<compile_context>
chip_gen: v5e
topology: v5e:2x2
jax: 0.10.0
libtpu: 0.0.40
codegen_flags: <defaults>
</compile_context>

<pallas_src>
import functools

import jax
import jax.numpy as jnp
from jax import lax
from jax.experimental import pallas as pl
from jax.experimental.pallas import tpu as pltpu

# ----------------------------- config (small) --------------------------------
VOCAB_SIZE = 512
MAX_POS = 128
D = 128           # hidden_size
H = 4             # num heads  -> head_dim = 32
L = 64            # sequence length
N_LAYERS = 2
FF = 4 * D        # MLP intermediate size
LN_EPS = 1e-5
NEG_INF = -1e9


# ------------------------------ kernel helpers --------------------------------
def _layernorm(x, w, b, eps):
    mu = jnp.mean(x, axis=-1, keepdims=True)
    xc = x - mu
    var = jnp.mean(xc * xc, axis=-1, keepdims=True)
    return xc * lax.rsqrt(var + eps) * w + b


def _gelu_new(x):
    # GPT-Neo uses the tanh ("new") GELU approximation.
    return 0.5 * x * (1.0 + jnp.tanh(0.7978845608028654 * (x + 0.044715 * x * x * x)))


# --------------------------- fused Pallas kernel -------------------------------
def gptneo_stack_kernel(alen_ref,                    # SMEM (1,) int32 (scalar prefetch)
                        hin_ref,                     # (L, D)   initial hidden state (f32)
                        ln1w_ref, ln1b_ref,          # (1, D)   layer l (f32)
                        wqkv_ref,                    # (D, 3D)  layer l, packed Q|K|V (bf16)
                        wo_ref, bo_ref,              # (D, D) bf16, (1, D) f32
                        ln2w_ref, ln2b_ref,          # (1, D)   f32
                        wfc_ref, bfc_ref,            # (D, FF) bf16, (1, FF) f32
                        wproj_ref, bproj_ref,        # (FF, D) bf16, (1, D) f32
                        lnfw_ref, lnfb_ref,          # (1, D)   final LN (f32)
                        o_ref,                       # (L, D)   output = resident residual stream
                        bias_sc,                     # VMEM (L, L) additive attn mask
                        *, num_heads):
    layer = pl.program_id(0)
    last = pl.num_programs(0) - 1
    seq, hid = o_ref.shape
    head_dim = hid // num_heads

    # ---- one-time init: seed residual stream, build causal+padding mask ----
    @pl.when(layer == 0)
    def _init():
        o_ref[...] = hin_ref[...]
        alen = alen_ref[0]
        row = lax.broadcasted_iota(jnp.int32, (seq, seq), 0)
        col = lax.broadcasted_iota(jnp.int32, (seq, seq), 1)
        keep = jnp.logical_and(col <= row, col < alen)
        bias_sc[...] = jnp.where(keep, 0.0, NEG_INF)

    h = o_ref[...]                                     # residual stream (f32)

    # ---- attention block ----
    x1 = _layernorm(h, ln1w_ref[...], ln1b_ref[...], LN_EPS)
    qkv = jnp.dot(x1.astype(jnp.bfloat16), wqkv_ref[...],
                  preferred_element_type=jnp.float32)          # (L, 3D) f32

    # Q as (H, L, hd); K/V as (H, hd, L) via one aligned lane slice + one
    # 2-D transpose + free leading-dim reshapes.
    q3 = jnp.stack(
        [qkv[:, hh * head_dim:(hh + 1) * head_dim] for hh in range(num_heads)],
        axis=0).astype(jnp.bfloat16)                            # (H, L, hd)
    kvT = qkv[:, hid:3 * hid].astype(jnp.bfloat16).T            # (2D, L)
    k3t = kvT[0:hid].reshape(num_heads, head_dim, seq)          # (H, hd, L)
    v3t = kvT[hid:2 * hid].reshape(num_heads, head_dim, seq)    # (H, hd, L)

    # GPT-Neo does NOT scale attention scores by 1/sqrt(head_dim).
    s = jnp.einsum("hqd,hdk->hqk", q3, k3t,
                   preferred_element_type=jnp.float32)          # (H, L, L) f32
    s = s + bias_sc[...]                                        # broadcast (L,L)
    m = jnp.max(s, axis=-1, keepdims=True)
    e = jnp.exp(s - m)
    p = (e * pl.reciprocal(jnp.sum(e, axis=-1, keepdims=True),
                           approx=True)).astype(jnp.bfloat16)   # (H, L, L) bf16

    # Context directly in (H, hd, L) so the head merge is a free reshape
    # plus one 2-D transpose; then ONE K=128 output projection.
    ctx3t = jnp.einsum("hek,hqk->heq", v3t, p,
                       preferred_element_type=jnp.float32)      # (H, hd, L)
    ctx = ctx3t.astype(jnp.bfloat16).reshape(hid, seq).T        # (L, D) bf16
    attn_out = jnp.dot(ctx, wo_ref[...],
                       preferred_element_type=jnp.float32) + bo_ref[...]
    h2 = h + attn_out

    # ---- MLP block ----
    x2 = _layernorm(h2, ln2w_ref[...], ln2b_ref[...], LN_EPS)
    fc = jnp.dot(x2.astype(jnp.bfloat16), wfc_ref[...],
                 preferred_element_type=jnp.float32) + bfc_ref[...]
    act = _gelu_new(fc)
    mlp_out = jnp.dot(act.astype(jnp.bfloat16), wproj_ref[...],
                      preferred_element_type=jnp.float32) + bproj_ref[...]
    h_new = h2 + mlp_out

    # ---- carry residual in the resident output block / finalize ----
    @pl.when(layer != last)
    def _carry():
        o_ref[...] = h_new

    @pl.when(layer == last)
    def _finalize():
        o_ref[...] = _layernorm(h_new, lnfw_ref[...], lnfb_ref[...], LN_EPS)


# ------------------------------ wrapper ----------------------------------------
def gptneo_fused_layers(hidden, actual_len, p):
    """hidden: (L, D) f32, actual_len: (1,) int32, p: packed param dict."""
    seq, hid = hidden.shape
    nl = p["wqkv"].shape[0]
    ff = p["wfc"].shape[2]

    grid_spec = pltpu.PrefetchScalarGridSpec(
        num_scalar_prefetch=1,
        grid=(nl,),
        in_specs=[
            pl.BlockSpec((seq, hid), lambda l, alen: (0, 0)),                 # hidden in
            pl.BlockSpec((None, 1, hid), lambda l, alen: (l, 0, 0)),          # ln1 w
            pl.BlockSpec((None, 1, hid), lambda l, alen: (l, 0, 0)),          # ln1 b
            pl.BlockSpec((None, hid, 3 * hid), lambda l, alen: (l, 0, 0)),    # wqkv (bf16)
            pl.BlockSpec((None, hid, hid), lambda l, alen: (l, 0, 0)),        # wo (bf16)
            pl.BlockSpec((None, 1, hid), lambda l, alen: (l, 0, 0)),          # bo
            pl.BlockSpec((None, 1, hid), lambda l, alen: (l, 0, 0)),          # ln2 w
            pl.BlockSpec((None, 1, hid), lambda l, alen: (l, 0, 0)),          # ln2 b
            pl.BlockSpec((None, hid, ff), lambda l, alen: (l, 0, 0)),         # wfc (bf16)
            pl.BlockSpec((None, 1, ff), lambda l, alen: (l, 0, 0)),           # bfc
            pl.BlockSpec((None, ff, hid), lambda l, alen: (l, 0, 0)),         # wproj (bf16)
            pl.BlockSpec((None, 1, hid), lambda l, alen: (l, 0, 0)),          # bproj
            pl.BlockSpec((1, hid), lambda l, alen: (0, 0)),                   # ln_f w
            pl.BlockSpec((1, hid), lambda l, alen: (0, 0)),                   # ln_f b
        ],
        out_specs=pl.BlockSpec((seq, hid), lambda l, alen: (0, 0)),           # resident residual
        scratch_shapes=[
            pltpu.VMEM((seq, seq), jnp.float32),   # additive attention mask
        ],
    )

    return pl.pallas_call(
        functools.partial(gptneo_stack_kernel, num_heads=H),
        out_shape=jax.ShapeDtypeStruct((seq, hid), jnp.float32),
        grid_spec=grid_spec,
        compiler_params=pltpu.CompilerParams(dimension_semantics=("arbitrary",)),
    )(
        actual_len,
        hidden,
        p["ln1_w"], p["ln1_b"],
        p["wqkv"],
        p["wo"], p["bo"],
        p["ln2_w"], p["ln2_b"],
        p["wfc"], p["bfc"],
        p["wproj"], p["bproj"],
        p["lnf_w"], p["lnf_b"],
    )


def gptneo_forward(input_ids, attention_mask, params):
    """input_ids: (1, L) int32, attention_mask: (1, L) int32 -> (1, L, D) f32."""
    # position_ids = cumsum(mask) - 1, clamped to 1 where mask == 0
    position_ids = jnp.cumsum(attention_mask.astype(jnp.int32), axis=-1) - 1
    position_ids = jnp.where(attention_mask == 0, 1, position_ids)

    inputs_embeds = jnp.take(params["wte"], input_ids, axis=0)        # (1, L, D)
    position_embeds = jnp.take(params["wpe"], position_ids, axis=0)   # (1, L, D)
    hidden = (inputs_embeds + position_embeds)[0]                     # (L, D)

    actual_len = jnp.sum(attention_mask).astype(jnp.int32).reshape(1)

    out = gptneo_fused_layers(hidden, actual_len, params)
    return out[None, :, :]


# ----------------------------- param init / packing ----------------------------
def init_raw_params(key):
    """Random params in the PyTorch (out_features, in_features) layout."""
    keys = jax.random.split(key, 3 + N_LAYERS)
    params = {
        "wte": 0.02 * jax.random.normal(keys[0], (VOCAB_SIZE, D), jnp.float32),
        "wpe": 0.02 * jax.random.normal(keys[1], (MAX_POS, D), jnp.float32),
        "ln_f_weight": jnp.ones((D,), jnp.float32),
        "ln_f_bias": jnp.zeros((D,), jnp.float32),
        "layers": {},
    }
    for layer in range(1, N_LAYERS + 1):
        lk = jax.random.split(keys[2 + layer], 6)
        params["layers"][layer] = {
            "ln1_weight": jnp.ones((D,), jnp.float32),
            "ln1_bias": jnp.zeros((D,), jnp.float32),
            "q_proj_weight": 0.02 * jax.random.normal(lk[0], (D, D), jnp.float32),
            "k_proj_weight": 0.02 * jax.random.normal(lk[1], (D, D), jnp.float32),
            "v_proj_weight": 0.02 * jax.random.normal(lk[2], (D, D), jnp.float32),
            "out_proj_weight": 0.02 * jax.random.normal(lk[3], (D, D), jnp.float32),
            "out_proj_bias": jnp.zeros((D,), jnp.float32),
            "ln2_weight": jnp.ones((D,), jnp.float32),
            "ln2_bias": jnp.zeros((D,), jnp.float32),
            "mlp_fc_weight": 0.02 * jax.random.normal(lk[4], (FF, D), jnp.float32),
            "mlp_fc_bias": jnp.zeros((FF,), jnp.float32),
            "mlp_proj_weight": 0.02 * jax.random.normal(lk[5], (D, FF), jnp.float32),
            "mlp_proj_bias": jnp.zeros((D,), jnp.float32),
        }
    return params


def pack_params(raw):
    """One-time: transpose to (in, out), pack QKV, stack per-layer, cast matmul
    weights to bf16 (f32 accumulation stays inside the kernel)."""
    layers = [raw["layers"][i] for i in range(1, N_LAYERS + 1)]

    def stk(fn):
        return jnp.stack([fn(p) for p in layers], axis=0)

    return {
        "wte": raw["wte"],
        "wpe": raw["wpe"],
        "ln1_w": stk(lambda p: p["ln1_weight"].reshape(1, D)),
        "ln1_b": stk(lambda p: p["ln1_bias"].reshape(1, D)),
        "wqkv": stk(lambda p: jnp.concatenate(
            [p["q_proj_weight"].T, p["k_proj_weight"].T, p["v_proj_weight"].T],
            axis=1)).astype(jnp.bfloat16),
        "wo": stk(lambda p: p["out_proj_weight"].T).astype(jnp.bfloat16),
        "bo": stk(lambda p: p["out_proj_bias"].reshape(1, D)),
        "ln2_w": stk(lambda p: p["ln2_weight"].reshape(1, D)),
        "ln2_b": stk(lambda p: p["ln2_bias"].reshape(1, D)),
        "wfc": stk(lambda p: p["mlp_fc_weight"].T).astype(jnp.bfloat16),
        "bfc": stk(lambda p: p["mlp_fc_bias"].reshape(1, FF)),
        "wproj": stk(lambda p: p["mlp_proj_weight"].T).astype(jnp.bfloat16),
        "bproj": stk(lambda p: p["mlp_proj_bias"].reshape(1, D)),
        "lnf_w": raw["ln_f_weight"].reshape(1, D),
        "lnf_b": raw["ln_f_bias"].reshape(1, D),
    }


# --------------------------------- main ----------------------------------------
if __name__ == "__main__":
    key = jax.random.PRNGKey(0)
    pkey, ikey = jax.random.split(key)
    raw_params = init_raw_params(pkey)
    params = pack_params(raw_params)     # pre-transpose / pack / bf16-cast ONCE

    input_ids = jax.random.randint(ikey, (1, L), 0, VOCAB_SIZE, dtype=jnp.int32)
    actual_length = 40
    attention_mask = (jnp.arange(L) < actual_length).astype(jnp.int32)[None, :]

    fwd = jax.jit(gptneo_forward)
    out = fwd(input_ids, attention_mask, params)
    out = jax.block_until_ready(out)

    assert out.shape == (1, L, D), out.shape
    assert bool(jnp.all(jnp.isfinite(out)))
    print("KERNEL_OK")
</pallas_src>

<mosaic_0001>
module attributes {stable_mosaic.version = 11 : i64} {
  func.func @gptneo_stack_kernel(%arg0: i32, %arg1: memref<1xi32, #tpu.memory_space<smem>>, %arg2: memref<64x128xf32, #tpu.memory_space<vmem>>, %arg3: memref<1x1x128xf32, #tpu.memory_space<vmem>>, %arg4: memref<1x1x128xf32, #tpu.memory_space<vmem>>, %arg5: memref<1x128x384xbf16, #tpu.memory_space<vmem>>, %arg6: memref<1x128x128xbf16, #tpu.memory_space<vmem>>, %arg7: memref<1x1x128xf32, #tpu.memory_space<vmem>>, %arg8: memref<1x1x128xf32, #tpu.memory_space<vmem>>, %arg9: memref<1x1x128xf32, #tpu.memory_space<vmem>>, %arg10: memref<1x128x512xbf16, #tpu.memory_space<vmem>>, %arg11: memref<1x1x512xf32, #tpu.memory_space<vmem>>, %arg12: memref<1x512x128xbf16, #tpu.memory_space<vmem>>, %arg13: memref<1x1x128xf32, #tpu.memory_space<vmem>>, %arg14: memref<1x128xf32, #tpu.memory_space<vmem>>, %arg15: memref<1x128xf32, #tpu.memory_space<vmem>>, %arg16: memref<64x128xf32, #tpu.memory_space<vmem>>, %arg17: memref<64x64xf32, #tpu.memory_space<vmem>>) attributes {dimension_semantics = [#tpu.dimension_semantics<arbitrary>], iteration_bounds = array<i64: 2>, scalar_prefetch = 1 : i64, scratch_operands = 1 : i64, tpu.core_type = #tpu.core_type<tc>, window_params = [{pipeline_mode = #tpu.pipeline_mode<synchronous>, transform_indices = @transform_0, window_bounds = array<i64: 64, 128>}, {transform_indices = @transform_1, window_bounds = array<i64: 1, 1, 128>}, {transform_indices = @transform_2, window_bounds = array<i64: 1, 1, 128>}, {transform_indices = @transform_3, window_bounds = array<i64: 1, 128, 384>}, {transform_indices = @transform_4, window_bounds = array<i64: 1, 128, 128>}, {transform_indices = @transform_5, window_bounds = array<i64: 1, 1, 128>}, {transform_indices = @transform_6, window_bounds = array<i64: 1, 1, 128>}, {transform_indices = @transform_7, window_bounds = array<i64: 1, 1, 128>}, {transform_indices = @transform_8, window_bounds = array<i64: 1, 128, 512>}, {transform_indices = @transform_9, window_bounds = array<i64: 1, 1, 512>}, {transform_indices = @transform_10, window_bounds = array<i64: 1, 512, 128>}, {transform_indices = @transform_11, window_bounds = array<i64: 1, 1, 128>}, {pipeline_mode = #tpu.pipeline_mode<synchronous>, transform_indices = @transform_12, window_bounds = array<i64: 1, 128>}, {pipeline_mode = #tpu.pipeline_mode<synchronous>, transform_indices = @transform_13, window_bounds = array<i64: 1, 128>}, {pipeline_mode = #tpu.pipeline_mode<synchronous>, transform_indices = @transform_14, window_bounds = array<i64: 64, 128>}]} {
    %c0_i32 = arith.constant 0 : i32
    %0 = arith.cmpi eq, %arg0, %c0_i32 : i32
    %1 = arith.extui %0 : i1 to i32
    %c0_i32_0 = arith.constant 0 : i32
    %2 = arith.cmpi ne, %1, %c0_i32_0 : i32
    scf.if %2 {
      %c0_61 = arith.constant 0 : index
      %c0_62 = arith.constant 0 : index
      %137 = vector.load %arg2[%c0_61, %c0_62] : memref<64x128xf32, #tpu.memory_space<vmem>>, vector<64x128xf32>
      %c0_63 = arith.constant 0 : index
      %c0_64 = arith.constant 0 : index
      %138 = vector.load %arg16[%c0_63, %c0_64] : memref<64x128xf32, #tpu.memory_space<vmem>>, vector<64x128xf32>
      tpu.vector_store %arg16[%c0_63, %c0_64], %137 {strides = array<i32>} : memref<64x128xf32, #tpu.memory_space<vmem>>, vector<64x128xf32>,
      %c0_65 = arith.constant 0 : index
      %139 = memref.load %arg1[%c0_65] : memref<1xi32, #tpu.memory_space<smem>>
      %140 = tpu.iota {dimensions = array<i32: 0>} : vector<64x64xi32>
      %141 = tpu.iota {dimensions = array<i32: 1>} : vector<64x64xi32>
      %142 = arith.cmpi sle, %141, %140 : vector<64x64xi32>
      %143 = vector.broadcast %139 : i32 to vector<64x64xi32>
      %144 = arith.cmpi slt, %141, %143 : vector<64x64xi32>
      %145 = arith.andi %142, %144 : vector<64x64xi1>
      %cst_66 = arith.constant 0.000000e+00 : f32
      %cst_67 = arith.constant -1.000000e+09 : f32
      %146 = vector.broadcast %cst_66 : f32 to vector<64x64xf32>
      %147 = vector.broadcast %cst_67 : f32 to vector<64x64xf32>
      %148 = arith.select %145, %146, %147 : vector<64x64xi1>, vector<64x64xf32>
      %c0_68 = arith.constant 0 : index
      %c0_69 = arith.constant 0 : index
      %149 = vector.load %arg17[%c0_68, %c0_69] : memref<64x64xf32, #tpu.memory_space<vmem>>, vector<64x64xf32>
      tpu.vector_store %arg17[%c0_68, %c0_69], %148 {strides = array<i32>} : memref<64x64xf32, #tpu.memory_space<vmem>>, vector<64x64xf32>,
    } else {
    }
    %c0 = arith.constant 0 : index
    %c0_1 = arith.constant 0 : index
    %3 = vector.load %arg16[%c0, %c0_1] : memref<64x128xf32, #tpu.memory_space<vmem>>, vector<64x128xf32>
    %c0_2 = arith.constant 0 : index
    %c0_3 = arith.constant 0 : index
    %c0_4 = arith.constant 0 : index
    %4 = vector.load %arg3[%c0_2, %c0_3, %c0_4] : memref<1x1x128xf32, #tpu.memory_space<vmem>>, vector<1x1x128xf32>
    %5 = vector.shape_cast %4 : vector<1x1x128xf32> to vector<1x128xf32>
    %c0_5 = arith.constant 0 : index
    %c0_6 = arith.constant 0 : index
    %c0_7 = arith.constant 0 : index
    %6 = vector.load %arg4[%c0_5, %c0_6, %c0_7] : memref<1x1x128xf32, #tpu.memory_space<vmem>>, vector<1x1x128xf32>
    %7 = vector.shape_cast %6 : vector<1x1x128xf32> to vector<1x128xf32>
    %cst = arith.constant dense<0.000000e+00> : vector<64xf32>
    %8 = vector.multi_reduction <add>, %3, %cst [1] : vector<64x128xf32> to vector<64xf32>
    %9 = vector.shape_cast %8 : vector<64xf32> to vector<64x1xf32>
    %cst_8 = arith.constant 1.280000e+02 : f32
    %10 = vector.broadcast %cst_8 : f32 to vector<64x1xf32>
    %11 = arith.divf %9, %10 : vector<64x1xf32>
    %12 = vector.broadcast %11 : vector<64x1xf32> to vector<64x128xf32>
    %13 = arith.subf %3, %12 : vector<64x128xf32>
    %14 = arith.mulf %13, %13 : vector<64x128xf32>
    %cst_9 = arith.constant dense<0.000000e+00> : vector<64xf32>
    %15 = vector.multi_reduction <add>, %14, %cst_9 [1] : vector<64x128xf32> to vector<64xf32>
    %16 = vector.shape_cast %15 : vector<64xf32> to vector<64x1xf32>
    %cst_10 = arith.constant 1.280000e+02 : f32
    %17 = vector.broadcast %cst_10 : f32 to vector<64x1xf32>
    %18 = arith.divf %16, %17 : vector<64x1xf32>
    %cst_11 = arith.constant 9.99999974E-6 : f32
    %19 = vector.broadcast %cst_11 : f32 to vector<64x1xf32>
    %20 = arith.addf %18, %19 : vector<64x1xf32>
    %21 = math.rsqrt %20 : vector<64x1xf32>
    %22 = vector.broadcast %21 : vector<64x1xf32> to vector<64x128xf32>
    %23 = arith.mulf %13, %22 : vector<64x128xf32>
    %24 = vector.broadcast %5 : vector<1x128xf32> to vector<64x128xf32>
    %25 = arith.mulf %23, %24 : vector<64x128xf32>
    %26 = vector.broadcast %7 : vector<1x128xf32> to vector<64x128xf32>
    %27 = arith.addf %25, %26 : vector<64x128xf32>
    %28 = arith.truncf %27 : vector<64x128xf32> to vector<64x128xbf16>
    %c0_12 = arith.constant 0 : index
    %c0_13 = arith.constant 0 : index
    %c0_14 = arith.constant 0 : index
    %29 = vector.load %arg5[%c0_12, %c0_13, %c0_14] : memref<1x128x384xbf16, #tpu.memory_space<vmem>>, vector<1x128x384xbf16>
    %30 = vector.shape_cast %29 : vector<1x128x384xbf16> to vector<128x384xbf16>
    %cst_15 = arith.constant dense<0.000000e+00> : vector<64x384xf32>
    %31 = tpu.matmul %28, %30, %cst_15 {dimension_numbers = #tpu.dot_dimension_numbers<[1], [0], [0], [1], [0, 0, 1, 1], [], []>} : vector<64x128xbf16>, vector<128x384xbf16>, vector<64x384xf32> -> vector<64x384xf32>
    %32 = vector.extract_strided_slice %31 {offsets = [0, 0], sizes = [64, 32], strides = [1, 1]} : vector<64x384xf32> to vector<64x32xf32>
    %33 = vector.extract_strided_slice %31 {offsets = [0, 32], sizes = [64, 32], strides = [1, 1]} : vector<64x384xf32> to vector<64x32xf32>
    %34 = vector.extract_strided_slice %31 {offsets = [0, 64], sizes = [64, 32], strides = [1, 1]} : vector<64x384xf32> to vector<64x32xf32>
    %35 = vector.extract_strided_slice %31 {offsets = [0, 96], sizes = [64, 32], strides = [1, 1]} : vector<64x384xf32> to vector<64x32xf32>
    %36 = vector.shape_cast %32 : vector<64x32xf32> to vector<1x64x32xf32>
    %37 = vector.shape_cast %33 : vector<64x32xf32> to vector<1x64x32xf32>
    %38 = vector.shape_cast %34 : vector<64x32xf32> to vector<1x64x32xf32>
    %39 = vector.shape_cast %35 : vector<64x32xf32> to vector<1x64x32xf32>
    %40 = tpu.concatenate %36, %37, %38, %39 in 0 : vector<1x64x32xf32>, vector<1x64x32xf32>, vector<1x64x32xf32>, vector<1x64x32xf32> -> vector<4x64x32xf32>
    %41 = arith.truncf %40 : vector<4x64x32xf32> to vector<4x64x32xbf16>
    %42 = vector.extract_strided_slice %31 {offsets = [0, 128], sizes = [64, 256], strides = [1, 1]} : vector<64x384xf32> to vector<64x256xf32>
    %43 = arith.truncf %42 : vector<64x256xf32> to vector<64x256xbf16>
    %44 = tpu.transpose %43, [1, 0] : vector<64x256xbf16> -> vector<256x64xbf16>
    %45 = vector.extract_strided_slice %44 {offsets = [0, 0], sizes = [128, 64], strides = [1, 1]} : vector<256x64xbf16> to vector<128x64xbf16>
    %46 = vector.shape_cast %45 : vector<128x64xbf16> to vector<4x32x64xbf16>
    %47 = vector.extract_strided_slice %44 {offsets = [128, 0], sizes = [128, 64], strides = [1, 1]} : vector<256x64xbf16> to vector<128x64xbf16>
    %48 = vector.shape_cast %47 : vector<128x64xbf16> to vector<4x32x64xbf16>
    "tpu.trace_start"() <{level = 10 : i32, message = "hqd,hdk->hqk"}> : () -> ()
    %cst_16 = arith.constant dense<0.000000e+00> : vector<4x64x64xf32>
    %49 = tpu.matmul %41, %46, %cst_16 {dimension_numbers = #tpu.dot_dimension_numbers<[2], [1], [1], [2], [0, 0, 0, 1, 1, 2], [0], [0]>} : vector<4x64x32xbf16>, vector<4x32x64xbf16>, vector<4x64x64xf32> -> vector<4x64x64xf32>
    "tpu.trace_stop"() : () -> ()
    %c0_17 = arith.constant 0 : index
    %c0_18 = arith.constant 0 : index
    %50 = vector.load %arg17[%c0_17, %c0_18] : memref<64x64xf32, #tpu.memory_space<vmem>>, vector<64x64xf32>
    %51 = vector.shape_cast %50 : vector<64x64xf32> to vector<1x64x64xf32>
    %52 = vector.broadcast %51 : vector<1x64x64xf32> to vector<4x64x64xf32>
    %53 = arith.addf %49, %52 : vector<4x64x64xf32>
    %cst_19 = arith.constant dense<0xFF800000> : vector<4x64xf32>
    %54 = vector.multi_reduction <maximumf>, %53, %cst_19 [2] : vector<4x64x64xf32> to vector<4x64xf32>
    %55 = vector.shape_cast %54 : vector<4x64xf32> to vector<4x64x1xf32>
    %56 = vector.broadcast %55 : vector<4x64x1xf32> to vector<4x64x64xf32>
    %57 = arith.subf %53, %56 : vector<4x64x64xf32>
    %58 = math.exp %57 : vector<4x64x64xf32>
    %cst_20 = arith.constant dense<0.000000e+00> : vector<4x64xf32>
    %59 = vector.multi_reduction <add>, %58, %cst_20 [2] : vector<4x64x64xf32> to vector<4x64xf32>
    %60 = vector.shape_cast %59 : vector<4x64xf32> to vector<4x64x1xf32>
    %61 = tpu.reciprocal %60 {approx = true} : vector<4x64x1xf32> -> vector<4x64x1xf32>
    %62 = vector.broadcast %61 : vector<4x64x1xf32> to vector<4x64x64xf32>
    %63 = arith.mulf %58, %62 : vector<4x64x64xf32>
    %64 = arith.truncf %63 : vector<4x64x64xf32> to vector<4x64x64xbf16>
    "tpu.trace_start"() <{level = 10 : i32, message = "hek,hqk->heq"}> : () -> ()
    %cst_21 = arith.constant dense<0.000000e+00> : vector<4x32x64xf32>
    %65 = tpu.matmul %48, %64, %cst_21 {dimension_numbers = #tpu.dot_dimension_numbers<[2], [2], [1], [1], [0, 0, 0, 1, 1, 1], [0], [0]>} : vector<4x32x64xbf16>, vector<4x64x64xbf16>, vector<4x32x64xf32> -> vector<4x32x64xf32>
    "tpu.trace_stop"() : () -> ()
    %66 = arith.truncf %65 : vector<4x32x64xf32> to vector<4x32x64xbf16>
    %67 = vector.shape_cast %66 : vector<4x32x64xbf16> to vector<128x64xbf16>
    %68 = tpu.transpose %67, [1, 0] : vector<128x64xbf16> -> vector<64x128xbf16>
    %c0_22 = arith.constant 0 : index
    %c0_23 = arith.constant 0 : index
    %c0_24 = arith.constant 0 : index
    %69 = vector.load %arg6[%c0_22, %c0_23, %c0_24] : memref<1x128x128xbf16, #tpu.memory_space<vmem>>, vector<1x128x128xbf16>
    %70 = vector.shape_cast %69 : vector<1x128x128xbf16> to vector<128x128xbf16>
    %cst_25 = arith.constant dense<0.000000e+00> : vector<64x128xf32>
    %71 = tpu.matmul %68, %70, %cst_25 {dimension_numbers = #tpu.dot_dimension_numbers<[1], [0], [0], [1], [0, 0, 1, 1], [], []>} : vector<64x128xbf16>, vector<128x128xbf16>, vector<64x128xf32> -> vector<64x128xf32>
    %c0_26 = arith.constant 0 : index
    %c0_27 = arith.constant 0 : index
    %c0_28 = arith.constant 0 : index
    %72 = vector.load %arg7[%c0_26, %c0_27, %c0_28] : memref<1x1x128xf32, #tpu.memory_space<vmem>>, vector<1x1x128xf32>
    %73 = vector.shape_cast %72 : vector<1x1x128xf32> to vector<1x128xf32>
    %74 = vector.broadcast %73 : vector<1x128xf32> to vector<64x128xf32>
    %75 = arith.addf %71, %74 : vector<64x128xf32>
    %76 = arith.addf %3, %75 : vector<64x128xf32>
    %c0_29 = arith.constant 0 : index
    %c0_30 = arith.constant 0 : index
    %c0_31 = arith.constant 0 : index
    %77 = vector.load %arg8[%c0_29, %c0_30, %c0_31] : memref<1x1x128xf32, #tpu.memory_space<vmem>>, vector<1x1x128xf32>
    %78 = vector.shape_cast %77 : vector<1x1x128xf32> to vector<1x128xf32>
    %c0_32 = arith.constant 0 : index
    %c0_33 = arith.constant 0 : index
    %c0_34 = arith.constant 0 : index
    %79 = vector.load %arg9[%c0_32, %c0_33, %c0_34] : memref<1x1x128xf32, #tpu.memory_space<vmem>>, vector<1x1x128xf32>
    %80 = vector.shape_cast %79 : vector<1x1x128xf32> to vector<1x128xf32>
    %cst_35 = arith.constant dense<0.000000e+00> : vector<64xf32>
    %81 = vector.multi_reduction <add>, %76, %cst_35 [1] : vector<64x128xf32> to vector<64xf32>
    %82 = vector.shape_cast %81 : vector<64xf32> to vector<64x1xf32>
    %cst_36 = arith.constant 1.280000e+02 : f32
    %83 = vector.broadcast %cst_36 : f32 to vector<64x1xf32>
    %84 = arith.divf %82, %83 : vector<64x1xf32>
    %85 = vector.broadcast %84 : vector<64x1xf32> to vector<64x128xf32>
    %86 = arith.subf %76, %85 : vector<64x128xf32>
    %87 = arith.mulf %86, %86 : vector<64x128xf32>
    %cst_37 = arith.constant dense<0.000000e+00> : vector<64xf32>
    %88 = vector.multi_reduction <add>, %87, %cst_37 [1] : vector<64x128xf32> to vector<64xf32>
    %89 = vector.shape_cast %88 : vector<64xf32> to vector<64x1xf32>
    %cst_38 = arith.constant 1.280000e+02 : f32
    %90 = vector.broadcast %cst_38 : f32 to vector<64x1xf32>
    %91 = arith.divf %89, %90 : vector<64x1xf32>
    %cst_39 = arith.constant 9.99999974E-6 : f32
    %92 = vector.broadcast %cst_39 : f32 to vector<64x1xf32>
    %93 = arith.addf %91, %92 : vector<64x1xf32>
    %94 = math.rsqrt %93 : vector<64x1xf32>
    %95 = vector.broadcast %94 : vector<64x1xf32> to vector<64x128xf32>
    %96 = arith.mulf %86, %95 : vector<64x128xf32>
    %97 = vector.broadcast %78 : vector<1x128xf32> to vector<64x128xf32>
    %98 = arith.mulf %96, %97 : vector<64x128xf32>
    %99 = vector.broadcast %80 : vector<1x128xf32> to vector<64x128xf32>
    %100 = arith.addf %98, %99 : vector<64x128xf32>
    %101 = arith.truncf %100 : vector<64x128xf32> to vector<64x128xbf16>
    %c0_40 = arith.constant 0 : index
    %c0_41 = arith.constant 0 : index
    %c0_42 = arith.constant 0 : index
    %102 = vector.load %arg10[%c0_40, %c0_41, %c0_42] : memref<1x128x512xbf16, #tpu.memory_space<vmem>>, vector<1x128x512xbf16>
    %103 = vector.shape_cast %102 : vector<1x128x512xbf16> to vector<128x512xbf16>
    %cst_43 = arith.constant dense<0.000000e+00> : vector<64x512xf32>
    %104 = tpu.matmul %101, %103, %cst_43 {dimension_numbers = #tpu.dot_dimension_numbers<[1], [0], [0], [1], [0, 0, 1, 1], [], []>} : vector<64x128xbf16>, vector<128x512xbf16>, vector<64x512xf32> -> vector<64x512xf32>
    %c0_44 = arith.constant 0 : index
    %c0_45 = arith.constant 0 : index
    %c0_46 = arith.constant 0 : index
    %105 = vector.load %arg11[%c0_44, %c0_45, %c0_46] : memref<1x1x512xf32, #tpu.memory_space<vmem>>, vector<1x1x512xf32>
    %106 = vector.shape_cast %105 : vector<1x1x512xf32> to vector<1x512xf32>
    %107 = vector.broadcast %106 : vector<1x512xf32> to vector<64x512xf32>
    %108 = arith.addf %104, %107 : vector<64x512xf32>
    %cst_47 = arith.constant 5.000000e-01 : f32
    %109 = vector.broadcast %cst_47 : f32 to vector<64x512xf32>
    %110 = arith.mulf %109, %108 : vector<64x512xf32>
    %cst_48 = arith.constant 4.471500e-02 : f32
    %111 = vector.broadcast %cst_48 : f32 to vector<64x512xf32>
    %112 = arith.mulf %111, %108 : vector<64x512xf32>
    %113 = arith.mulf %112, %108 : vector<64x512xf32>
    %114 = arith.mulf %113, %108 : vector<64x512xf32>
    %115 = arith.addf %108, %114 : vector<64x512xf32>
    %cst_49 = arith.constant 0.797884583 : f32
    %116 = vector.broadcast %cst_49 : f32 to vector<64x512xf32>
    %117 = arith.mulf %116, %115 : vector<64x512xf32>
    %118 = math.tanh %117 : vector<64x512xf32>
    %cst_50 = arith.constant 1.000000e+00 : f32
    %119 = vector.broadcast %cst_50 : f32 to vector<64x512xf32>
    %120 = arith.addf %119, %118 : vector<64x512xf32>
    %121 = arith.mulf %110, %120 : vector<64x512xf32>
    %122 = arith.truncf %121 : vector<64x512xf32> to vector<64x512xbf16>
    %c0_51 = arith.constant 0 : index
    %c0_52 = arith.constant 0 : index
    %c0_53 = arith.constant 0 : index
    %123 = vector.load %arg12[%c0_51, %c0_52, %c0_53] : memref<1x512x128xbf16, #tpu.memory_space<vmem>>, vector<1x512x128xbf16>
    %124 = vector.shape_cast %123 : vector<1x512x128xbf16> to vector<512x128xbf16>
    %cst_54 = arith.constant dense<0.000000e+00> : vector<64x128xf32>
    %125 = tpu.matmul %122, %124, %cst_54 {dimension_numbers = #tpu.dot_dimension_numbers<[1], [0], [0], [1], [0, 0, 1, 1], [], []>} : vector<64x512xbf16>, vector<512x128xbf16>, vector<64x128xf32> -> vector<64x128xf32>
    %c0_55 = arith.constant 0 : index
    %c0_56 = arith.constant 0 : index
    %c0_57 = arith.constant 0 : index
    %126 = vector.load %arg13[%c0_55, %c0_56, %c0_57] : memref<1x1x128xf32, #tpu.memory_space<vmem>>, vector<1x1x128xf32>
    %127 = vector.shape_cast %126 : vector<1x1x128xf32> to vector<1x128xf32>
    %128 = vector.broadcast %127 : vector<1x128xf32> to vector<64x128xf32>
    %129 = arith.addf %125, %128 : vector<64x128xf32>
    %130 = arith.addf %76, %129 : vector<64x128xf32>
    %c1_i32 = arith.constant 1 : i32
    %131 = arith.cmpi ne, %arg0, %c1_i32 : i32
    %132 = arith.extui %131 : i1 to i32
    %c0_i32_58 = arith.constant 0 : i32
    %133 = arith.cmpi ne, %132, %c0_i32_58 : i32
    scf.if %133 {
      %c0_61 = arith.constant 0 : index
      %c0_62 = arith.constant 0 : index
      %137 = vector.load %arg16[%c0_61, %c0_62] : memref<64x128xf32, #tpu.memory_space<vmem>>, vector<64x128xf32>
      tpu.vector_store %arg16[%c0_61, %c0_62], %130 {strides = array<i32>} : memref<64x128xf32, #tpu.memory_space<vmem>>, vector<64x128xf32>,
    } else {
    }
    %c1_i32_59 = arith.constant 1 : i32
    %134 = arith.cmpi eq, %arg0, %c1_i32_59 : i32
    %135 = arith.extui %134 : i1 to i32
    %c0_i32_60 = arith.constant 0 : i32
    %136 = arith.cmpi ne, %135, %c0_i32_60 : i32
    scf.if %136 {
      %c0_61 = arith.constant 0 : index
      %c0_62 = arith.constant 0 : index
      %137 = vector.load %arg14[%c0_61, %c0_62] : memref<1x128xf32, #tpu.memory_space<vmem>>, vector<1x128xf32>
      %c0_63 = arith.constant 0 : index
      %c0_64 = arith.constant 0 : index
      %138 = vector.load %arg15[%c0_63, %c0_64] : memref<1x128xf32, #tpu.memory_space<vmem>>, vector<1x128xf32>
      %cst_65 = arith.constant dense<0.000000e+00> : vector<64xf32>
      %139 = vector.multi_reduction <add>, %130, %cst_65 [1] : vector<64x128xf32> to vector<64xf32>
      %140 = vector.shape_cast %139 : vector<64xf32> to vector<64x1xf32>
      %cst_66 = arith.constant 1.280000e+02 : f32
      %141 = vector.broadcast %cst_66 : f32 to vector<64x1xf32>
      %142 = arith.divf %140, %141 : vector<64x1xf32>
      %143 = vector.broadcast %142 : vector<64x1xf32> to vector<64x128xf32>
      %144 = arith.subf %130, %143 : vector<64x128xf32>
      %145 = arith.mulf %144, %144 : vector<64x128xf32>
      %cst_67 = arith.constant dense<0.000000e+00> : vector<64xf32>
      %146 = vector.multi_reduction <add>, %145, %cst_67 [1] : vector<64x128xf32> to vector<64xf32>
      %147 = vector.shape_cast %146 : vector<64xf32> to vector<64x1xf32>
      %cst_68 = arith.constant 1.280000e+02 : f32
      %148 = vector.broadcast %cst_68 : f32 to vector<64x1xf32>
      %149 = arith.divf %147, %148 : vector<64x1xf32>
      %cst_69 = arith.constant 9.99999974E-6 : f32
      %150 = vector.broadcast %cst_69 : f32 to vector<64x1xf32>
      %151 = arith.addf %149, %150 : vector<64x1xf32>
      %152 = math.rsqrt %151 : vector<64x1xf32>
      %153 = vector.broadcast %152 : vector<64x1xf32> to vector<64x128xf32>
      %154 = arith.mulf %144, %153 : vector<64x128xf32>
      %155 = vector.broadcast %137 : vector<1x128xf32> to vector<64x128xf32>
      %156 = arith.mulf %154, %155 : vector<64x128xf32>
      %157 = vector.broadcast %138 : vector<1x128xf32> to vector<64x128xf32>
      %158 = arith.addf %156, %157 : vector<64x128xf32>
      %c0_70 = arith.constant 0 : index
      %c0_71 = arith.constant 0 : index
      %159 = vector.load %arg16[%c0_70, %c0_71] : memref<64x128xf32, #tpu.memory_space<vmem>>, vector<64x128xf32>
      tpu.vector_store %arg16[%c0_70, %c0_71], %158 {strides = array<i32>} : memref<64x128xf32, #tpu.memory_space<vmem>>, vector<64x128xf32>,
    } else {
    }
    return
  }
  func.func @transform_0(%arg0: i32, %arg1: memref<1xi32, #tpu.memory_space<smem>>) -> (i32, i32) {
    %c0_i32 = arith.constant 0 : i32
    %c0_i32_0 = arith.constant 0 : i32
    %c0_i32_1 = arith.constant 0 : i32
    return %c0_i32, %c0_i32_0 : i32, i32
  }
  func.func @transform_1(%arg0: i32, %arg1: memref<1xi32, #tpu.memory_space<smem>>) -> (i32, i32, i32) {
    %c0_i32 = arith.constant 0 : i32
    %c0_i32_0 = arith.constant 0 : i32
    %c0_i32_1 = arith.constant 0 : i32
    return %arg0, %c0_i32, %c0_i32_0 : i32, i32, i32
  }
  func.func @transform_2(%arg0: i32, %arg1: memref<1xi32, #tpu.memory_space<smem>>) -> (i32, i32, i32) {
    %c0_i32 = arith.constant 0 : i32
    %c0_i32_0 = arith.constant 0 : i32
    %c0_i32_1 = arith.constant 0 : i32
    return %arg0, %c0_i32, %c0_i32_0 : i32, i32, i32
  }
  func.func @transform_3(%arg0: i32, %arg1: memref<1xi32, #tpu.memory_space<smem>>) -> (i32, i32, i32) {
    %c0_i32 = arith.constant 0 : i32
    %c0_i32_0 = arith.constant 0 : i32
    %c0_i32_1 = arith.constant 0 : i32
    return %arg0, %c0_i32, %c0_i32_0 : i32, i32, i32
  }
  func.func @transform_4(%arg0: i32, %arg1: memref<1xi32, #tpu.memory_space<smem>>) -> (i32, i32, i32) {
    %c0_i32 = arith.constant 0 : i32
    %c0_i32_0 = arith.constant 0 : i32
    %c0_i32_1 = arith.constant 0 : i32
    return %arg0, %c0_i32, %c0_i32_0 : i32, i32, i32
  }
  func.func @transform_5(%arg0: i32, %arg1: memref<1xi32, #tpu.memory_space<smem>>) -> (i32, i32, i32) {
    %c0_i32 = arith.constant 0 : i32
    %c0_i32_0 = arith.constant 0 : i32
    %c0_i32_1 = arith.constant 0 : i32
    return %arg0, %c0_i32, %c0_i32_0 : i32, i32, i32
  }
  func.func @transform_6(%arg0: i32, %arg1: memref<1xi32, #tpu.memory_space<smem>>) -> (i32, i32, i32) {
    %c0_i32 = arith.constant 0 : i32
    %c0_i32_0 = arith.constant 0 : i32
    %c0_i32_1 = arith.constant 0 : i32
    return %arg0, %c0_i32, %c0_i32_0 : i32, i32, i32
  }
  func.func @transform_7(%arg0: i32, %arg1: memref<1xi32, #tpu.memory_space<smem>>) -> (i32, i32, i32) {
    %c0_i32 = arith.constant 0 : i32
    %c0_i32_0 = arith.constant 0 : i32
    %c0_i32_1 = arith.constant 0 : i32
    return %arg0, %c0_i32, %c0_i32_0 : i32, i32, i32
  }
  func.func @transform_8(%arg0: i32, %arg1: memref<1xi32, #tpu.memory_space<smem>>) -> (i32, i32, i32) {
    %c0_i32 = arith.constant 0 : i32
    %c0_i32_0 = arith.constant 0 : i32
    %c0_i32_1 = arith.constant 0 : i32
    return %arg0, %c0_i32, %c0_i32_0 : i32, i32, i32
  }
  func.func @transform_9(%arg0: i32, %arg1: memref<1xi32, #tpu.memory_space<smem>>) -> (i32, i32, i32) {
    %c0_i32 = arith.constant 0 : i32
    %c0_i32_0 = arith.constant 0 : i32
    %c0_i32_1 = arith.constant 0 : i32
    return %arg0, %c0_i32, %c0_i32_0 : i32, i32, i32
  }
  func.func @transform_10(%arg0: i32, %arg1: memref<1xi32, #tpu.memory_space<smem>>) -> (i32, i32, i32) {
    %c0_i32 = arith.constant 0 : i32
    %c0_i32_0 = arith.constant 0 : i32
    %c0_i32_1 = arith.constant 0 : i32
    return %arg0, %c0_i32, %c0_i32_0 : i32, i32, i32
  }
  func.func @transform_11(%arg0: i32, %arg1: memref<1xi32, #tpu.memory_space<smem>>) -> (i32, i32, i32) {
    %c0_i32 = arith.constant 0 : i32
    %c0_i32_0 = arith.constant 0 : i32
    %c0_i32_1 = arith.constant 0 : i32
    return %arg0, %c0_i32, %c0_i32_0 : i32, i32, i32
  }
  func.func @transform_12(%arg0: i32, %arg1: memref<1xi32, #tpu.memory_space<smem>>) -> (i32, i32) {
    %c0_i32 = arith.constant 0 : i32
    %c0_i32_0 = arith.constant 0 : i32
    %c0_i32_1 = arith.constant 0 : i32
    return %c0_i32, %c0_i32_0 : i32, i32
  }
  func.func @transform_13(%arg0: i32, %arg1: memref<1xi32, #tpu.memory_space<smem>>) -> (i32, i32) {
    %c0_i32 = arith.constant 0 : i32
    %c0_i32_0 = arith.constant 0 : i32
    %c0_i32_1 = arith.constant 0 : i32
    return %c0_i32, %c0_i32_0 : i32, i32
  }
  func.func @transform_14(%arg0: i32, %arg1: memref<1xi32, #tpu.memory_space<smem>>) -> (i32, i32) {
    %c0_i32 = arith.constant 0 : i32
    %c0_i32_0 = arith.constant 0 : i32
    %c0_i32_1 = arith.constant 0 : i32
    return %c0_i32, %c0_i32_0 : i32, i32
  }
}

</mosaic_0001>

<bundles_post_ra>
// kernel: gptneo_forward.1
= control target key start
LH: loop header
LB: loop body
LE: loop exit
PB: predicated region body
PF: predicated region fallthrough
CT: control target
= control target key end

     0   :  { %s6486_s0 = inlined_call_operand.<no memory space> [shape: s32[1], index: 0, kind: input, shape index: {}]   ;;  %s6487_s1 = inlined_call_operand.vmem [shape: f32[64,128], index: 1, kind: input, shape index: {}]   ;;  %s6488_s2 = inlined_call_operand.vmem [shape: f32[2,1,128], index: 2, kind: input, shape index: {}]   ;;  %s6489_s3 = inlined_call_operand.vmem [shape: f32[2,1,128], index: 3, kind: input, shape index: {}]   ;;  %s6490_s4 = inlined_call_operand.hbm [shape: bf16[2,128,384], index: 4, kind: input, shape index: {}]   ;;  %s6491_s5 = inlined_call_operand.vmem [shape: bf16[2,128,128], index: 5, kind: input, shape index: {}]   ;;  %s6492_s6 = inlined_call_operand.vmem [shape: f32[2,1,128], index: 6, kind: input, shape index: {}]   ;;  %s6493_s7 = inlined_call_operand.vmem [shape: f32[2,1,128], index: 7, kind: input, shape index: {}]   ;;  %s6494_s8 = inlined_call_operand.vmem [shape: f32[2,1,128], index: 8, kind: input, shape index: {}]   ;;  %s6495_s9 = inlined_call_operand.vmem [shape: bf16[2,128,512], index: 9, kind: input, shape index: {}]   ;;  %s6496_s10 = inlined_call_operand.vmem [shape: f32[2,1,512], index: 10, kind: input, shape index: {}]   ;;  %s6497_s11 = inlined_call_operand.vmem [shape: bf16[2,512,128], index: 11, kind: input, shape index: {}]   ;;  %s6498_s12 = inlined_call_operand.vmem [shape: f32[2,1,128], index: 12, kind: input, shape index: {}]   ;;  %s6499_s13 = inlined_call_operand.vmem [shape: f32[1,128], index: 13, kind: input, shape index: {}]   ;;  %s6500_s14 = inlined_call_operand.vmem [shape: f32[1,128], index: 14, kind: input, shape index: {}]   ;;  %s6501_s15 = inlined_call_operand.hbm [shape: f32[64,128], index: 15, kind: output, shape index: {}]  }
   0x1   :  { %6506 = sst [smem:[#allocation15_spill]] %s6490_s4 }
   0x2   :  { %6507 = sst [smem:[#allocation16_spill]] %s6499_s13 }
   0x3   :  { %6508 = sst [smem:[#allocation17_spill]] %s6500_s14 }
   0x4   :  { %6509 = sst [smem:[#allocation18_spill]] %s6501_s15 }
   0x5   :  { %20 = sst [smem:[#allocation4]] %s6486_s0 }
   0x6   :  { %21 = vsyncpa [#allocation6], 0 }
   0x7   :  { %23 = vsyncpa [#allocation6 + $0x1], 0 }
   0x8   :  { %24 = vsyncpa [#allocation7], 0  ;;  %s5019_s20 = smov 0   ;;  %s5021_s21 = smov 0  }
   0x9   :  { %s5023_s22 = smov 0   ;;  %s5025_s23 = smov 0  }
   0xa LB: > { %6510 = sst [smem:[#allocation11_spill]] %s4916_s21  ;;  %s5038_s0 = sadd.s32 4294967295, %s4924_s23   ;;  %s4924_s23 = sphi %s5025_s23, %s6532_s23   ;;  %s4920_s22 = sphi %s5023_s22, %s6535_s22   ;;  %s4916_s21 = sphi %s5021_s21, %s6534_s21   ;;  %s4912_s20 = sphi %s5019_s20, %s6533_s20  }
   0xb   : > { %6511 = sst [smem:[#allocation12_spill]] %s4920_s22  ;;  %s5041_s24 = sadd.s32 1, %s4924_s23  }
   0xc   : > { %6512 = sst [smem:[#allocation13_spill]] %s5041_s24  ;;  %s107_s25 = ssub.s32 %s4924_s23, %s5041_s24 }
   0xd   : > { %s110_s26 = sadd.s32 1, %s4920_s22  ;;  %p108_p0 = scmp.eq.s32.totalorder %s107_s25, 0 }
   0xe   : > { %p117_p1 = scmp.ne.s32.totalorder %s4920_s22, %s4916_s21  ;;  %p118_p2 = scmp.eq.s32.totalorder %s4924_s23, 0 }
   0xf   : > { %p123_p3 = scmp.ne.s32.totalorder %s4916_s21, %s4912_s20  ;;  %p124_p5 = scmp.eq.s32.totalorder %s5038_s0, 0 }
  0x10   : > { %s5051_s27 = scalar_select %p108_p0, %s4920_s22, %s110_s26  }
  0x11   : > { %p119_p4 = por %p118_p2, %p117_p1  ;;  %p4464_p6 = scmp.lt.s32.totalorder %s4924_s23, 2 }
  0x12   : > { %6513 = sst [smem:[#allocation14_spill]] %s5051_s27  ;;  %p5055_p7 = por %p124_p5, %p123_p3 }
  0x13   : > { %s439_s29 = sand.u32 1, %s4920_s22   ;;  %s4452_s16 = smul.u32 192, %s4924_s23 }
  0x14   : > { %s4451_s30 = smul.u32 192, %s439_s29  ;;  %p5061_p8 = pnand %p4464_p6, %p119_p4 }
  0x15   : > { %s6516_s4 = sld [smem:[#allocation15_spill]]  ;;  %p3921_p9 = scmp.ge.s32.totalorder %s4924_s23, 1 }
  0x16   : > { %s443_s25 = scalar_lea.vmem [#allocation5], %s4451_s30  ;;  %s440_s24 = scalar_lea.sflag [#allocation6], %s439_s29 }
  0x17   : > { %s451_s26 = sshll.u32 %s443_s25, 4  ;;  %p4832_p11 = pneg %p5061_p8  ;;  %s452_s26 = int_to_ptr.vmem [resolvable:$true] %s451_s26 }
  0x1b   : > { %s448_s20 = scalar_lea.hbm %s6516_s4, %s4452_s16  ;;  %s4835_s18 = scalar_lea.hbm %s6516_s4, 384 }
  0x1c   : > { %s449_s27 = sshll.u32 %s448_s20, 4  ;;  %s450_s27 = int_to_ptr.hbm [resolvable:$true] %s449_s27 }
  0x1d   : > { %s4828_s15 = sshra.s32 %s450_s27, 4  ;;  %s4829_s15 = int_to_ptr.hbm [resolvable:$true] %s4828_s15 }
  0x1e   : > { %s4830_s22 = scalar_lea.hbm %s4829_s15, 192  ;;  %p4836_p0 = scmp.lt.s32.totalorder %s4829_s15, %s6516_s4 }
  0x1f   : > { %p4831_p10 = scmp.ne.s32.totalorder %s4829_s15, %s4830_s22  ;;  %p4837_p1 = scmp.lt.s32.totalorder %s4835_s18, %s4830_s22 }
  0x21   : > { %p4833_p12 = pnand %p4832_p11, %p4831_p10  ;;  %p4838_p2 = por %p4837_p1, %p4836_p0 }
  0x23   : > { %p4834_p13 = pneg %p4833_p12 }
  0x25   : > { %p4839_p3 = pnand %p4838_p2, %p4834_p13 }
  0x27   : > { %4842 = shalt.err (!%p4839_p3)
}
  0x28   : > { %s4926_s29 = smov 192   ;;  %s4927_s19 = smov 12  }
  0x29   : > { %4463 = dma.hbm_to_vmem [thread:$0]  (!%p5061_p8), %s450_s27, 3072, %s452_s26, %s440_s24, %s4926_s29, %s4926_s29, %s4927_s19  }
  0x2a   : > { %p514_p4 = scmp.lt.s32.totalorder %s4924_s23, 3 }
  0x2c   : > { %p515_p5 = pnand %p3921_p9, %p514_p4 }
  0x2d   : > { %s520_s13 = sand.u32 (!%p515_p5), 1, %s4916_s21  }
  0x2e   : > { %518 = sbr.rel (%p515_p5) target bundleno = 2803 (0xaf3), region = 76  ;;  %s521_s15 = scalar_lea.sflag (!%p515_p5), [#allocation6], %s520_s13 }
  0x2f   : > { %s4453_s14 = smul.u32 (!%p515_p5), 192, %s520_s13 }
  0x31   : > { %s5083_s22 = scalar_lea.vmem (!%p515_p5), [#allocation5], %s4453_s14 }
  0x33   : > { %4903 = dma.done.wait (%p5055_p7), %s521_s15, 3072  }
  0x34   : > { %4905 = vsyncadd (%p5055_p7), %s521_s15, 4294964224  ;;  %p602_p6 = scmp.lt.s32.totalorder %s5038_s0, 1  ;;  %p3929_p7 = scmp.ne.s32.totalorder %s5038_s0, 0 }
  0x36   : > { %s5091_s24 = scalar_select %p602_p6, %s5038_s0, 1 }
  0x38   : > { %s4344_s26 = sshll.u32 %s5091_s24, 6  ;;  %s618_s23 = scalar_lea.vmem %s6493_s7, %s5091_s24 }
  0x39   : > { %s5109_s13 = scalar_lea.vmem %s6491_s5, %s4344_s26  ;;  %s4345_s28 = sshll.u32 %s5091_s24, 8 }
  0x3a   : > { %s5123_s21 = scalar_lea.vmem %s6495_s9, %s4345_s28  ;;  %s3926_s18 = sshll.u32 %s5091_s24, 2 }
  0x3b   : > { %s5129_s26 = scalar_lea.vmem %s6496_s10, %s3926_s18  ;;  %s5134_s14 = scalar_lea.vmem %s6497_s11, %s4345_s28 }
  0x3c   : > { %s638_s27 = scalar_lea.vmem %s6498_s12, %s5091_s24  ;;  %643 = sbr.rel (%p3929_p7) target bundleno = 82 (0x52), region = 84 }
  0x3d   : > { %s660_s28 = sld [smem:[#allocation4]] (!%p3929_p7) }
  0x41   : > { %v644_v0 = vld [vmem:[%s6487_s1] sm:$0xff]  ;;  %v645_v1 = vld [vmem:[%s6487_s1 + $0x8] sm:$0xff]  ;;  %v646_v2 = vld [vmem:[%s6487_s1 + $0x10] sm:$0xff]  ;;  %v661_v3 = vlaneseq  ;;  %vm698_vm3 = vcmask 523264   ;;  %v4928_v20 = vmov -1e+09  }
  0x42   : > { %652 = vst [vmem:[#allocation8] sm:$0xff] %v644_v0  ;;  %v647_v4 = vld [vmem:[%s6487_s1 + $0x18] sm:$0xff]  ;;  %v648_v5 = vld [vmem:[%s6487_s1 + $0x20] sm:$0xff]  ;;  %v649_v8 = vld [vmem:[%s6487_s1 + $0x28] sm:$0xff] }
  0x43   : > { %653 = vst [vmem:[#allocation8 + $0x8] sm:$0xff] %v645_v1  ;;  %v662_v6 = vshrl.u32 %v661_v3, 7  ;;  %v671_v7 = vand.u32 127, %v661_v3  ;;  %v650_v9 = vld [vmem:[%s6487_s1 + $0x30] sm:$0xff]  ;;  %v651_v13 = vld [vmem:[%s6487_s1 + $0x38] sm:$0xff]  ;;  %v680_v15 = vstv %s660_s28 }
  0x44   : > { %654 = vst [vmem:[#allocation8 + $0x10] sm:$0xff] %v646_v2 }
  0x45   : > { %655 = vst [vmem:[#allocation8 + $0x18] sm:$0xff] %v647_v4  ;;  %v663_v10 = vadd.s32 8, %v662_v6  ;;  %v664_v11 = vadd.s32 16, %v662_v6  ;;  %v665_v12 = vadd.s32 24, %v662_v6  ;;  %vm672_vm0 = vcmp.le.s32.totalorder %v671_v7, %v662_v6 }
  0x46   : > { %656 = vst [vmem:[#allocation8 + $0x20] sm:$0xff] %v648_v5  ;;  %v666_v14 = vadd.s32 32, %v662_v6  ;;  %v667_v16 = vadd.s32 40, %v662_v6  ;;  %vm5165_vm2 = vcmp.lt.s32.totalorder %v671_v7, %v680_v15  ;;  %v668_v18 = vadd.s32 48, %v662_v6 }
  0x47   : > { %657 = vst [vmem:[#allocation8 + $0x28] sm:$0xff] %v649_v8  ;;  %vm673_vm1 = vcmp.le.s32.totalorder %v671_v7, %v663_v10  ;;  %vm674_vm4 = vcmp.le.s32.totalorder %v671_v7, %v664_v11  ;;  %vm682_vm5 = vmand %vm672_vm0, %vm5165_vm2  ;;  %vm675_vm6 = vcmp.le.s32.totalorder %v671_v7, %v665_v12  ;;  %v669_v19 = vadd.s32 56, %v662_v6 }
  0x48   : > { %658 = vst [vmem:[#allocation8 + $0x30] sm:$0xff] %v650_v9  ;;  %v690_v21 = vsel %vm682_vm5, 0.0, %v4928_v20  ;;  %vm683_vm7 = vmand %vm673_vm1, %vm5165_vm2  ;;  %vm676_vm8 = vcmp.le.s32.totalorder %v671_v7, %v666_v14  ;;  %vm677_vm10 = vcmp.le.s32.totalorder %v671_v7, %v667_v16  ;;  %vm678_vm12 = vcmp.le.s32.totalorder %v671_v7, %v668_v18 }
  0x49   : > { %659 = vst [vmem:[#allocation8 + $0x38] sm:$0xff] %v651_v13  ;;  %v691_v22 = vsel %vm683_vm7, 0.0, %v4928_v20  ;;  %vm684_vm9 = vmand %vm674_vm4, %vm5165_vm2  ;;  %vm679_vm14 = vcmp.le.s32.totalorder %v671_v7, %v669_v19 }
  0x4a   : > { %699 = vst.msk [vmem:[#allocation2] sm:$0xff] %vm698_vm3, %v690_v21  ;;  %v692_v23 = vsel %vm684_vm9, 0.0, %v4928_v20  ;;  %vm685_vm11 = vmand %vm675_vm6, %vm5165_vm2 }
  0x4b   : > { %700 = vst.msk [vmem:[#allocation2 + $0x8] sm:$0xff] %vm698_vm3, %v691_v22  ;;  %v693_v24 = vsel %vm685_vm11, 0.0, %v4928_v20  ;;  %vm686_vm13 = vmand %vm676_vm8, %vm5165_vm2 }
  0x4c   : > { %701 = vst.msk [vmem:[#allocation2 + $0x10] sm:$0xff] %vm698_vm3, %v692_v23  ;;  %v694_v25 = vsel %vm686_vm13, 0.0, %v4928_v20  ;;  %vm687_vm15 = vmand %vm677_vm10, %vm5165_vm2 }
  0x4d   : > { %702 = vst.msk [vmem:[#allocation2 + $0x18] sm:$0xff] %vm698_vm3, %v693_v24  ;;  %v695_v26 = vsel %vm687_vm15, 0.0, %v4928_v20  ;;  %vm688_vm0 = vmand %vm678_vm12, %vm5165_vm2 }
  0x4e   : > { %703 = vst.msk [vmem:[#allocation2 + $0x20] sm:$0xff] %vm698_vm3, %v694_v25  ;;  %v696_v27 = vsel %vm688_vm0, 0.0, %v4928_v20  ;;  %vm689_vm1 = vmand %vm679_vm14, %vm5165_vm2 }
  0x4f   : > { %704 = vst.msk [vmem:[#allocation2 + $0x28] sm:$0xff] %vm698_vm3, %v695_v26  ;;  %v697_v28 = vsel %vm689_vm1, 0.0, %v4928_v20 }
  0x50   : > { %705 = vst.msk [vmem:[#allocation2 + $0x30] sm:$0xff] %vm698_vm3, %v696_v27 }
  0x51   : > { %706 = vst.msk [vmem:[#allocation2 + $0x38] sm:$0xff] %vm698_vm3, %v697_v28 }
  0x52 PF: > { %v713_v29 = vld [vmem:[#allocation8 + $0x30] sm:$0xff]  ;;  %v711_v30 = vld [vmem:[#allocation8 + $0x20] sm:$0xff]  ;;  %v714_v32 = vld [vmem:[#allocation8 + $0x38] sm:$0xff]  ;;  %v4929_v36 = vmov 128.0   ;;  %s6521_s19 = scalar_lea.vmem %s6488_s2, %s5091_s24  ;;  %s6522_s4 = scalar_lea.vmem %s6489_s3, %s5091_s24 }
  0x53   : > { %v707_v31 = vld [vmem:[#allocation8] sm:$0xff]  ;;  %729 = vadd.xlane.f32.xlu1 %v713_v29  ;;  %725 = vadd.xlane.f32.xlu0 %v711_v30  ;;  %v712_v33 = vld [vmem:[#allocation8 + $0x28] sm:$0xff]  ;;  %v709_v35 = vld [vmem:[#allocation8 + $0x10] sm:$0xff]  ;;  %4576 = vrcp.f32 %v4929_v36  ;;  %s4931_s25 = smov 64   ;;  %s4932_s20 = smov 32  }
  0x54   : > { %717 = vadd.xlane.f32.xlu2 %v707_v31  ;;  %v708_v34 = vld [vmem:[#allocation8 + $0x8] sm:$0xff]  ;;  %v5208_v58 = vld [vmem:[#allocation8 + $0x18] sm:$0xff]  ;;  %v4365_v11 = vld [vmem:[%s5083_s22 + $0x94] sm:$0xf]  ;;  %s6525_s16 = scalar_lea.vmem %s6492_s6, %s5091_s24  ;;  %p4338_p8 = scmp.eq.s32.totalorder %s5038_s0, 1 }
  0x55   : > { %v4368_v8 = vld [vmem:[%s5083_s22 + $0xac] sm:$0xf]  ;;  %v4018_v9 = vld [vmem:[%s5083_s22 + $0xb4] sm:$0xf0]  ;;  %v4006_v12 = vld [vmem:[%s5083_s22 + $0x9c] sm:$0xf0] }
  0x56   : > { %v4021_v10 = vor.u32 %v4368_v8, %v4018_v9  ;;  %v4009_v13 = vor.u32 %v4365_v11, %v4006_v12  ;;  %v4362_v14 = vld [vmem:[%s5083_s22 + $0x7c] sm:$0xf]  ;;  %v3994_v15 = vld [vmem:[%s5083_s22 + $0x84] sm:$0xf0]  ;;  %v4359_v17 = vld [vmem:[%s5083_s22 + $0x64] sm:$0xf] }
  0x57   : > { %v3997_v16 = vor.u32 %v4362_v14, %v3994_v15  ;;  %v3982_v18 = vld [vmem:[%s5083_s22 + $0x6c] sm:$0xf0]  ;;  %v4016_v20 = vld [vmem:[%s5083_s22 + $0xa8] sm:$0xf]  ;;  %v4369_v21 = vld [vmem:[%s5083_s22 + $0xb0] sm:$0xf0] }
  0x58   : > { %4443 = vmatpush.bf16.msra.mxu2 %v4021_v10  ;;  %1099 = vmatpush.bf16.msra.mxu1 %v4021_v10  ;;  %v3985_v19 = vor.u32 %v4359_v17, %v3982_v18  ;;  %v4356_v22 = vld [vmem:[%s5083_s22 + $0x4c] sm:$0xf]  ;;  %v4017_v23 = vor.u32 %v4369_v21, %v4016_v20  ;;  %v3970_v24 = vld [vmem:[%s5083_s22 + $0x54] sm:$0xf0]  ;;  %v4004_v26 = vld [vmem:[%s5083_s22 + $0x90] sm:$0xf] }
  0x59   : > { %v4577_v37 = vpop.eup %4576  ;;  %v3973_v25 = vor.u32 %v4356_v22, %v3970_v24  ;;  %v4366_v27 = vld [vmem:[%s5083_s22 + $0x98] sm:$0xf0]  ;;  %v4353_v28 = vld [vmem:[%s5083_s22 + $0x34] sm:$0xf]  ;;  %v4012_v12 = vld [vmem:[%s5083_s22 + $0x98] sm:$0xf] }
  0x5a   : > { %v734_v38 = vmul.f32 128.0, %v4577_v37  ;;  %vm738_vm2 = vweird.f32 %v4577_v37  ;;  %1070 = vmatpush.bf16.msra.mxu0 %v4017_v23  ;;  %v4354_v8 = vld [vmem:[%s5083_s22 + $0x38] sm:$0xf0]  ;;  %v4351_v17 = vld [vmem:[%s5083_s22 + $0x20] sm:$0xf0] }
  0x5b   : > { %731 = vadd.xlane.f32.xlu1 %v714_v32  ;;  %727 = vadd.xlane.f32.xlu0 %v712_v33  ;;  %v4000_v18 = vld [vmem:[%s5083_s22 + $0x80] sm:$0xf]  ;;  %v4364_v23 = vld [vmem:[%s5083_s22 + $0x88] sm:$0xf0] }
  0x5c   : > { %719 = vadd.xlane.f32.xlu2 %v708_v34  ;;  %v735_v39 = vsub.f32 1.0, %v734_v38  ;;  %4444 = vmatpush.bf16.msra.mxu2 %v4009_v13  ;;  %v3932_v24 = vld [vmem:[%s5083_s22] sm:$0xf] }
  0x5d   : > { %1100 = vmatpush.bf16.msra.mxu1 %v4009_v13  ;;  %v4367_v13 = vld [vmem:[%s5083_s22 + $0xa0] sm:$0xf0] }
  0x5e   : > { %v736_v40 = vmul.f32 %v4577_v37, %v735_v39  ;;  %v4013_v14 = vor.u32 %v4367_v13, %v4012_v12 }
  0x60   : > { %v737_v41 = vadd.f32 %v4577_v37, %v736_v40  ;;  %4445 = vmatpush.bf16.msra.mxu2 %v3997_v16 }
  0x61   : > { %1101 = vmatpush.bf16.msra.mxu1 %v3997_v16  ;;  %v3944_v16 = vld [vmem:[%s5083_s22 + $0x18] sm:$0xf] }
  0x62   : > { %v5193_v42 = vsel %vm738_vm2, %v4577_v37, %v737_v41  ;;  %v3946_v37 = vld [vmem:[%s5083_s22 + $0x24] sm:$0xf0]  ;;  %v3980_v41 = vld [vmem:[%s5083_s22 + $0x60] sm:$0xf]  ;;  %v3945_v22 = vor.u32 %v4351_v17, %v3944_v16 }
  0x63   : > { %v5347_v16 = vld [vmem:[%s6522_s4] ss:$0 sm:$0xff] }
  0x64   : > { %721 = vadd.xlane.f32.xlu2 %v709_v35  ;;  %4446 = vmatpush.bf16.msra.mxu2 %v3985_v19 }
  0x65   : > { %1102 = vmatpush.bf16.msra.mxu1 %v3985_v19 }
  0x68   : > { %4447 = vmatpush.bf16.msra.mxu2 %v3973_v25 }
  0x69   : > { %1103 = vmatpush.bf16.msra.mxu1 %v3973_v25 }
  0xc6   : > { %v730_v43 = vpop.xlane.xlu1 %729  ;;  %v726_v44 = vpop.xlane.xlu0 %725 }
  0xc7   : > { %v744_v45 = vmul.f32 %v5193_v42, %v726_v44  ;;  %v718_v46 = vpop.xlane.xlu2 %717  ;;  %v746_v54 = vmul.f32 %v5193_v42, %v730_v43  ;;  %v4360_v43 = vld [vmem:[%s5083_s22 + $0x68] sm:$0xf0] }
  0xc8   : > { %v740_v55 = vmul.f32 %v5193_v42, %v718_v46  ;;  %v3981_v44 = vor.u32 %v4360_v43, %v3980_v41  ;;  %v3934_v46 = vld [vmem:[%s5083_s22 + $0xc] sm:$0xf0] }
  0xc9   : > { %v5196_v47 = vsub.f32 %v711_v30, %v744_v45  ;;  %v5214_v61 = vsub.f32 %v713_v29, %v746_v54  ;;  %v4005_v29 = vor.u32 %v4366_v27, %v4004_v26  ;;  %v3958_v30 = vld [vmem:[%s5083_s22 + $0x3c] sm:$0xf0]  ;;  %v4347_v45 = vld [vmem:[%s5083_s22 + $0x4] sm:$0xf]  ;;  %v4001_v27 = vor.u32 %v4364_v23, %v4000_v18 }
  0xca   : > { %v5216_v62 = vsub.f32 %v707_v31, %v740_v55  ;;  %v3961_v31 = vor.u32 %v4353_v28, %v3958_v30  ;;  %v4370_v55 = vld [vmem:[%s5083_s22 + $0xb8] sm:$0xf0]  ;;  %v4348_v28 = vld [vmem:[%s5083_s22 + $0x8] sm:$0xf0]  ;;  %v4361_v30 = vld [vmem:[%s5083_s22 + $0x70] sm:$0xf0] }
  0xcb   : > { %v760_v48 = vmul.f32 %v5196_v47, %v5196_v47  ;;  %v762_v2 = vmul.f32 %v5214_v61, %v5214_v61  ;;  %1071 = vmatpush.bf16.msra.mxu0 %v4005_v29  ;;  %v3988_v29 = vld [vmem:[%s5083_s22 + $0x68] sm:$0xf] }
  0xcc   : > { %v756_v3 = vmul.f32 %v5216_v62, %v5216_v62  ;;  %4448 = vmatpush.bf16.msra.mxu2 %v3961_v31  ;;  %1104 = vmatpush.bf16.msra.mxu1 %v3961_v31 }
  0xcd   : > { %772 = vadd.xlane.f32.xlu0 %v760_v48  ;;  %v3937_v48 = vor.u32 %v4347_v45, %v3934_v46  ;;  %v3976_v45 = vld [vmem:[%s5083_s22 + $0x50] sm:$0xf]  ;;  %v4358_v46 = vld [vmem:[%s5083_s22 + $0x58] sm:$0xf0] }
  0xce   : > { %v732_v49 = vpop.xlane.xlu1 %731  ;;  %v728_v50 = vpop.xlane.xlu0 %727 }
  0xcf   : > { %v747_v51 = vmul.f32 %v5193_v42, %v732_v49  ;;  %v745_v52 = vmul.f32 %v5193_v42, %v728_v50  ;;  %v720_v53 = vpop.xlane.xlu2 %719  ;;  %v3968_v49 = vld [vmem:[%s5083_s22 + $0x48] sm:$0xf]  ;;  %v4357_v50 = vld [vmem:[%s5083_s22 + $0x50] sm:$0xf0] }
  0xd0   : > { %v741_v1 = vmul.f32 %v5193_v42, %v720_v53  ;;  %v3969_v54 = vor.u32 %v4357_v50, %v3968_v49  ;;  %v3977_v50 = vor.u32 %v4358_v46, %v3976_v45 }
  0xd1   : > { %v5204_v56 = vsub.f32 %v714_v32, %v747_v51  ;;  %v5206_v57 = vsub.f32 %v712_v33, %v745_v52  ;;  %v3992_v32 = vld [vmem:[%s5083_s22 + $0x78] sm:$0xf]  ;;  %v4363_v33 = vld [vmem:[%s5083_s22 + $0x80] sm:$0xf0]  ;;  %v4024_v51 = vld [vmem:[%s5083_s22 + $0xb0] sm:$0xf] }
  0xd2   : > { %v5229_v6 = vsub.f32 %v708_v34, %v741_v1  ;;  %v4350_v34 = vld [vmem:[%s5083_s22 + $0x1c] sm:$0xf]  ;;  %v3993_v36 = vor.u32 %v4363_v33, %v3992_v32  ;;  %v3933_v32 = vor.u32 %v4348_v28, %v3932_v24 }
  0xd3   : > { %v761_v59 = vmul.f32 %v5206_v57, %v5206_v57  ;;  %v763_v60 = vmul.f32 %v5204_v56, %v5204_v56  ;;  %v3949_v39 = vor.u32 %v4350_v34, %v3946_v37 }
  0xd4   : > { %v757_v7 = vmul.f32 %v5229_v6, %v5229_v6  ;;  %1072 = vmatpush.bf16.msra.mxu0 %v3993_v36  ;;  %v3989_v36 = vor.u32 %v4361_v30, %v3988_v29 }
  0xd5   : > { %774 = vadd.xlane.f32.xlu1 %v761_v59  ;;  %723 = vadd.xlane.f32.xlu0 %v5208_v58 }
  0xd6   : > { %778 = vadd.xlane.f32.xlu2 %v763_v60  ;;  %4449 = vmatpush.bf16.msra.mxu2 %v3949_v39 }
  0xd7   : > { %v722_v63 = vpop.xlane.xlu2 %721  ;;  %1105 = vmatpush.bf16.msra.mxu1 %v3949_v39 }
  0xd8   : > { %v742_v0 = vmul.f32 %v5193_v42, %v722_v63  ;;  %1073 = vmatpush.bf16.msra.mxu0 %v3981_v44 }
  0xda   : > { %v5225_v4 = vsub.f32 %v709_v35, %v742_v0  ;;  %4450 = vmatpush.bf16.msra.mxu2 %v3937_v48  ;;  %v4025_v0 = vor.u32 %v4370_v55, %v4024_v51  ;;  %v3964_v51 = vld [vmem:[%s5083_s22 + $0x38] sm:$0xf] }
  0xdb   : > { %1106 = vmatpush.bf16.msra.mxu1 %v3937_v48 }
  0xdc   : > { %v758_v5 = vmul.f32 %v5225_v4, %v5225_v4  ;;  %1074 = vmatpush.bf16.msra.mxu0 %v3969_v54 }
  0xdd   : > { %776 = vadd.xlane.f32.xlu1 %v762_v2  ;;  %764 = vadd.xlane.f32.xlu0 %v756_v3 }
  0xde   : > { %768 = vadd.xlane.f32.xlu2 %v758_v5  ;;  %1128 = vmatpush.bf16.msrb.mxu2 %v4025_v0  ;;  %v5334_v0 = vld [vmem:[%s6521_s19] ss:$0 sm:$0xff]  ;;  %s6526_s19 = scalar_lea.vmem %s6494_s8, %s5091_s24 }
  0xe2   : > { %1129 = vmatpush.bf16.msrb.mxu2 %v4013_v14 }
  0xe5   : > { %766 = vadd.xlane.f32.xlu1 %v757_v7  ;;  %v3956_v7 = vld [vmem:[%s5083_s22 + $0x30] sm:$0xf] }
  0xe6   : > { %v3957_v11 = vor.u32 %v4354_v8, %v3956_v7  ;;  %1130 = vmatpush.bf16.msrb.mxu2 %v4001_v27 }
  0xe8   : > { %1075 = vmatpush.bf16.msra.mxu0 %v3957_v11  ;;  %v4352_v11 = vld [vmem:[%s5083_s22 + $0x28] sm:$0xf0] }
  0xea   : > { %1131 = vmatpush.bf16.msrb.mxu2 %v3989_v36 }
  0xec   : > { %1076 = vmatpush.bf16.msra.mxu0 %v3945_v22  ;;  %v4349_v22 = vld [vmem:[%s5083_s22 + $0x10] sm:$0xf0] }
  0xee   : > { %1132 = vmatpush.bf16.msrb.mxu2 %v3977_v50 }
  0xf0   : > { %1077 = vmatpush.bf16.msra.mxu0 %v3933_v32 }
 0x140   : > { %v773_v35 = vpop.xlane.xlu0 %772 }
 0x141   : > { %v784_v38 = vmul.f32 %v773_v35, %v5193_v42 }
 0x143   : > { %v5254_v40 = vadd.f32 1e-05, %v784_v38 }
 0x145   : > { %4578 = vrsqrt.f32 %v5254_v40  ;;  %vm842_vm4 = vweird.f32 %v5254_v40 }
 0x148   : > { %v775_v52 = vpop.xlane.xlu1 %774  ;;  %v724_v53 = vpop.xlane.xlu0 %723 }
 0x149   : > { %v785_v59 = vmul.f32 %v775_v52, %v5193_v42  ;;  %v743_v60 = vmul.f32 %v5193_v42, %v724_v53  ;;  %v779_v63 = vpop.xlane.xlu2 %778  ;;  %v4355_v52 = vld [vmem:[%s5083_s22 + $0x40] sm:$0xf0] }
 0x14a   : > { %v787_v1 = vmul.f32 %v779_v63, %v5193_v42 }
 0x14b   : > { %v5268_v2 = vpop.eup %4578  ;;  %v5270_v3 = vadd.f32 1e-05, %v785_v59  ;;  %v5273_v5 = vsub.f32 %v5208_v58, %v743_v60 }
 0x14c   : > { %v837_v9 = vmul.f32 %v5268_v2, %v5254_v40  ;;  %v5279_v10 = vadd.f32 1e-05, %v787_v1  ;;  %vm843_vm3 = vweird.f32 %v5268_v2  ;;  %v3965_v1 = vor.u32 %v4355_v52, %v3964_v51 }
 0x14d   : > { %4580 = vrsqrt.f32 %v5270_v3  ;;  %v759_v58 = vmul.f32 %v5273_v5, %v5273_v5  ;;  %vm5312_vm5 = vmor %vm842_vm4, %vm843_vm3  ;;  %vm852_vm6 = vweird.f32 %v5270_v3 }
 0x14e   : > { %v838_v15 = vmul.f32 %v5268_v2, %v837_v9  ;;  %4582 = vrsqrt.f32 %v5279_v10  ;;  %v3952_v9 = vld [vmem:[%s5083_s22 + $0x20] sm:$0xf]  ;;  %1133 = vmatpush.bf16.msrb.mxu2 %v3965_v1  ;;  %vm872_vm11 = vweird.f32 %v5279_v10 }
 0x14f   : > { %770 = vadd.xlane.f32.xlu0 %v759_v58  ;;  %v3953_v17 = vor.u32 %v4352_v11, %v3952_v9 }
 0x150   : > { %v839_v19 = vmul.f32 0.5, %v838_v15  ;;  %v777_v20 = vpop.xlane.xlu1 %776  ;;  %v765_v21 = vpop.xlane.xlu0 %764 }
 0x151   : > { %v786_v25 = vmul.f32 %v777_v20, %v5193_v42  ;;  %v780_v26 = vmul.f32 %v765_v21, %v5193_v42 }
 0x152   : > { %v840_v31 = vsub.f32 1.5, %v839_v19  ;;  %1134 = vmatpush.bf16.msrb.mxu2 %v3953_v17 }
 0x153   : > { %v4581_v33 = vpop.eup %4580  ;;  %v5298_v34 = vadd.f32 1e-05, %v786_v25  ;;  %v5300_v35 = vadd.f32 1e-05, %v780_v26 }
 0x154   : > { %v5302_v37 = vpop.eup %4582  ;;  %v841_v38 = vmul.f32 %v5268_v2, %v840_v31  ;;  %v847_v39 = vmul.f32 %v4581_v33, %v5270_v3  ;;  %vm853_vm7 = vweird.f32 %v4581_v33 }
 0x155   : > { %v867_v41 = vmul.f32 %v5302_v37, %v5279_v10  ;;  %4584 = vrsqrt.f32 %v5298_v34  ;;  %vm854_vm8 = vmor %vm852_vm6, %vm853_vm7  ;;  %vm862_vm9 = vweird.f32 %v5298_v34  ;;  %vm802_vm12 = vweird.f32 %v5300_v35 }
 0x156   : > { %v848_v43 = vmul.f32 %v4581_v33, %v847_v39  ;;  %4586 = vrsqrt.f32 %v5300_v35  ;;  %v845_v48 = vsel %vm5312_vm5, %v5268_v2, %v841_v38  ;;  %vm873_vm14 = vweird.f32 %v5302_v37 }
 0x157   : > { %v868_v53 = vmul.f32 %v5302_v37, %v867_v41  ;;  %v880_v60 = vmul.f32 %v845_v48, %v5196_v47  ;;  %vm874_vm1 = vmor %vm872_vm11, %vm873_vm14  ;;  %vm1329_vm11 = vcmask 261120  }
 0x158   : > { %v849_v49 = vmul.f32 0.5, %v848_v43  ;;  %v767_v40 = vpop.xlane.xlu1 %766 }
 0x159   : > { %v781_v54 = vmul.f32 %v767_v40, %v5193_v42  ;;  %v869_v47 = vmul.f32 0.5, %v868_v53  ;;  %v891_v15 = vmul.f32 %v5334_v0, %v880_v60 }
 0x15a   : > { %v850_v55 = vsub.f32 1.5, %v849_v49 }
 0x15b   : > { %v4585_v59 = vpop.eup %4584  ;;  %v789_v63 = vadd.f32 1e-05, %v781_v54  ;;  %v870_v19 = vsub.f32 1.5, %v869_v47  ;;  %v902_v26 = vadd.f32 %v5347_v16, %v891_v15 }
 0x15c   : > { %v4587_v2 = vpop.eup %4586  ;;  %v851_v7 = vmul.f32 %v4581_v33, %v850_v55  ;;  %v857_v8 = vmul.f32 %v4585_v59, %v5298_v34  ;;  %vm863_vm10 = vweird.f32 %v4585_v59 }
 0x15d   : > { %v797_v3 = vmul.f32 %v4587_v2, %v5300_v35  ;;  %4588 = vrsqrt.f32 %v789_v63  ;;  %vm803_vm13 = vweird.f32 %v4587_v2  ;;  %vm5361_vm15 = vmor %vm862_vm9, %vm863_vm10  ;;  %v871_v32 = vmul.f32 %v5302_v37, %v870_v19 }
 0x15e   : > { %v855_v12 = vsel %vm854_vm8, %v4581_v33, %v851_v7  ;;  %v858_v13 = vmul.f32 %v4585_v59, %v857_v8  ;;  %vm804_vm0 = vmor %vm802_vm12, %vm803_vm13  ;;  %vm812_vm2 = vweird.f32 %v789_v63  ;;  %vm1554_vm12 = vcmask 523264  }
 0x15f   : > { %v881_v58 = vmul.f32 %v855_v12, %v5206_v57  ;;  %v798_v14 = vmul.f32 %v4587_v2, %v797_v3  ;;  %v3940_v57 = vld [vmem:[%s5083_s22 + $0x8] sm:$0xf]  ;;  %v875_v41 = vsel %vm874_vm1, %v5302_v37, %v871_v32  ;;  %s4930_s22 = smov 96  }
 0x160   : > { %v859_v18 = vmul.f32 0.5, %v858_v13  ;;  %v3941_v31 = vor.u32 %v4349_v22, %v3940_v57  ;;  %v883_v10 = vmul.f32 %v875_v41, %v5204_v56 }
 0x161   : > { %v799_v20 = vmul.f32 0.5, %v798_v14  ;;  %v892_v21 = vmul.f32 %v5334_v0, %v881_v58 }
 0x162   : > { %v860_v23 = vsub.f32 1.5, %v859_v18  ;;  %1135 = vmatpush.bf16.msrb.mxu2 %v3941_v31  ;;  %v894_v51 = vmul.f32 %v5334_v0, %v883_v10 }
 0x163   : > { %v4589_v24 = vpop.eup %4588  ;;  %v800_v25 = vsub.f32 1.5, %v799_v20  ;;  %v903_v27 = vadd.f32 %v5347_v16, %v892_v21 }
 0x164   : > { %v861_v28 = vmul.f32 %v4585_v59, %v860_v23  ;;  %v807_v30 = vmul.f32 %v4589_v24, %v789_v63  ;;  %vm813_vm3 = vweird.f32 %v4589_v24  ;;  %v905_v56 = vadd.f32 %v5347_v16, %v894_v51 }
 0x165   : > { %v801_v33 = vmul.f32 %v4587_v2, %v800_v25  ;;  %v5366_v35 = vpack.c.bf16 %v903_v27, %v902_v26  ;;  %vm814_vm4 = vmor %vm812_vm2, %vm813_vm3 }
 0x166   : > { %v808_v36 = vmul.f32 %v4589_v24, %v807_v30  ;;  %v865_v38 = vsel %vm5361_vm15, %v4585_v59, %v861_v28 }
 0x167   : > { %1117 = vmatmul.bf16.vlgmr.msra.gmra.mxu2 %v5366_v35  ;;  %v805_v34 = vsel %vm804_vm0, %v4587_v2, %v801_v33  ;;  %v882_v43 = vmul.f32 %v865_v38, %v5214_v61 }
 0x168   : > { %v809_v39 = vmul.f32 0.5, %v808_v36  ;;  %v876_v45 = vmul.f32 %v805_v34, %v5216_v62 }
 0x169   : > { %v893_v49 = vmul.f32 %v5334_v0, %v882_v43 }
 0x16a   : > { %v810_v44 = vsub.f32 1.5, %v809_v39  ;;  %v887_v50 = vmul.f32 %v5334_v0, %v876_v45 }
 0x16b   : > { %v904_v61 = vadd.f32 %v5347_v16, %v893_v49 }
 0x16c   : > { %v811_v46 = vmul.f32 %v4589_v24, %v810_v44  ;;  %v898_v52 = vadd.f32 %v5347_v16, %v887_v50 }
 0x16d   : > { %v909_v54 = vpack.c.bf16 %v905_v56, %v904_v61 }
 0x16e   : > { %v815_v48 = vsel %vm814_vm4, %v4589_v24, %v811_v46 }
 0x16f   : > { %v877_v40 = vmul.f32 %v815_v48, %v5229_v6  ;;  %v769_v6 = vpop.xlane.xlu2 %768 }
 0x170   : > { %v782_v55 = vmul.f32 %v769_v6, %v5193_v42 }
 0x171   : > { %v888_v37 = vmul.f32 %v5334_v0, %v877_v40 }
 0x172   : > { %v790_v59 = vadd.f32 1e-05, %v782_v55 }
 0x173   : > { %v899_v62 = vadd.f32 %v5347_v16, %v888_v37 }
 0x174   : > { %4590 = vrsqrt.f32 %v790_v59  ;;  %vm822_vm5 = vweird.f32 %v790_v59 }
 0x175   : > { %v906_v53 = vpack.c.bf16 %v899_v62, %v898_v52 }
 0x177   : > { %1078 = vmatmul.bf16.vlgmr.msra.gmra.mxu0 %v906_v53  ;;  %1107 = vmatmul.bf16.vlgmr.msra.gmra.mxu1 %v906_v53 }
 0x178   : > { %1122 = vmatmul.bf16.gmra.mxu2 %v909_v54 }
 0x17a   : > { %v4591_v60 = vpop.eup %4590 }
 0x17b   : > { %v817_v63 = vmul.f32 %v4591_v60, %v790_v59  ;;  %vm823_vm6 = vweird.f32 %v4591_v60 }
 0x17c   : > { %vm824_vm7 = vmor %vm822_vm5, %vm823_vm6 }
 0x17d   : > { %v818_v1 = vmul.f32 %v4591_v60, %v817_v63 }
 0x17f   : > { %v819_v9 = vmul.f32 0.5, %v818_v1 }
 0x181   : > { %v820_v11 = vsub.f32 1.5, %v819_v9 }
 0x183   : > { %v821_v3 = vmul.f32 %v4591_v60, %v820_v11 }
 0x185   : > { %v825_v58 = vsel %vm824_vm7, %v4591_v60, %v821_v3 }
 0x186   : > { %v878_v17 = vmul.f32 %v825_v58, %v5225_v4 }
 0x188   : > { %1136 = vmatmul.bf16.vlgmr.msrb.gmra.mxu2 %v906_v53  ;;  %v889_v21 = vmul.f32 %v5334_v0, %v878_v17 }
 0x18a   : > { %v900_v22 = vadd.f32 %v5347_v16, %v889_v21 }
 0x1c2   : > { %v771_v2 = vpop.xlane.xlu0 %770 }
 0x1c3   : > { %v783_v7 = vmul.f32 %v771_v2, %v5193_v42 }
 0x1c5   : > { %v791_v8 = vadd.f32 1e-05, %v783_v7 }
 0x1c7   : > { %4592 = vrsqrt.f32 %v791_v8  ;;  %vm832_vm9 = vweird.f32 %v791_v8 }
 0x1cd   : > { %v4593_v47 = vpop.eup %4592 }
 0x1ce   : > { %v827_v12 = vmul.f32 %v4593_v47, %v791_v8  ;;  %vm833_vm8 = vweird.f32 %v4593_v47 }
 0x1cf   : > { %vm834_vm10 = vmor %vm832_vm9, %vm833_vm8 }
 0x1d0   : > { %v828_v13 = vmul.f32 %v4593_v47, %v827_v12 }
 0x1d2   : > { %v829_v14 = vmul.f32 0.5, %v828_v13 }
 0x1d4   : > { %v830_v15 = vsub.f32 1.5, %v829_v14 }
 0x1d6   : > { %v831_v18 = vmul.f32 %v4593_v47, %v830_v15 }
 0x1d8   : > { %v835_v19 = vsel %vm834_vm10, %v4593_v47, %v831_v18 }
 0x1d9   : > { %v879_v20 = vmul.f32 %v835_v19, %v5273_v5 }
 0x1db   : > { %v890_v57 = vmul.f32 %v5334_v0, %v879_v20 }
 0x1dd   : > { %v901_v23 = vadd.f32 %v5347_v16, %v890_v57 }
 0x1df   : > { %v907_v24 = vpack.c.bf16 %v901_v23, %v900_v22 }
 0x1e1   : > { %1083 = vmatmul.bf16.gmra.mxu0 %v907_v24  ;;  %1112 = vmatmul.bf16.gmra.mxu1 %v907_v24 }
 0x1e2   : > { %1141 = vmatmul.bf16.gmra.mxu2 %v907_v24 }
 0x1ea   : > { %v1118_v25 = vpop.f32.mrf.mxu2 }
 0x1f1   : > { %1088 = vmatmul.bf16.gmra.mxu0 %v5366_v35 }
 0x1f2   : > { %1146 = vmatmul.bf16.gmra.mxu2 %v5366_v35  ;;  %v1120_v4 = vpop.f32.mrf.mxu2 }
 0x1f3   : > { %v1273_v50 = vpack.c.bf16 %v1120_v4, %v1118_v25 }
 0x1f4   : > { %v1079_v26 = vpop.f32.mrf.mxu0  ;;  %v1108_v16 = vpop.f32.mrf.mxu1 }
 0x1f5   : > { %v1237_v60 = vpack.c.bf16 %v1079_v26, %v1079_v26 }
 0x1f7   : > { %v1317_v2 = vunpack.c.l.b16 %v1237_v60 }
 0x1fb   : > { %v1123_v5 = vpop.f32.mrf.mxu2 }
 0x1fc   : > { %v1081_v27 = vpop.f32.mrf.mxu0  ;;  %v1110_v30 = vpop.f32.mrf.mxu1 }
 0x1fd   : > { %v4510_v28 = vpack.i.bf16 %v1081_v27, %v1079_v26  ;;  %v1269_v32 = vpack.c.bf16 %v1110_v30, %v1108_v16  ;;  %v1238_v59 = vpack.c.bf16 %v1081_v27, %v1081_v27 }
 0x1ff   : > { %4511 = vrot.lane.b32.xlu2 %v4510_v28, %s4930_s22  ;;  %v1318_v1 = vunpack.c.l.b16 %v1238_v59 }
 0x201   : > { %1093 = vmatmul.bf16.gmra.mxu0 %v909_v54  ;;  %v1325_v7 = vpack.c.b16 %v1318_v1, %v1317_v2 }
 0x202   : > { %1151 = vmatmul.bf16.gmra.mxu2 %v909_v54 }
 0x203   : > { %v1125_v0 = vpop.f32.mrf.mxu2 }
 0x204   : > { %v1275_v53 = vpack.c.bf16 %v1125_v0, %v1123_v5 }
 0x207   : > { %4521 = vrot.lane.b32.xlu2 %v4510_v28, %s4931_s25 }
 0x20b   : > { %v1137_v29 = vpop.f32.mrf.mxu2 }
 0x213   : > { %v1139_v31 = vpop.f32.mrf.mxu2 }
 0x214   : > { %v1270_v33 = vpack.c.bf16 %v1139_v31, %v1137_v29 }
 0x216   : > { %1277 = vxpose.binary.xlu1.c.b16.start [1/8] (short) %v1270_v33, %v1269_v32, 128 }
 0x259   : > { %v4512_v57 = vpop.permute.xlu2 %4511 }
 0x25a   : > { %v4513_v0 = vunpack.i.l.bf16 %v4512_v57 }
 0x25c   : > { %v1245_v32 = vpack.c.bf16 %v4513_v0, %v4513_v0 }
 0x25e   : > { %v1084_v35 = vpop.f32.mrf.mxu0  ;;  %v1113_v36 = vpop.f32.mrf.mxu1 }
 0x25f   : > { %v1239_v11 = vpack.c.bf16 %v1084_v35, %v1084_v35 }
 0x261   : > { %v1319_v12 = vunpack.c.l.b16 %v1239_v11  ;;  %v4522_v5 = vpop.permute.xlu2 %4521 }
 0x262   : > { %v4524_v16 = vunpack.i.h.bf16 %v4522_v5  ;;  %v4523_v29 = vunpack.i.l.bf16 %v4522_v5 }
 0x264   : > { %v1254_v33 = vpack.c.bf16 %v4524_v16, %v4524_v16 }
 0x265   : > { %v1142_v38 = vpop.f32.mrf.mxu2 }
 0x266   : > { %v1086_v34 = vpop.f32.mrf.mxu0  ;;  %v1115_v41 = vpop.f32.mrf.mxu1 }
 0x267   : > { %v4530_v39 = vpack.i.bf16 %v1086_v34, %v1084_v35  ;;  %v1271_v44 = vpack.c.bf16 %v1115_v41, %v1113_v36  ;;  %v1240_v9 = vpack.c.bf16 %v1086_v34, %v1086_v34  ;;  %v1253_v35 = vpack.c.bf16 %v4523_v29, %v4523_v29 }
 0x268   : > { %v1379_v34 = vunpack.c.l.b16 %v1245_v32 }
 0x269   : > { %4531 = vrot.lane.b32.xlu2 %v4530_v39, %s4931_s25  ;;  %4516 = vrot.lane.b32.xlu0 %v4530_v39, %s4930_s22  ;;  %v1320_v3 = vunpack.c.l.b16 %v1240_v9  ;;  %v1440_v41 = vunpack.c.l.b16 %v1253_v35 }
 0x26b   : > { %v1326_v13 = vpack.c.b16 %v1320_v3, %v1319_v12 }
 0x26d   : > { %v1144_v43 = vpop.f32.mrf.mxu2 }
 0x26e   : > { %v1272_v45 = vpack.c.bf16 %v1144_v43, %v1142_v38  ;;  %v1089_v10 = vpop.f32.mrf.mxu0 }
 0x26f   : > { %v1241_v15 = vpack.c.bf16 %v1089_v10, %v1089_v10 }
 0x270   : > { %1278 = vxpose.binary.xlu1.c.b16.cont [2/8] (short) %v1272_v45, %v1271_v44, 128 }
 0x271   : > { %v1321_v19 = vunpack.c.l.b16 %v1241_v15 }
 0x275   : > { %v1147_v46 = vpop.f32.mrf.mxu2 }
 0x276   : > { %v1091_v48 = vpop.f32.mrf.mxu0 }
 0x277   : > { %v4525_v49 = vpack.i.bf16 %v1091_v48, %v1089_v10  ;;  %v1242_v14 = vpack.c.bf16 %v1091_v48, %v1091_v48 }
 0x279   : > { %4526 = vrot.lane.b32.xlu0 %v4525_v49, %s4930_s22  ;;  %v1322_v18 = vunpack.c.l.b16 %v1242_v14 }
 0x27b   : > { %v1327_v20 = vpack.c.b16 %v1322_v18, %v1321_v19 }
 0x27d   : > { %v1149_v40 = vpop.f32.mrf.mxu2 }
 0x27e   : > { %v1274_v51 = vpack.c.bf16 %v1149_v40, %v1147_v46  ;;  %v1094_v37 = vpop.f32.mrf.mxu0 }
 0x27f   : > { %v1243_v23 = vpack.c.bf16 %v1094_v37, %v1094_v37 }
 0x280   : > { %1279 = vxpose.binary.xlu1.c.b16.cont [3/8] (short) %v1274_v51, %v1273_v50, 128 }
 0x281   : > { %4536 = vrot.lane.b32.xlu0 %v4510_v28, %s4932_s20  ;;  %v1323_v4 = vunpack.c.l.b16 %v1243_v23  ;;  %v4514_v28 = vunpack.i.h.bf16 %v4512_v57 }
 0x283   : > { %v1246_v31 = vpack.c.bf16 %v4514_v28, %v4514_v28 }
 0x285   : > { %v1152_v61 = vpop.f32.mrf.mxu2  ;;  %v1380_v38 = vunpack.c.l.b16 %v1246_v31 }
 0x286   : > { %v1096_v52 = vpop.f32.mrf.mxu0 }
 0x287   : > { %v4540_v62 = vpack.i.bf16 %v1096_v52, %v1094_v37  ;;  %v1244_v22 = vpack.c.bf16 %v1096_v52, %v1096_v52  ;;  %v1387_v44 = vpack.c.b16 %v1380_v38, %v1379_v34 }
 0x289   : > { %4546 = vrot.lane.b32.xlu0 %v4525_v49, %s4931_s25  ;;  %4541 = vrot.lane.b32.xlu2 %v4540_v62, %s4930_s22  ;;  %v1324_v25 = vunpack.c.l.b16 %v1244_v22 }
 0x28b   : > { %v1328_v26 = vpack.c.b16 %v1324_v25, %v1323_v4 }
 0x28d   : > { %v1154_v56 = vpop.f32.mrf.mxu2 }
 0x28e   : > { %v1276_v54 = vpack.c.bf16 %v1154_v56, %v1152_v61 }
 0x290   : > { %1280 = vxpose.binary.xlu1.c.b16.end [4/8] (short) %v1276_v54, %v1275_v53, 128 }
 0x291   : > { %4556 = vrot.lane.b32.xlu0 %v4540_v62, %s4931_s25  ;;  %4551 = vrot.lane.b32.xlu2 %v4530_v39, %s4932_s20  ;;  %v1441_v39 = vunpack.c.l.b16 %v1254_v33 }
 0x293   : > { %v1448_v45 = vpack.c.b16 %v1441_v39, %v1440_v41 }
 0x299   : > { %4566 = vrot.lane.b32.xlu0 %v4540_v62, %s4932_s20  ;;  %4561 = vrot.lane.b32.xlu2 %v4525_v49, %s4932_s20 }
 0x2c3   : > { %v4532_v10 = vpop.permute.xlu2 %4531 }
 0x2c4   : > { %v4534_v48 = vunpack.i.h.bf16 %v4532_v10  ;;  %v4533_v49 = vunpack.i.l.bf16 %v4532_v10 }
 0x2c6   : > { %v1256_v37 = vpack.c.bf16 %v4534_v48, %v4534_v48  ;;  %v1255_v61 = vpack.c.bf16 %v4533_v49, %v4533_v49 }
 0x2c8   : > { %v1443_v53 = vunpack.c.l.b16 %v1256_v37  ;;  %v1442_v54 = vunpack.c.l.b16 %v1255_v61 }
 0x2db   : > { %v4517_v30 = vpop.permute.xlu0 %4516 }
 0x2dc   : > { %v4519_v40 = vunpack.i.h.bf16 %v4517_v30  ;;  %v4518_v50 = vunpack.i.l.bf16 %v4517_v30 }
 0x2de   : > { %v1248_v52 = vpack.c.bf16 %v4519_v40, %v4519_v40  ;;  %v1247_v62 = vpack.c.bf16 %v4518_v50, %v4518_v50 }
 0x2e0   : > { %v1381_v59 = vunpack.c.l.b16 %v1247_v62 }
 0x2eb   : > { %v4527_v43 = vpop.permute.xlu0 %4526 }
 0x2ec   : > { %v4528_v9 = vunpack.i.l.bf16 %v4527_v43 }
 0x2ee   : > { %v1249_v15 = vpack.c.bf16 %v4528_v9, %v4528_v9 }
 0x2f0   : > { %v1383_v23 = vunpack.c.l.b16 %v1249_v15  ;;  %v5434_v15 = vld [vmem:[#allocation2 + $0x10] sm:$0xff] }
 0x2f3   : > { %v4537_v51 = vpop.permute.xlu0 %4536 }
 0x2f4   : > { %v4539_v3 = vunpack.i.h.bf16 %v4537_v51  ;;  %v4538_v12 = vunpack.i.l.bf16 %v4537_v51 }
 0x2f6   : > { %v1262_v19 = vpack.c.bf16 %v4539_v3, %v4539_v3 }
 0x2f8   : > { %v1502_v4 = vunpack.c.l.b16 %v1262_v19 }
 0x2fb   : > { %v4547_v1 = vpop.permute.xlu0 %4546 }
 0x2fc   : > { %v4549_v11 = vunpack.i.h.bf16 %v4547_v1 }
 0x303   : > { %v4557_v16 = vpop.permute.xlu0 %4556 }
 0x304   : > { %v4559_v32 = vunpack.i.h.bf16 %v4557_v16  ;;  %v4558_v33 = vunpack.i.l.bf16 %v4557_v16 }
 0x306   : > { %v1260_v39 = vpack.c.bf16 %v4559_v32, %v4559_v32  ;;  %v1259_v41 = vpack.c.bf16 %v4558_v33, %v4558_v33  ;;  %v5469_v32 = vld [vmem:[#allocation2 + $0x8] sm:$0xff] }
 0x308   : > { %v1447_v48 = vunpack.c.l.b16 %v1260_v39  ;;  %v1446_v49 = vunpack.c.l.b16 %v1259_v41 }
 0x30a   : > { %v1451_v37 = vpack.c.b16 %v1447_v48, %v1446_v49 }
 0x30c   : > { %v1285_v6 = vpop.trf.xlu1 }
 0x314   : > { %v5404_v55 = vpop.trf.xlu1 }
 0x31c   : > { %v1287_v63 = vpop.trf.xlu1 }
 0x31d   : > { %1348 = vmatpush.bf16.msra.mxu3 %v1287_v63  ;;  %v1449_v63 = vpack.c.b16 %v1443_v53, %v1442_v54 }
 0x321   : > { %1349 = vmatpush.bf16.msra.mxu3 %v1285_v6  ;;  %v1382_v6 = vunpack.c.l.b16 %v1248_v52 }
 0x323   : > { %v1388_v60 = vpack.c.b16 %v1382_v6, %v1381_v59 }
 0x324   : > { %4026 = vmatmul.msk.bf16.vlgmr.msra.gmra.mxu3 %vm1329_vm11, %v1325_v7  ;;  %v5407_v8 = vpop.trf.xlu1  ;;  %v4529_v7 = vunpack.i.h.bf16 %v4527_v43 }
 0x326   : > { %v1250_v14 = vpack.c.bf16 %v4529_v7, %v4529_v7 }
 0x328   : > { %v1384_v22 = vunpack.c.l.b16 %v1250_v14 }
 0x32a   : > { %v1389_v5 = vpack.c.b16 %v1384_v22, %v1383_v23 }
 0x32c   : > { %v1289_v47 = vpop.trf.xlu1 }
 0x334   : > { %v5409_v58 = vpop.trf.xlu1  ;;  %4027 = vmatmul.msk.bf16.gmra.mxu3 %vm1329_vm11, %v1326_v13  ;;  %v4542_v13 = vpop.permute.xlu2 %4541 }
 0x335   : > { %v4544_v30 = vunpack.i.h.bf16 %v4542_v13  ;;  %v4543_v31 = vunpack.i.l.bf16 %v4542_v13 }
 0x337   : > { %v1252_v38 = vpack.c.bf16 %v4544_v30, %v4544_v30  ;;  %v1251_v34 = vpack.c.bf16 %v4543_v31, %v4543_v31 }
 0x339   : > { %v1385_v10 = vunpack.c.l.b16 %v1251_v34  ;;  %v5478_v34 = vld [vmem:[#allocation2 + $0x38] sm:$0xff] }
 0x33c   : > { %v1291_v17 = vpop.trf.xlu1  ;;  %v4552_v29 = vpop.permute.xlu2 %4551 }
 0x33d   : > { %1409 = vmatpush.bf16.msrb.mxu3 %v1291_v17  ;;  %v1258_v17 = vpack.c.bf16 %v4549_v11, %v4549_v11  ;;  %v4554_v35 = vunpack.i.h.bf16 %v4552_v29 }
 0x33f   : > { %v1264_v43 = vpack.c.bf16 %v4554_v35, %v4554_v35 }
 0x341   : > { %1410 = vmatpush.bf16.msrb.mxu3 %v1289_v47  ;;  %v4548_v47 = vunpack.i.l.bf16 %v4547_v1  ;;  %v1504_v40 = vunpack.c.l.b16 %v1264_v43 }
 0x343   : > { %v1257_v18 = vpack.c.bf16 %v4548_v47, %v4548_v47 }
 0x344   : > { %v5412_v21 = vpop.trf.xlu1  ;;  %4028 = vmatmul.msk.bf16.gmra.mxu3 %vm1329_vm11, %v1327_v20  ;;  %v1261_v20 = vpack.c.bf16 %v4538_v12, %v4538_v12  ;;  %v4562_v52 = vpop.permute.xlu2 %4561 }
 0x345   : > { %v1444_v25 = vunpack.c.l.b16 %v1257_v18  ;;  %v4564_v62 = vunpack.i.h.bf16 %v4562_v52 }
 0x347   : > { %v1266_v53 = vpack.c.bf16 %v4564_v62, %v4564_v62 }
 0x349   : > { %v1506_v6 = vunpack.c.l.b16 %v1266_v53 }
 0x34c   : > { %v1293_v24 = vpop.trf.xlu1 }
 0x354   : > { %v5415_v27 = vpop.trf.xlu1  ;;  %4029 = vmatmul.msk.bf16.gmra.mxu3 %vm1329_vm11, %v1328_v26  ;;  %v1501_v26 = vunpack.c.l.b16 %v1261_v20  ;;  %v5441_v20 = vld [vmem:[#allocation2] sm:$0xff] }
 0x356   : > { %v1509_v0 = vpack.c.b16 %v1502_v4, %v1501_v26 }
 0x35c   : > { %v1295_v36 = vpop.trf.xlu1 }
 0x35d   : > { %1470 = vmatpush.bf16.msrb.mxu0 %v1295_v36  ;;  %v4553_v36 = vunpack.i.l.bf16 %v4552_v29 }
 0x361   : > { %1471 = vmatpush.bf16.msrb.mxu0 %v1293_v24  ;;  %v1445_v24 = vunpack.c.l.b16 %v1258_v17 }
 0x363   : > { %v1450_v28 = vpack.c.b16 %v1445_v24, %v1444_v25  ;;  %v5448_v24 = vld [vmem:[#allocation2 + $0x20] sm:$0xff] }
 0x364   : > { %v5418_v46 = vpop.trf.xlu1  ;;  %4030 = vmatmul.msk.bf16.vlgmr.msrb.gmra.mxu3 %vm1329_vm11, %v1387_v44  ;;  %4034 = vmatmul.msk.bf16.vlgmr.msrb.gmra.mxu0 %vm1329_vm11, %v1448_v45  ;;  %v1263_v44 = vpack.c.bf16 %v4553_v36, %v4553_v36  ;;  %v1386_v45 = vunpack.c.l.b16 %v1252_v38  ;;  %v5476_v38 = vld [vmem:[#allocation2 + $0x30] sm:$0xff] }
 0x366   : > { %v1503_v50 = vunpack.c.l.b16 %v1263_v44  ;;  %v1390_v51 = vpack.c.b16 %v1386_v45, %v1385_v10 }
 0x368   : > { %v1510_v61 = vpack.c.b16 %v1504_v40, %v1503_v50 }
 0x36c   : > { %v1297_v56 = vpop.trf.xlu1 }
 0x374   : > { %v5422_v2 = vpop.trf.xlu1  ;;  %4031 = vmatmul.msk.bf16.gmra.mxu3 %vm1329_vm11, %v1388_v60  ;;  %4035 = vmatmul.msk.bf16.gmra.mxu0 %vm1329_vm11, %v1449_v63  ;;  %v4567_v63 = vpop.permute.xlu0 %4566 }
 0x375   : > { %v4569_v1 = vunpack.i.h.bf16 %v4567_v63  ;;  %v4568_v7 = vunpack.i.l.bf16 %v4567_v63 }
 0x377   : > { %v1268_v11 = vpack.c.bf16 %v4569_v1, %v4569_v1  ;;  %v1267_v47 = vpack.c.bf16 %v4568_v7, %v4568_v7 }
 0x379   : > { %v1508_v3 = vunpack.c.l.b16 %v1268_v11  ;;  %v1507_v12 = vunpack.c.l.b16 %v1267_v47 }
 0x37b   : > { %v1512_v14 = vpack.c.b16 %v1508_v3, %v1507_v12 }
 0x37c   : > { %v1299_v57 = vpop.trf.xlu1 }
 0x37d   : > { %1531 = vmatpush.bf16.msrb.mxu1 %v1299_v57 }
 0x381   : > { %1532 = vmatpush.bf16.msrb.mxu1 %v1297_v56  ;;  %v4563_v56 = vunpack.i.l.bf16 %v4562_v52 }
 0x383   : > { %v1265_v54 = vpack.c.bf16 %v4563_v56, %v4563_v56 }
 0x384   : > { %4032 = vmatmul.msk.bf16.gmra.mxu3 %vm1329_vm11, %v1389_v5  ;;  %4036 = vmatmul.msk.bf16.gmra.mxu0 %vm1329_vm11, %v1450_v28  ;;  %v5455_v5 = vld [vmem:[#allocation2 + $0x18] sm:$0xff]  ;;  %v5457_v28 = vld [vmem:[#allocation2 + $0x28] sm:$0xff] }
 0x385   : > { %4038 = vmatmul.msk.bf16.vlgmr.msrb.gmra.mxu1 %vm1329_vm11, %v1509_v0  ;;  %v1505_v59 = vunpack.c.l.b16 %v1265_v54 }
 0x387   : > { %v1511_v60 = vpack.c.b16 %v1506_v6, %v1505_v59 }
 0x394   : > { %4033 = vmatmul.msk.bf16.gmra.mxu3 %vm1329_vm11, %v1390_v51  ;;  %4037 = vmatmul.msk.bf16.gmra.mxu0 %vm1329_vm11, %v1451_v37 }
 0x395   : > { %4039 = vmatmul.msk.bf16.gmra.mxu1 %vm1329_vm11, %v1510_v61 }
 0x3a5   : > { %4040 = vmatmul.msk.bf16.gmra.mxu1 %vm1329_vm11, %v1511_v60 }
 0x3a7   : > { %v1351_v9 = vpop.f32.mrf.mxu3 }
 0x3a8   : > { %v5444_v57 = vadd.f32 %v1351_v9, %v5441_v20 }
 0x3aa   : > { %v1555_v23 = vsel %vm1554_vm12, %v5444_v57, -inf }
 0x3af   : > { %v1353_v13 = vpop.f32.mrf.mxu3 }
 0x3b0   : > { %v5472_v33 = vadd.f32 %v1353_v13, %v5469_v32 }
 0x3b2   : > { %v1558_v36 = vsel %vm1554_vm12, %v5472_v33, -inf }
 0x3b5   : > { %4041 = vmatmul.msk.bf16.gmra.mxu1 %vm1329_vm11, %v1512_v14 }
 0x3b7   : > { %v1356_v17 = vpop.f32.mrf.mxu3 }
 0x3b8   : > { %v5437_v18 = vadd.f32 %v1356_v17, %v5434_v15 }
 0x3ba   : > { %v1561_v19 = vsel %vm1554_vm12, %v5437_v18, -inf }
 0x3bb   : > { %1562 = vmax.xlane.f32.xlu0 %v1561_v19 }
 0x3bf   : > { %v1358_v22 = vpop.f32.mrf.mxu3 }
 0x3c0   : > { %v5460_v0 = vadd.f32 %v1358_v22, %v5455_v5 }
 0x3c2   : > { %v1564_v31 = vsel %vm1554_vm12, %v5460_v0, -inf }
 0x3c3   : > { %1556 = vmax.xlane.f32.xlu0 %v1555_v23 }
 0x3c7   : > { %v1361_v25 = vpop.f32.mrf.mxu3 }
 0x3c8   : > { %v5451_v4 = vadd.f32 %v1361_v25, %v5448_v24 }
 0x3ca   : > { %v1567_v26 = vsel %vm1554_vm12, %v5451_v4, -inf }
 0x3cb   : > { %1568 = vmax.xlane.f32.xlu2 %v1567_v26 }
 0x3cf   : > { %v1363_v16 = vpop.f32.mrf.mxu3 }
 0x3d0   : > { %v5463_v29 = vadd.f32 %v1363_v16, %v5457_v28 }
 0x3d2   : > { %v1570_v30 = vsel %vm1554_vm12, %v5463_v29, -inf }
 0x3d3   : > { %1571 = vmax.xlane.f32.xlu1 %v1570_v30  ;;  %1565 = vmax.xlane.f32.xlu2 %v1564_v31 }
 0x3d7   : > { %v1366_v35 = vpop.f32.mrf.mxu3 }
 0x3d8   : > { %v5481_v39 = vadd.f32 %v1366_v35, %v5476_v38 }
 0x3da   : > { %v1573_v10 = vsel %vm1554_vm12, %v5481_v39, -inf }
 0x3db   : > { %1559 = vmax.xlane.f32.xlu2 %v1558_v36 }
 0x3df   : > { %v1368_v41 = vpop.f32.mrf.mxu3 }
 0x3e0   : > { %v5484_v43 = vadd.f32 %v1368_v41, %v5478_v34 }
 0x3e1   : > { %v1473_v44 = vpop.f32.mrf.mxu0 }
 0x3e2   : > { %v1576_v45 = vsel %vm1554_vm12, %v5484_v43, -inf  ;;  %v5491_v48 = vadd.f32 %v1473_v44, %v5441_v20 }
 0x3e3   : > { %1577 = vmax.xlane.f32.xlu0 %v1576_v45  ;;  %1574 = vmax.xlane.f32.xlu2 %v1573_v10 }
 0x3e4   : > { %v1603_v51 = vsel %vm1554_vm12, %v5491_v48, -inf }
 0x3e7   : > { %v1412_v49 = vpop.f32.mrf.mxu3 }
 0x3e8   : > { %v5501_v61 = vadd.f32 %v1412_v49, %v5441_v20 }
 0x3e9   : > { %v1475_v40 = vpop.f32.mrf.mxu0 }
 0x3ea   : > { %v5494_v50 = vadd.f32 %v1475_v40, %v5469_v32  ;;  %v1579_v53 = vsel %vm1554_vm12, %v5501_v61, -inf }
 0x3eb   : > { %1604 = vmax.xlane.f32.xlu0 %v1603_v51 }
 0x3ec   : > { %v1606_v37 = vsel %vm1554_vm12, %v5494_v50, -inf }
 0x3ed   : > { %1607 = vmax.xlane.f32.xlu2 %v1606_v37 }
 0x3ef   : > { %v1414_v52 = vpop.f32.mrf.mxu3 }
 0x3f0   : > { %v5504_v62 = vadd.f32 %v1414_v52, %v5469_v32 }
 0x3f1   : > { %v1478_v56 = vpop.f32.mrf.mxu0 }
 0x3f2   : > { %v1582_v54 = vsel %vm1554_vm12, %v5504_v62, -inf  ;;  %v5511_v6 = vadd.f32 %v1478_v56, %v5434_v15 }
 0x3f3   : > { %1580 = vmax.xlane.f32.xlu0 %v1579_v53 }
 0x3f4   : > { %v1609_v1 = vsel %vm1554_vm12, %v5511_v6, -inf }
 0x3f5   : > { %1583 = vmax.xlane.f32.xlu2 %v1582_v54 }
 0x3f7   : > { %v1417_v59 = vpop.f32.mrf.mxu3 }
 0x3f8   : > { %v5521_v9 = vadd.f32 %v1417_v59, %v5434_v15 }
 0x3f9   : > { %v1480_v60 = vpop.f32.mrf.mxu0 }
 0x3fa   : > { %v5514_v63 = vadd.f32 %v1480_v60, %v5455_v5  ;;  %v1585_v13 = vsel %vm1554_vm12, %v5521_v9, -inf }
 0x3fb   : > { %1610 = vmax.xlane.f32.xlu0 %v1609_v1 }
 0x3fc   : > { %v1612_v7 = vsel %vm1554_vm12, %v5514_v63, -inf }
 0x3fd   : > { %1613 = vmax.xlane.f32.xlu2 %v1612_v7 }
 0x3ff   : > { %v1419_v11 = vpop.f32.mrf.mxu3 }
 0x400   : > { %v5524_v47 = vadd.f32 %v1419_v11, %v5455_v5 }
 0x401   : > { %v1483_v3 = vpop.f32.mrf.mxu0 }
 0x402   : > { %v5526_v12 = vpop.f32.mrf.mxu1  ;;  %v1588_v14 = vsel %vm1554_vm12, %v5524_v47, -inf  ;;  %v5533_v17 = vadd.f32 %v1483_v3, %v5448_v24 }
 0x403   : > { %1586 = vmax.xlane.f32.xlu0 %v1585_v13 }
 0x404   : > { %v1615_v26 = vsel %vm1554_vm12, %v5533_v17, -inf }
 0x405   : > { %1589 = vmax.xlane.f32.xlu2 %v1588_v14 }
 0x407   : > { %v1422_v19 = vpop.f32.mrf.mxu3 }
 0x408   : > { %v5545_v30 = vadd.f32 %v1422_v19, %v5448_v24 }
 0x409   : > { %v1485_v22 = vpop.f32.mrf.mxu0 }
 0x40a   : > { %v5536_v23 = vadd.f32 %v1485_v22, %v5457_v28  ;;  %v5538_v25 = vpop.f32.mrf.mxu1  ;;  %v1591_v44 = vsel %vm1554_vm12, %v5545_v30, -inf }
 0x40b   : > { %1616 = vmax.xlane.f32.xlu0 %v1615_v26 }
 0x40c   : > { %v1618_v16 = vsel %vm1554_vm12, %v5536_v23, -inf }
 0x40d   : > { %1619 = vmax.xlane.f32.xlu2 %v1618_v16 }
 0x40f   : > { %v1424_v31 = vpop.f32.mrf.mxu3 }
 0x410   : > { %v5548_v35 = vadd.f32 %v1424_v31, %v5457_v28 }
 0x411   : > { %v1488_v36 = vpop.f32.mrf.mxu0 }
 0x412   : > { %v5550_v41 = vpop.f32.mrf.mxu1  ;;  %v1594_v45 = vsel %vm1554_vm12, %v5548_v35, -inf  ;;  %v5557_v10 = vadd.f32 %v1488_v36, %v5476_v38 }
 0x413   : > { %1592 = vmax.xlane.f32.xlu0 %v1591_v44 }
 0x414   : > { %v1621_v52 = vsel %vm1554_vm12, %v5557_v10, -inf }
 0x415   : > { %1595 = vmax.xlane.f32.xlu2 %v1594_v45 }
 0x417   : > { %v1427_v49 = vpop.f32.mrf.mxu3 }
 0x418   : > { %v5569_v53 = vadd.f32 %v1427_v49, %v5476_v38 }
 0x419   : > { %v1490_v40 = vpop.f32.mrf.mxu0 }
 0x41a   : > { %v5560_v51 = vadd.f32 %v1490_v40, %v5478_v34  ;;  %v5562_v37 = vpop.f32.mrf.mxu1  ;;  %v1597_v1 = vsel %vm1554_vm12, %v5569_v53, -inf }
 0x41b   : > { %1622 = vmax.xlane.f32.xlu0 %v1621_v52 }
 0x41c   : > { %v1624_v56 = vsel %vm1554_vm12, %v5560_v51, -inf }
 0x41d   : > { %1625 = vmax.xlane.f32.xlu2 %v1624_v56 }
 0x41f   : > { %v1429_v54 = vpop.f32.mrf.mxu3 }
 0x420   : > { %v5572_v59 = vadd.f32 %v1429_v54, %v5478_v34 }
 0x422   : > { %v1544_v60 = vpop.f32.mrf.mxu1  ;;  %v1600_v7 = vsel %vm1554_vm12, %v5572_v59, -inf }
 0x423   : > { %1598 = vmax.xlane.f32.xlu0 %v1597_v1  ;;  %v5579_v11 = vadd.f32 %v1544_v60, %v5448_v24 }
 0x425   : > { %1601 = vmax.xlane.f32.xlu2 %v1600_v7  ;;  %v1639_v13 = vsel %vm1554_vm12, %v5579_v11, -inf }
 0x42a   : > { %v1546_v3 = vpop.f32.mrf.mxu1 }
 0x42b   : > { %v5584_v14 = vadd.f32 %v1546_v3, %v5457_v28  ;;  %1640 = vmax.xlane.f32.xlu0 %v1639_v13  ;;  %v5605_v3 = vpop.trf.xlu1 }
 0x42d   : > { %v1642_v19 = vsel %vm1554_vm12, %v5584_v14, -inf }
 0x42e   : > { %1643 = vmax.xlane.f32.xlu2 %v1642_v19  ;;  %v1563_v22 = vpop.xlane.xlu0 %1562 }
 0x42f   : > { %v1653_v44 = vsub.f32 %v5437_v18, %v1563_v22 }
 0x431   : > { %v1687_v49 = vmul.f32 1.442695, %v1653_v44 }
 0x432   : > { %v1549_v45 = vpop.f32.mrf.mxu1 }
 0x433   : > { %v5595_v40 = vadd.f32 %v1549_v45, %v5476_v38 }
 0x435   : > { %v1645_v56 = vsel %vm1554_vm12, %v5595_v40, -inf }
 0x436   : > { %v1557_v26 = vpop.xlane.xlu0 %1556 }
 0x437   : > { %v1651_v16 = vsub.f32 %v5444_v57, %v1557_v26 }
 0x439   : > { %v1683_v31 = vmul.f32 1.442695, %v1651_v16 }
 0x43a   : > { %v1551_v44 = vpop.f32.mrf.mxu1 }
 0x43b   : > { %4594 = vpow2.f32 %v1683_v31  ;;  %v5618_v45 = vadd.f32 %v1551_v44, %v5478_v34 }
 0x43c   : > { %4596 = vpow2.f32 %v1687_v49 }
 0x43e   : > { %v1569_v24 = vpop.xlane.xlu2 %1568 }
 0x43f   : > { %v1655_v57 = vsub.f32 %v5451_v4, %v1569_v24 }
 0x441   : > { %v5589_v36 = vpop.eup %4594  ;;  %v1691_v54 = vmul.f32 1.442695, %v1655_v57 }
 0x442   : > { %v1747_v28 = vsel %vm1554_vm12, %v5589_v36, 0.0  ;;  %v5600_v18 = vpop.eup %4596 }
 0x443   : > { %1748 = vadd.xlane.f32.xlu0 %v1747_v28  ;;  %4598 = vpow2.f32 %v1691_v54  ;;  %v1753_v38 = vsel %vm1554_vm12, %v5600_v18, 0.0 }
 0x446   : > { %v1566_v52 = vpop.xlane.xlu2 %1565 }
 0x447   : > { %v1654_v16 = vsub.f32 %v5460_v0, %v1566_v52 }
 0x449   : > { %v5607_v19 = vpop.eup %4598  ;;  %v1689_v28 = vmul.f32 1.442695, %v1654_v16 }
 0x44a   : > { %v1759_v24 = vsel %vm1554_vm12, %v5607_v19, 0.0 }
 0x44b   : > { %1646 = vmax.xlane.f32.xlu0 %v1645_v56  ;;  %v1648_v56 = vsel %vm1554_vm12, %v5618_v45, -inf }
 0x44e   : > { %v1560_v60 = vpop.xlane.xlu2 %1559 }
 0x44f   : > { %v1652_v1 = vsub.f32 %v5472_v33, %v1560_v60 }
 0x451   : > { %v1685_v7 = vmul.f32 1.442695, %v1652_v1 }
 0x453   : > { %4600 = vpow2.f32 %v1685_v7  ;;  %1754 = vadd.xlane.f32.xlu0 %v1753_v38  ;;  %v5637_v7 = vadd.f32 %v5550_v41, %v5434_v15  ;;  %v5652_v15 = vadd.f32 %v5526_v12, %v5441_v20  ;;  %v5666_v20 = vadd.f32 %v5562_v37, %v5455_v5 }
 0x456   : > { %v1578_v4 = vpop.xlane.xlu0 %1577  ;;  %v1575_v13 = vpop.xlane.xlu2 %1574 }
 0x457   : > { %v1657_v22 = vsub.f32 %v5481_v39, %v1575_v13  ;;  %v1572_v39 = vpop.xlane.xlu1 %1571  ;;  %v1658_v38 = vsub.f32 %v5484_v43, %v1578_v4  ;;  %v1627_v4 = vsel %vm1554_vm12, %v5652_v15, -inf }
 0x458   : > { %v1656_v0 = vsub.f32 %v5463_v29, %v1572_v39 }
 0x459   : > { %v5610_v26 = vpop.eup %4600  ;;  %v1695_v33 = vmul.f32 1.442695, %v1657_v22  ;;  %v1633_v22 = vsel %vm1554_vm12, %v5637_v7, -inf  ;;  %v1697_v16 = vmul.f32 1.442695, %v1658_v38 }
 0x45a   : > { %v1750_v31 = vsel %vm1554_vm12, %v5610_v26, 0.0  ;;  %v1693_v34 = vmul.f32 1.442695, %v1656_v0 }
 0x45b   : > { %1751 = vadd.xlane.f32.xlu2 %v1750_v31  ;;  %1760 = vadd.xlane.f32.xlu0 %v1759_v24  ;;  %4602 = vpow2.f32 %v1695_v33 }
 0x45c   : > { %4604 = vpow2.f32 %v1689_v28 }
 0x45d   : > { %4606 = vpow2.f32 %v1693_v34 }
 0x45e   : > { %v5620_v49 = vpop.xlane.xlu0 %1604  ;;  %4608 = vpow2.f32 %v1697_v16 }
 0x460   : > { %v5622_v57 = vpop.xlane.xlu2 %1607 }
 0x461   : > { %v5625_v52 = vpop.eup %4602 }
 0x462   : > { %v1765_v54 = vsel %vm1554_vm12, %v5625_v52, 0.0  ;;  %v5633_v1 = vpop.eup %4604 }
 0x463   : > { %1649 = vmax.xlane.f32.xlu2 %v1648_v56  ;;  %1766 = vadd.xlane.f32.xlu0 %v1765_v54  ;;  %v1756_v13 = vsel %vm1554_vm12, %v5633_v1, 0.0  ;;  %v5648_v31 = vpop.eup %4606  ;;  %v1636_v56 = vsel %vm1554_vm12, %v5666_v20, -inf  ;;  %v5674_v54 = vadd.f32 %v5538_v25, %v5469_v32 }
 0x464   : > { %v1762_v43 = vsel %vm1554_vm12, %v5648_v31, 0.0  ;;  %v5660_v44 = vpop.eup %4608 }
 0x465   : > { %v1768_v39 = vsel %vm1554_vm12, %v5660_v44, 0.0  ;;  %v1630_v5 = vsel %vm1554_vm12, %v5674_v54, -inf }
 0x466   : > { %v5631_v60 = vpop.xlane.xlu0 %1580 }
 0x468   : > { %v5639_v29 = vpop.xlane.xlu2 %1583 }
 0x46b   : > { %1757 = vadd.xlane.f32.xlu2 %v1756_v13  ;;  %1634 = vmax.xlane.f32.xlu0 %v1633_v22 }
 0x46e   : > { %v5646_v33 = vpop.xlane.xlu0 %1610 }
 0x470   : > { %v5654_v41 = vpop.xlane.xlu2 %1613 }
 0x473   : > { %1763 = vadd.xlane.f32.xlu2 %v1762_v43  ;;  %1628 = vmax.xlane.f32.xlu0 %v1627_v4 }
 0x476   : > { %v1587_v24 = vpop.xlane.xlu0 %1586 }
 0x478   : > { %v1590_v28 = vpop.xlane.xlu2 %1589 }
 0x479   : > { %v1662_v25 = vsub.f32 %v5524_v47, %v1590_v28 }
 0x47b   : > { %1769 = vadd.xlane.f32.xlu2 %v1768_v39 }
 0x47e   : > { %v1617_v12 = vpop.xlane.xlu0 %1616 }
 0x480   : > { %v5668_v0 = vpop.xlane.xlu2 %1619 }
 0x483   : > { %1637 = vmax.xlane.f32.xlu2 %v1636_v56 }
 0x486   : > { %v1593_v34 = vpop.xlane.xlu0 %1592 }
 0x487   : > { %v1663_v38 = vsub.f32 %v5545_v30, %v1593_v34 }
 0x488   : > { %v1596_v13 = vpop.xlane.xlu2 %1595 }
 0x489   : > { %v1707_v22 = vmul.f32 1.442695, %v1663_v38  ;;  %v1664_v16 = vsub.f32 %v5548_v35, %v1596_v13  ;;  %v1705_v38 = vmul.f32 1.442695, %v1662_v25 }
 0x48b   : > { %4610 = vpow2.f32 %v1707_v22  ;;  %v1709_v37 = vmul.f32 1.442695, %v1664_v16  ;;  %1631 = vmax.xlane.f32.xlu2 %v1630_v5  ;;  %v1659_v22 = vsub.f32 %v5501_v61, %v5631_v60 }
 0x48d   : > { %4612 = vpow2.f32 %v1709_v37 }
 0x48e   : > { %v1623_v43 = vpop.xlane.xlu0 %1622 }
 0x48f   : > { %v1673_v4 = vsub.f32 %v5557_v10, %v1623_v43 }
 0x490   : > { %v1626_v39 = vpop.xlane.xlu2 %1625 }
 0x491   : > { %v5681_v32 = vpop.eup %4610  ;;  %v1727_v30 = vmul.f32 1.442695, %v1673_v4  ;;  %v1674_v16 = vsub.f32 %v5560_v51, %v1626_v39  ;;  %v1661_v4 = vsub.f32 %v5521_v9, %v1587_v24  ;;  %v1670_v51 = vsub.f32 %v5514_v63, %v5654_v41 }
 0x492   : > { %v1783_v56 = vsel %vm1554_vm12, %v5681_v32, 0.0 }
 0x493   : > { %v5686_v35 = vpop.eup %4612  ;;  %4614 = vpow2.f32 %v1727_v30  ;;  %1784 = vadd.xlane.f32.xlu0 %v1783_v56  ;;  %v1729_v30 = vmul.f32 1.442695, %v1674_v16  ;;  %v1703_v60 = vmul.f32 1.442695, %v1661_v4  ;;  %v1721_v63 = vmul.f32 1.442695, %v1670_v51 }
 0x494   : > { %v1786_v34 = vsel %vm1554_vm12, %v5686_v35, 0.0  ;;  %4616 = vpow2.f32 %v1705_v38  ;;  %v1669_v16 = vsub.f32 %v5511_v6, %v5646_v33 }
 0x495   : > { %1787 = vadd.xlane.f32.xlu2 %v1786_v34  ;;  %v1672_v34 = vsub.f32 %v5536_v23, %v5668_v0  ;;  %v1660_v23 = vsub.f32 %v5504_v62, %v5639_v29 }
 0x496   : > { %v1599_v13 = vpop.xlane.xlu0 %1598  ;;  %v1719_v4 = vmul.f32 1.442695, %v1669_v16 }
 0x497   : > { %v1665_v10 = vsub.f32 %v5569_v53, %v1599_v13  ;;  %v1699_v53 = vmul.f32 1.442695, %v1659_v22  ;;  %v1725_v13 = vmul.f32 1.442695, %v1672_v34 }
 0x498   : > { %v1602_v47 = vpop.xlane.xlu2 %1601 }
 0x499   : > { %v5693_v28 = vpop.eup %4614  ;;  %v1711_v5 = vmul.f32 1.442695, %v1665_v10  ;;  %v1666_v37 = vsub.f32 %v5572_v59, %v1602_v47  ;;  %v1671_v59 = vsub.f32 %v5533_v17, %v1617_v12  ;;  %v1667_v10 = vsub.f32 %v5491_v48, %v5620_v49 }
 0x49a   : > { %v1813_v43 = vsel %vm1554_vm12, %v5693_v28, 0.0  ;;  %v5700_v61 = vpop.eup %4616 }
 0x49b   : > { %4618 = vpow2.f32 %v1711_v5  ;;  %v1713_v25 = vmul.f32 1.442695, %v1666_v37  ;;  %1814 = vadd.xlane.f32.xlu1 %v1813_v43  ;;  %v1780_v9 = vsel %vm1554_vm12, %v5700_v61, 0.0  ;;  %v1723_v17 = vmul.f32 1.442695, %v1671_v59 }
 0x49c   : > { %v1715_v48 = vmul.f32 1.442695, %v1667_v10  ;;  %v1701_v5 = vmul.f32 1.442695, %v1660_v23  ;;  %v1668_v10 = vsub.f32 %v5494_v50, %v5622_v57 }
 0x49d   : > { %4620 = vpow2.f32 %v1713_v25 }
 0x49e   : > { %4622 = vpow2.f32 %v1699_v53  ;;  %v1641_v29 = vpop.xlane.xlu0 %1640 }
 0x49f   : > { %4624 = vpow2.f32 %v1729_v30 }
 0x4a0   : > { %4626 = vpow2.f32 %v1703_v60 }
 0x4a1   : > { %v5704_v39 = vpop.eup %4618  ;;  %4628 = vpow2.f32 %v1721_v63  ;;  %v1644_v37 = vpop.xlane.xlu2 %1643 }
 0x4a2   : > { %v1789_v24 = vsel %vm1554_vm12, %v5704_v39, 0.0  ;;  %4630 = vpow2.f32 %v1723_v17  ;;  %v1680_v6 = vsub.f32 %v5584_v14, %v1644_v37 }
 0x4a3   : > { %v5711_v56 = vpop.eup %4620  ;;  %1781 = vadd.xlane.f32.xlu1 %v1780_v9  ;;  %1790 = vadd.xlane.f32.xlu0 %v1789_v24  ;;  %4632 = vpow2.f32 %v1725_v13 }
 0x4a4   : > { %v1792_v41 = vsel %vm1554_vm12, %v5711_v56, 0.0  ;;  %v5717_v12 = vpop.eup %4622  ;;  %4634 = vpow2.f32 %v1715_v48  ;;  %v1741_v60 = vmul.f32 1.442695, %v1680_v6 }
 0x4a5   : > { %1793 = vadd.xlane.f32.xlu2 %v1792_v41  ;;  %v5719_v38 = vpop.eup %4624  ;;  %v1771_v0 = vsel %vm1554_vm12, %v5717_v12, 0.0  ;;  %4636 = vpow2.f32 %v1701_v5 }
 0x4a6   : > { %v5723_v22 = vpop.eup %4626  ;;  %v1816_v47 = vsel %vm1554_vm12, %v5719_v38, 0.0  ;;  %4638 = vpow2.f32 %v1719_v4 }
 0x4a7   : > { %v1777_v49 = vsel %vm1554_vm12, %v5723_v22, 0.0  ;;  %v5735_v62 = vpop.eup %4628  ;;  %4640 = vpow2.f32 %v1741_v60 }
 0x4a8   : > { %v5737_v43 = vpop.eup %4630  ;;  %v1804_v33 = vsel %vm1554_vm12, %v5735_v62, 0.0 }
 0x4a9   : > { %v5739_v25 = vpop.eup %4632  ;;  %v1807_v53 = vsel %vm1554_vm12, %v5737_v43, 0.0 }
 0x4aa   : > { %v1810_v30 = vsel %vm1554_vm12, %v5739_v25, 0.0  ;;  %v5748_v51 = vpop.eup %4634 }
 0x4ab   : > { %1772 = vadd.xlane.f32.xlu1 %v1771_v0  ;;  %1817 = vadd.xlane.f32.xlu0 %v1816_v47  ;;  %v5752_v9 = vpop.eup %4636  ;;  %v1795_v24 = vsel %vm1554_vm12, %v5748_v51, 0.0  ;;  %v1717_v47 = vmul.f32 1.442695, %v1668_v10 }
 0x4ac   : > { %v5754_v14 = vpop.eup %4638  ;;  %v1774_v34 = vsel %vm1554_vm12, %v5752_v9, 0.0 }
 0x4ad   : > { %1778 = vadd.xlane.f32.xlu2 %v1777_v49  ;;  %v1801_v63 = vsel %vm1554_vm12, %v5754_v14, 0.0  ;;  %v5762_v17 = vpop.eup %4640 }
 0x4ae   : > { %v1834_v0 = vsel %vm1554_vm12, %v5762_v17, 0.0 }
 0x4b3   : > { %1805 = vadd.xlane.f32.xlu1 %v1804_v33  ;;  %1808 = vadd.xlane.f32.xlu0 %v1807_v53  ;;  %v1679_v33 = vsub.f32 %v5579_v11, %v1641_v29 }
 0x4b5   : > { %1811 = vadd.xlane.f32.xlu2 %v1810_v30  ;;  %v1739_v30 = vmul.f32 1.442695, %v1679_v33 }
 0x4b6   : > { %v5750_v59 = vpop.xlane.xlu0 %1748 }
 0x4bb   : > { %1796 = vadd.xlane.f32.xlu1 %v1795_v24  ;;  %1775 = vadd.xlane.f32.xlu0 %v1774_v34 }
 0x4bd   : > { %1802 = vadd.xlane.f32.xlu2 %v1801_v63 }
 0x4be   : > { %v1647_v41 = vpop.xlane.xlu0 %1646 }
 0x4bf   : > { %v1681_v13 = vsub.f32 %v5595_v40, %v1647_v41 }
 0x4c1   : > { %v1743_v23 = vmul.f32 1.442695, %v1681_v13 }
 0x4c3   : > { %4642 = vpow2.f32 %v1743_v23  ;;  %1835 = vadd.xlane.f32.xlu1 %v1834_v0 }
 0x4c4   : > { %4644 = vpow2.f32 %v1717_v47 }
 0x4c6   : > { %v1755_v16 = vpop.xlane.xlu0 %1754 }
 0x4c9   : > { %v5769_v48 = vpop.eup %4642 }
 0x4ca   : > { %v1837_v49 = vsel %vm1554_vm12, %v5769_v48, 0.0  ;;  %v5773_v37 = vpop.eup %4644 }
 0x4cb   : > { %1838 = vadd.xlane.f32.xlu0 %v1837_v49  ;;  %v1798_v50 = vsel %vm1554_vm12, %v5773_v37, 0.0 }
 0x4ce   : > { %v1752_v5 = vpop.xlane.xlu2 %1751  ;;  %v1761_v40 = vpop.xlane.xlu0 %1760 }
 0x4d3   : > { %1799 = vadd.xlane.f32.xlu0 %v1798_v50 }
 0x4d6   : > { %v1650_v57 = vpop.xlane.xlu2 %1649  ;;  %v1767_v6 = vpop.xlane.xlu0 %1766 }
 0x4d7   : > { %v1682_v4 = vsub.f32 %v5618_v45, %v1650_v57 }
 0x4d9   : > { %v1745_v53 = vmul.f32 1.442695, %v1682_v4 }
 0x4db   : > { %4646 = vpow2.f32 %v1745_v53 }
 0x4dc   : > { %4648 = vpow2.f32 %v1739_v30 }
 0x4de   : > { %v1758_v60 = vpop.xlane.xlu2 %1757  ;;  %v1635_v24 = vpop.xlane.xlu0 %1634 }
 0x4df   : > { %v1677_v34 = vsub.f32 %v5637_v7, %v1635_v24 }
 0x4e1   : > { %v5780_v63 = vpop.eup %4646  ;;  %v1735_v41 = vmul.f32 1.442695, %v1677_v34 }
 0x4e2   : > { %v1840_v13 = vsel %vm1554_vm12, %v5780_v63, 0.0  ;;  %v5784_v10 = vpop.eup %4648 }
 0x4e3   : > { %1841 = vadd.xlane.f32.xlu2 %v1840_v13  ;;  %4650 = vpow2.f32 %v1735_v41  ;;  %v1831_v7 = vsel %vm1554_vm12, %v5784_v10, 0.0 }
 0x4e4   : > { %4652 = vrcp.f32 %v1767_v6 }
 0x4e6   : > { %v1764_v45 = vpop.xlane.xlu2 %1763  ;;  %v1629_v11 = vpop.xlane.xlu0 %1628 }
 0x4e7   : > { %v1675_v29 = vsub.f32 %v5652_v15, %v1629_v11 }
 0x4e9   : > { %v5787_v23 = vpop.eup %4650  ;;  %v1731_v0 = vmul.f32 1.442695, %v1675_v29 }
 0x4ea   : > { %v1825_v47 = vsel %vm1554_vm12, %v5787_v23, 0.0  ;;  %v4653_v50 = vpop.eup %4652 }
 0x4eb   : > { %1832 = vadd.xlane.f32.xlu2 %v1831_v7  ;;  %4654 = vpow2.f32 %v1731_v0  ;;  %1826 = vadd.xlane.f32.xlu0 %v1825_v47  ;;  %v1881_v15 = vmul.f32 %v4653_v50, %v5625_v52 }
 0x4ec   : > { %4656 = vrcp.f32 %v1764_v45 }
 0x4ed   : > { %4658 = vrcp.f32 %v1761_v40  ;;  %v1913_v34 = vpack.c.bf16 %v1881_v15, %v1881_v15 }
 0x4ee   : > { %v1770_v49 = vpop.xlane.xlu2 %1769 }
 0x4ef   : > { %4660 = vrcp.f32 %v1770_v49  ;;  %v1953_v11 = vunpack.c.l.b16 %v1913_v34 }
 0x4f0   : > { %4662 = vrcp.f32 %v1758_v60 }
 0x4f1   : > { %v5793_v57 = vpop.eup %4654  ;;  %4664 = vrcp.f32 %v1755_v16 }
 0x4f2   : > { %v4657_v4 = vpop.eup %4656  ;;  %v1819_v6 = vsel %vm1554_vm12, %v5793_v57, 0.0 }
 0x4f3   : > { %v4659_v33 = vpop.eup %4658  ;;  %1820 = vadd.xlane.f32.xlu1 %v1819_v6  ;;  %v1880_v40 = vmul.f32 %v4657_v4, %v5648_v31 }
 0x4f4   : > { %v1879_v52 = vmul.f32 %v4659_v33, %v5607_v19 }
 0x4f5   : > { %v4661_v53 = vpop.eup %4660  ;;  %v1912_v0 = vpack.c.bf16 %v1880_v40, %v1880_v40 }
 0x4f6   : > { %v1882_v30 = vmul.f32 %v4661_v53, %v5660_v44  ;;  %v1638_v24 = vpop.xlane.xlu2 %1637  ;;  %v4663_v7 = vpop.eup %4662  ;;  %v1911_v60 = vpack.c.bf16 %v1879_v52, %v1879_v52 }
 0x4f7   : > { %v1678_v41 = vsub.f32 %v5666_v20, %v1638_v24  ;;  %v4665_v49 = vpop.eup %4664  ;;  %v1952_v31 = vunpack.c.l.b16 %v1912_v0  ;;  %v1878_v16 = vmul.f32 %v4663_v7, %v5633_v1 }
 0x4f8   : > { %v1914_v13 = vpack.c.bf16 %v1882_v30, %v1882_v30  ;;  %v1951_v20 = vunpack.c.l.b16 %v1911_v60  ;;  %v1877_v15 = vmul.f32 %v4665_v49, %v5600_v18 }
 0x4f9   : > { %v1737_v45 = vmul.f32 1.442695, %v1678_v41  ;;  %v1910_v53 = vpack.c.bf16 %v1878_v16, %v1878_v16 }
 0x4fa   : > { %v1954_v29 = vunpack.c.l.b16 %v1914_v13  ;;  %v1957_v33 = vpack.c.b16 %v1952_v31, %v1951_v20  ;;  %v1909_v1 = vpack.c.bf16 %v1877_v15, %v1877_v15 }
 0x4fb   : > { %4666 = vpow2.f32 %v1737_v45 }
 0x4fc   : > { %v1958_v47 = vpack.c.b16 %v1954_v29, %v1953_v11  ;;  %4668 = vrcp.f32 %v1752_v5  ;;  %v1949_v18 = vunpack.c.l.b16 %v1909_v1 }
 0x4fd   : > { %4670 = vrcp.f32 %v5750_v59  ;;  %v1972_v59 = vsel %vm1554_vm12, %v1957_v33, 0 }
 0x4fe   : > { %v1632_v44 = vpop.xlane.xlu2 %1631  ;;  %v1975_v50 = vsel %vm1554_vm12, %v1958_v47, 0 }
 0x4ff   : > { %v1676_v19 = vsub.f32 %v5674_v54, %v1632_v44  ;;  %1981 = vmatpush.bf16.xpose.msra.mxu2 %v1975_v50  ;;  %v1950_v54 = vunpack.c.l.b16 %v1910_v53 }
 0x501   : > { %v5807_v4 = vpop.eup %4666  ;;  %v1733_v6 = vmul.f32 1.442695, %v1676_v19  ;;  %v1956_v52 = vpack.c.b16 %v1950_v54, %v1949_v18 }
 0x502   : > { %v1828_v5 = vsel %vm1554_vm12, %v5807_v4, 0.0  ;;  %v4669_v30 = vpop.eup %4668 }
 0x503   : > { %4672 = vpow2.f32 %v1733_v6  ;;  %1829 = vadd.xlane.f32.xlu2 %v1828_v5  ;;  %v4671_v24 = vpop.eup %4670  ;;  %v1876_v34 = vmul.f32 %v4669_v30, %v5610_v26  ;;  %v1969_v7 = vsel %vm1554_vm12, %v1956_v52, 0 }
 0x504   : > { %v1875_v40 = vmul.f32 %v4671_v24, %v5589_v36 }
 0x505   : > { %v1908_v45 = vpack.c.bf16 %v1876_v34, %v1876_v34 }
 0x506   : > { %v1907_v11 = vpack.c.bf16 %v1875_v40, %v1875_v40  ;;  %v1785_v29 = vpop.xlane.xlu0 %1784 }
 0x507   : > { %1982 = vmatpush.bf16.xpose.msra.mxu2 %v1972_v59  ;;  %v1948_v47 = vunpack.c.l.b16 %v1908_v45  ;;  %4674 = vrcp.f32 %v1785_v29 }
 0x508   : > { %v1788_v26 = vpop.xlane.xlu2 %1787  ;;  %v1947_v60 = vunpack.c.l.b16 %v1907_v11 }
 0x509   : > { %v5814_v41 = vpop.eup %4672  ;;  %4676 = vrcp.f32 %v1788_v26 }
 0x50a   : > { %v1822_v13 = vsel %vm1554_vm12, %v5814_v41, 0.0  ;;  %v1955_v49 = vpack.c.b16 %v1948_v47, %v1947_v60 }
 0x50b   : > { %1823 = vadd.xlane.f32.xlu0 %v1822_v13 }
 0x50c   : > { %v1966_v50 = vsel %vm1554_vm12, %v1955_v49, 0 }
 0x50d   : > { %v4675_v16 = vpop.eup %4674 }
 0x50e   : > { %v1815_v0 = vpop.xlane.xlu1 %1814  ;;  %v1887_v34 = vmul.f32 %v4675_v16, %v5681_v32 }
 0x50f   : > { %1983 = vmatpush.bf16.xpose.msra.mxu2 %v1969_v7  ;;  %v4677_v19 = vpop.eup %4676 }
 0x510   : > { %v1888_v24 = vmul.f32 %v4677_v19, %v5686_v35  ;;  %v1919_v29 = vpack.c.bf16 %v1887_v34, %v1887_v34 }
 0x512   : > { %v1920_v13 = vpack.c.bf16 %v1888_v24, %v1888_v24  ;;  %v2008_v49 = vunpack.c.l.b16 %v1919_v29 }
 0x514   : > { %v2009_v32 = vunpack.c.l.b16 %v1920_v13 }
 0x516   : > { %v1782_v36 = vpop.xlane.xlu1 %1781  ;;  %v1791_v44 = vpop.xlane.xlu0 %1790 }
 0x517   : > { %1984 = vmatpush.bf16.xpose.msra.mxu2 %v1966_v50  ;;  %4678 = vrcp.f32 %v1791_v44 }
 0x518   : > { %v1794_v31 = vpop.xlane.xlu2 %1793 }
 0x519   : > { %4680 = vrcp.f32 %v1794_v31 }
 0x51a   : > { %4682 = vrcp.f32 %v1815_v0 }
 0x51b   : > { %4684 = vrcp.f32 %v1782_v36 }
 0x51d   : > { %v4679_v20 = vpop.eup %4678 }
 0x51e   : > { %v1773_v15 = vpop.xlane.xlu1 %1772  ;;  %4042 = vmatmul.msk.bf16.vlgmr.msra.gmra.mxu2 %vm1554_vm12, %v5404_v55  ;;  %v1818_v6 = vpop.xlane.xlu0 %1817  ;;  %v1889_v33 = vmul.f32 %v4679_v20, %v5704_v39 }
 0x51f   : > { %v4681_v5 = vpop.eup %4680  ;;  %4686 = vrcp.f32 %v1818_v6 }
 0x520   : > { %v4683_v53 = vpop.eup %4682  ;;  %v1890_v30 = vmul.f32 %v4681_v5, %v5711_v56  ;;  %v1779_v1 = vpop.xlane.xlu2 %1778  ;;  %v1921_v59 = vpack.c.bf16 %v1889_v33, %v1889_v33 }
 0x521   : > { %4688 = vrcp.f32 %v1779_v1  ;;  %v1897_v18 = vmul.f32 %v4683_v53, %v5693_v28  ;;  %v4685_v52 = vpop.eup %4684 }
 0x522   : > { %v1922_v54 = vpack.c.bf16 %v1890_v30, %v1890_v30  ;;  %v2010_v55 = vunpack.c.l.b16 %v1921_v59  ;;  %v1886_v36 = vmul.f32 %v4685_v52, %v5700_v61 }
 0x523   : > { %v1929_v7 = vpack.c.bf16 %v1897_v18, %v1897_v18 }
 0x524   : > { %v2011_v40 = vunpack.c.l.b16 %v1922_v54  ;;  %v1918_v6 = vpack.c.bf16 %v1886_v36, %v1886_v36 }
 0x525   : > { %v4687_v45 = vpop.eup %4686  ;;  %v2067_v44 = vunpack.c.l.b16 %v1929_v7 }
 0x526   : > { %v1809_v39 = vpop.xlane.xlu0 %1808  ;;  %v2015_v11 = vpack.c.b16 %v2011_v40, %v2010_v55  ;;  %v1898_v0 = vmul.f32 %v4687_v45, %v5719_v38  ;;  %v1806_v35 = vpop.xlane.xlu1 %1805  ;;  %v2014_v38 = vpack.c.b16 %v2009_v32, %v2008_v49  ;;  %v2007_v59 = vunpack.c.l.b16 %v1918_v6 }
 0x527   : > { %v4689_v56 = vpop.eup %4688  ;;  %4690 = vrcp.f32 %v1809_v39 }
 0x528   : > { %v1812_v47 = vpop.xlane.xlu2 %1811  ;;  %v2032_v26 = vsel %vm1554_vm12, %v2015_v11, 0  ;;  %v1885_v28 = vmul.f32 %v4689_v56, %v5723_v22  ;;  %v1930_v60 = vpack.c.bf16 %v1898_v0, %v1898_v0  ;;  %v2029_v53 = vsel %vm1554_vm12, %v2014_v38, 0 }
 0x529   : > { %4692 = vrcp.f32 %v1812_v47  ;;  %2038 = vmatpush.bf16.xpose.msrb.mxu2 %v2032_v26 }
 0x52a   : > { %4694 = vrcp.f32 %v1773_v15  ;;  %v2068_v50 = vunpack.c.l.b16 %v1930_v60  ;;  %v1917_v31 = vpack.c.bf16 %v1885_v28, %v1885_v28 }
 0x52b   : > { %4696 = vrcp.f32 %v1806_v35 }
 0x52c   : > { %v2072_v16 = vpack.c.b16 %v2068_v50, %v2067_v44  ;;  %v2006_v30 = vunpack.c.l.b16 %v1917_v31 }
 0x52d   : > { %v4691_v19 = vpop.eup %4690 }
 0x52e   : > { %4043 = vmatmul.msk.bf16.gmra.mxu2 %vm1554_vm12, %v5407_v8  ;;  %v1776_v20 = vpop.xlane.xlu0 %1775  ;;  %v2089_v5 = vsel %vm1554_vm12, %v2072_v16, 0  ;;  %v1895_v15 = vmul.f32 %v4691_v19, %v5737_v43  ;;  %v2013_v18 = vpack.c.b16 %v2007_v59, %v2006_v30  ;;  %v1797_v28 = vpop.xlane.xlu1 %1796 }
 0x52f   : > { %v4693_v22 = vpop.eup %4692  ;;  %4698 = vrcp.f32 %v1776_v20  ;;  %2095 = vmatpush.bf16.xpose.msra.mxu3 %v2089_v5 }
 0x530   : > { %v4695_v33 = vpop.eup %4694  ;;  %v1803_v61 = vpop.xlane.xlu2 %1802  ;;  %v1896_v1 = vmul.f32 %v4693_v22, %v5739_v25  ;;  %v1927_v8 = vpack.c.bf16 %v1895_v15, %v1895_v15  ;;  %v2026_v25 = vsel %vm1554_vm12, %v2013_v18, 0 }
 0x531   : > { %v4697_v24 = vpop.eup %4696  ;;  %4700 = vrcp.f32 %v1803_v61  ;;  %2039 = vmatpush.bf16.xpose.msrb.mxu2 %v2029_v53  ;;  %v1883_v34 = vmul.f32 %v4695_v33, %v5717_v12 }
 0x532   : > { %v1928_v54 = vpack.c.bf16 %v1896_v1, %v1896_v1  ;;  %v2065_v55 = vunpack.c.l.b16 %v1927_v8  ;;  %v1894_v40 = vmul.f32 %v4697_v24, %v5735_v62  ;;  %4702 = vrcp.f32 %v1797_v28 }
 0x533   : > { %v1915_v11 = vpack.c.bf16 %v1883_v34, %v1883_v34 }
 0x534   : > { %v2066_v43 = vunpack.c.l.b16 %v1928_v54  ;;  %v1926_v0 = vpack.c.bf16 %v1894_v40, %v1894_v40 }
 0x535   : > { %v4699_v13 = vpop.eup %4698  ;;  %v2004_v35 = vunpack.c.l.b16 %v1915_v11 }
 0x536   : > { %v2071_v52 = vpack.c.b16 %v2066_v43, %v2065_v55  ;;  %v1884_v39 = vmul.f32 %v4699_v13, %v5752_v9  ;;  %v2064_v26 = vunpack.c.l.b16 %v1926_v0  ;;  %v1836_v5 = vpop.xlane.xlu1 %1835 }
 0x537   : > { %v4701_v45 = vpop.eup %4700 }
 0x538   : > { %v2086_v29 = vsel %vm1554_vm12, %v2071_v52, 0  ;;  %v1893_v56 = vmul.f32 %v4701_v45, %v5754_v14  ;;  %v1916_v12 = vpack.c.bf16 %v1884_v39, %v1884_v39  ;;  %v4703_v44 = vpop.eup %4702 }
 0x539   : > { %2040 = vmatpush.bf16.xpose.msrb.mxu2 %v2026_v25  ;;  %2096 = vmatpush.bf16.xpose.msra.mxu3 %v2086_v29  ;;  %v1891_v50 = vmul.f32 %v4703_v44, %v5748_v51 }
 0x53a   : > { %v1925_v7 = vpack.c.bf16 %v1893_v56, %v1893_v56  ;;  %v2005_v47 = vunpack.c.l.b16 %v1916_v12 }
 0x53b   : > { %v1923_v16 = vpack.c.bf16 %v1891_v50, %v1891_v50 }
 0x53c   : > { %v2063_v62 = vunpack.c.l.b16 %v1925_v7  ;;  %v2012_v32 = vpack.c.b16 %v2005_v47, %v2004_v35 }
 0x53d   : > { %v2061_v20 = vunpack.c.l.b16 %v1923_v16 }
 0x53e   : > { %v1839_v60 = vpop.xlane.xlu0 %1838  ;;  %v2070_v9 = vpack.c.b16 %v2064_v26, %v2063_v62  ;;  %v2023_v49 = vsel %vm1554_vm12, %v2012_v32, 0 }
 0x540   : > { %v2083_v36 = vsel %vm1554_vm12, %v2070_v9, 0 }
 0x541   : > { %2041 = vmatpush.bf16.xpose.msrb.mxu2 %v2023_v49  ;;  %2097 = vmatpush.bf16.xpose.msra.mxu3 %v2083_v36 }
 0x546   : > { %v1800_v14 = vpop.xlane.xlu0 %1799 }
 0x547   : > { %4704 = vrcp.f32 %v1800_v14 }
 0x548   : > { %4044 = vmatmul.msk.bf16.vlgmr.msrb.gmra.mxu2 %vm1554_vm12, %v5409_v58  ;;  %4706 = vrcp.f32 %v1839_v60 }
 0x54d   : > { %v4705_v38 = vpop.eup %4704 }
 0x54e   : > { %v1892_v31 = vmul.f32 %v4705_v38, %v5773_v37  ;;  %v4707_v61 = vpop.eup %4706 }
 0x54f   : > { %v1905_v58 = vmul.f32 %v4707_v61, %v5769_v48 }
 0x550   : > { %v1924_v19 = vpack.c.bf16 %v1892_v31, %v1892_v31 }
 0x551   : > { %v1937_v30 = vpack.c.bf16 %v1905_v58, %v1905_v58 }
 0x552   : > { %v2062_v6 = vunpack.c.l.b16 %v1924_v19 }
 0x553   : > { %v2124_v8 = vunpack.c.l.b16 %v1937_v30 }
 0x554   : > { %v2069_v22 = vpack.c.b16 %v2062_v6, %v2061_v20 }
 0x556   : > { %v1842_v15 = vpop.xlane.xlu2 %1841  ;;  %v2080_v33 = vsel %vm1554_vm12, %v2069_v22, 0 }
 0x557   : > { %4708 = vrcp.f32 %v1842_v15  ;;  %2098 = vmatpush.bf16.xpose.msra.mxu3 %v2080_v33 }
 0x558   : > { %4045 = vmatmul.msk.bf16.gmra.mxu2 %vm1554_vm12, %v5412_v21  ;;  %4710 = vrcp.f32 %v1836_v5 }
 0x55d   : > { %v4709_v51 = vpop.eup %4708 }
 0x55e   : > { %v1906_v37 = vmul.f32 %v4709_v51, %v5780_v63  ;;  %v1833_v53 = vpop.xlane.xlu2 %1832  ;;  %4046 = vmatmul.msk.bf16.vlgmr.msra.gmra.mxu3 %vm1554_vm12, %v5415_v27  ;;  %v4711_v1 = vpop.eup %4710 }
 0x55f   : > { %4712 = vrcp.f32 %v1833_v53  ;;  %v1904_v54 = vmul.f32 %v4711_v1, %v5762_v17  ;;  %v1827_v13 = vpop.xlane.xlu0 %1826 }
 0x560   : > { %v1938_v24 = vpack.c.bf16 %v1906_v37, %v1906_v37  ;;  %4714 = vrcp.f32 %v1827_v13 }
 0x561   : > { %v1936_v55 = vpack.c.bf16 %v1904_v54, %v1904_v54 }
 0x562   : > { %v2125_v59 = vunpack.c.l.b16 %v1938_v24 }
 0x563   : > { %v2123_v40 = vunpack.c.l.b16 %v1936_v55 }
 0x564   : > { %v2129_v34 = vpack.c.b16 %v2125_v59, %v2124_v8 }
 0x565   : > { %v4713_v21 = vpop.eup %4712 }
 0x566   : > { %v2146_v18 = vsel %vm1554_vm12, %v2129_v34, 0  ;;  %v1903_v48 = vmul.f32 %v4713_v21, %v5784_v10  ;;  %v1821_v17 = vpop.xlane.xlu1 %1820  ;;  %v4715_v39 = vpop.eup %4714 }
 0x567   : > { %2152 = vmatpush.bf16.xpose.msra.mxu0 %v2146_v18  ;;  %v1901_v10 = vmul.f32 %v4715_v39, %v5787_v23  ;;  %v4378_v39 = vld [vmem:[%s5109_s13 + $0x38] sm:$0xff] }
 0x568   : > { %v1935_v63 = vpack.c.bf16 %v1903_v48, %v1903_v48  ;;  %2315 = vmatpush.bf16.msra.mxu1 %v4378_v39 }
 0x569   : > { %v1933_v56 = vpack.c.bf16 %v1901_v10, %v1901_v10 }
 0x56a   : > { %v2122_v43 = vunpack.c.l.b16 %v1935_v63 }
 0x56c   : > { %v2128_v27 = vpack.c.b16 %v2123_v40, %v2122_v43 }
 0x56e   : > { %4047 = vmatmul.msk.bf16.gmra.mxu3 %vm1554_vm12, %v5418_v46  ;;  %v2143_v52 = vsel %vm1554_vm12, %v2128_v27, 0  ;;  %v2120_v46 = vunpack.c.l.b16 %v1933_v56 }
 0x56f   : > { %2153 = vmatpush.bf16.xpose.msra.mxu0 %v2143_v52 }
 0x576   : > { %v1830_v45 = vpop.xlane.xlu2 %1829 }
 0x577   : > { %4716 = vrcp.f32 %v1830_v45 }
 0x578   : > { %4718 = vrcp.f32 %v1821_v17 }
 0x57d   : > { %v4717_v11 = vpop.eup %4716 }
 0x57e   : > { %v1824_v25 = vpop.xlane.xlu0 %1823  ;;  %v1902_v29 = vmul.f32 %v4717_v11, %v5807_v4  ;;  %v4719_v0 = vpop.eup %4718  ;;  %v4377_v11 = vld [vmem:[%s5109_s13 + $0x30] sm:$0xff] }
 0x57f   : > { %4720 = vrcp.f32 %v1824_v25  ;;  %v1899_v35 = vmul.f32 %v4719_v0, %v5793_v57  ;;  %2316 = vmatpush.bf16.msra.mxu1 %v4377_v11  ;;  %v4376_v25 = vld [vmem:[%s5109_s13 + $0x28] sm:$0xff] }
 0x580   : > { %v1934_v12 = vpack.c.bf16 %v1902_v29, %v1902_v29 }
 0x581   : > { %v1931_v28 = vpack.c.bf16 %v1899_v35, %v1899_v35 }
 0x582   : > { %v2121_v7 = vunpack.c.l.b16 %v1934_v12  ;;  %v4375_v12 = vld [vmem:[%s5109_s13 + $0x20] sm:$0xff] }
 0x583   : > { %v2118_v60 = vunpack.c.l.b16 %v1931_v28  ;;  %2317 = vmatpush.bf16.msra.mxu1 %v4376_v25 }
 0x584   : > { %v2127_v47 = vpack.c.b16 %v2121_v7, %v2120_v46 }
 0x585   : > { %v4721_v62 = vpop.eup %4720 }
 0x586   : > { %v2140_v26 = vsel %vm1554_vm12, %v2127_v47, 0  ;;  %v1900_v32 = vmul.f32 %v4721_v62, %v5814_v41  ;;  %v4374_v47 = vld [vmem:[%s5109_s13 + $0x18] sm:$0xff] }
 0x587   : > { %2154 = vmatpush.bf16.xpose.msra.mxu0 %v2140_v26  ;;  %2318 = vmatpush.bf16.msra.mxu1 %v4375_v12  ;;  %v4373_v26 = vld [vmem:[%s5109_s13 + $0x10] sm:$0xff] }
 0x588   : > { %v1932_v23 = vpack.c.bf16 %v1900_v32, %v1900_v32  ;;  %v4372_v32 = vld [vmem:[%s5109_s13 + $0x8] sm:$0xff] }
 0x58a   : > { %v2119_v9 = vunpack.c.l.b16 %v1932_v23 }
 0x58b   : > { %2319 = vmatpush.bf16.msra.mxu1 %v4374_v47 }
 0x58c   : > { %v2126_v4 = vpack.c.b16 %v2119_v9, %v2118_v60  ;;  %v4371_v9 = vld [vmem:[%s5109_s13] sm:$0xff] }
 0x58e   : > { %v2137_v49 = vsel %vm1554_vm12, %v2126_v4, 0 }
 0x58f   : > { %2155 = vmatpush.bf16.xpose.msra.mxu0 %v2137_v49  ;;  %2320 = vmatpush.bf16.msra.mxu1 %v4373_v26 }
 0x593   : > { %2321 = vmatpush.bf16.msra.mxu1 %v4372_v32 }
 0x596   : > { %4048 = vmatmul.msk.bf16.vlgmr.msra.gmra.mxu0 %vm1554_vm12, %v5422_v2 }
 0x597   : > { %2322 = vmatpush.bf16.msra.mxu1 %v4371_v9 }
 0x5a1   : > { %v1986_v36 = vpop.f32.mrf.mxu2 }
 0x5a2   : > { %v2167_v57 = vpack.c.bf16 %v1986_v36, %v1986_v36 }
 0x5a4   : > { %v2199_v41 = vunpack.c.l.b16 %v2167_v57 }
 0x5a6   : > { %4049 = vmatmul.msk.bf16.gmra.mxu0 %vm1554_vm12, %v5605_v3 }
 0x5a9   : > { %v1988_v14 = vpop.f32.mrf.mxu2 }
 0x5aa   : > { %v2168_v44 = vpack.c.bf16 %v1988_v14, %v1988_v14 }
 0x5ac   : > { %v2200_v50 = vunpack.c.l.b16 %v2168_v44 }
 0x5ae   : > { %v2215_v38 = vpack.c.b16 %v2200_v50, %v2199_v41  ;;  %v4572_v50 = vld [vmem:[%s6525_s16] ss:$0 sm:$0xff] }
 0x5b0   : > { %2231 = vxpose.xlu2.c.b16.start [1/8] (narrow) %v2215_v38, 64 }
 0x5b1   : > { %v1991_v31 = vpop.f32.mrf.mxu2 }
 0x5b2   : > { %v2169_v16 = vpack.c.bf16 %v1991_v31, %v1991_v31 }
 0x5b4   : > { %v2201_v6 = vunpack.c.l.b16 %v2169_v16  ;;  %v4802_v16 = vld [vmem:[#allocation8] sm:$0xff] }
 0x5b9   : > { %v1993_v19 = vpop.f32.mrf.mxu2 }
 0x5ba   : > { %v2170_v20 = vpack.c.bf16 %v1993_v19, %v1993_v19 }
 0x5bc   : > { %v2202_v22 = vunpack.c.l.b16 %v2170_v20 }
 0x5be   : > { %v2216_v5 = vpack.c.b16 %v2202_v22, %v2201_v6  ;;  %v4803_v22 = vld [vmem:[#allocation8 + $0x8] sm:$0xff] }
 0x5c0   : > { %2232 = vxpose.xlu2.c.b16.cont [2/8] (narrow) %v2216_v5, 64 }
 0x5cb   : > { %v2043_v2 = vpop.f32.mrf.mxu2 }
 0x5cc   : > { %v2171_v15 = vpack.c.bf16 %v2043_v2, %v2043_v2 }
 0x5ce   : > { %v2203_v3 = vunpack.c.l.b16 %v2171_v15 }
 0x5d3   : > { %v2045_v33 = vpop.f32.mrf.mxu2 }
 0x5d4   : > { %v2172_v61 = vpack.c.bf16 %v2045_v33, %v2045_v33  ;;  %v4804_v33 = vld [vmem:[#allocation8 + $0x10] sm:$0xff] }
 0x5d6   : > { %v2204_v58 = vunpack.c.l.b16 %v2172_v61 }
 0x5d8   : > { %v2217_v51 = vpack.c.b16 %v2204_v58, %v2203_v3 }
 0x5da   : > { %2233 = vxpose.xlu2.c.b16.cont [3/8] (narrow) %v2217_v51, 64  ;;  %v4805_v51 = vld [vmem:[#allocation8 + $0x18] sm:$0xff] }
 0x5db   : > { %v2048_v37 = vpop.f32.mrf.mxu2 }
 0x5dc   : > { %v2173_v30 = vpack.c.bf16 %v2048_v37, %v2048_v37 }
 0x5de   : > { %v2205_v8 = vunpack.c.l.b16 %v2173_v30 }
 0x5e1   : > { %v2100_v53 = vpop.f32.mrf.mxu3 }
 0x5e2   : > { %v2175_v18 = vpack.c.bf16 %v2100_v53, %v2100_v53 }
 0x5e3   : > { %v2050_v1 = vpop.f32.mrf.mxu2 }
 0x5e4   : > { %v2174_v24 = vpack.c.bf16 %v2050_v1, %v2050_v1  ;;  %v2207_v63 = vunpack.c.l.b16 %v2175_v18  ;;  %v4806_v1 = vld [vmem:[#allocation8 + $0x20] sm:$0xff] }
 0x5e6   : > { %v2206_v59 = vunpack.c.l.b16 %v2174_v24 }
 0x5e8   : > { %v2218_v54 = vpack.c.b16 %v2206_v59, %v2205_v8 }
 0x5e9   : > { %v2102_v34 = vpop.f32.mrf.mxu3 }
 0x5ea   : > { %2234 = vxpose.xlu2.c.b16.cont [4/8] (narrow) %v2218_v54, 64  ;;  %v2176_v21 = vpack.c.bf16 %v2102_v34, %v2102_v34  ;;  %v4807_v54 = vld [vmem:[#allocation8 + $0x28] sm:$0xff] }
 0x5ec   : > { %v2208_v55 = vunpack.c.l.b16 %v2176_v21 }
 0x5ee   : > { %v2219_v43 = vpack.c.b16 %v2208_v55, %v2207_v63 }
 0x5f1   : > { %v2105_v48 = vpop.f32.mrf.mxu3 }
 0x5f2   : > { %v2177_v13 = vpack.c.bf16 %v2105_v48, %v2105_v48 }
 0x5f4   : > { %v2209_v17 = vunpack.c.l.b16 %v2177_v13 }
 0x5f9   : > { %v2107_v40 = vpop.f32.mrf.mxu3 }
 0x5fa   : > { %2235 = vxpose.xlu2.c.b16.cont [5/8] (narrow) %v2219_v43, 64  ;;  %v2178_v27 = vpack.c.bf16 %v2107_v40, %v2107_v40 }
 0x5fc   : > { %v2210_v52 = vunpack.c.l.b16 %v2178_v27 }
 0x5fe   : > { %v2220_v45 = vpack.c.b16 %v2210_v52, %v2209_v17  ;;  %v4808_v52 = vld [vmem:[#allocation8 + $0x30] sm:$0xff] }
 0x60a   : > { %2236 = vxpose.xlu2.c.b16.cont [6/8] (narrow) %v2220_v45, 64 }
 0x613   : > { %v2157_v10 = vpop.f32.mrf.mxu0 }
 0x614   : > { %v2179_v29 = vpack.c.bf16 %v2157_v10, %v2157_v10 }
 0x616   : > { %v2211_v46 = vunpack.c.l.b16 %v2179_v29 }
 0x61b   : > { %v2159_v56 = vpop.f32.mrf.mxu0 }
 0x61c   : > { %v2180_v0 = vpack.c.bf16 %v2159_v56, %v2159_v56  ;;  %v4809_v56 = vld [vmem:[#allocation8 + $0x38] sm:$0xff] }
 0x61e   : > { %v2212_v7 = vunpack.c.l.b16 %v2180_v0 }
 0x620   : > { %v2221_v35 = vpack.c.b16 %v2212_v7, %v2211_v46 }
 0x622   : > { %2237 = vxpose.xlu2.c.b16.cont [7/8] (narrow) %v2221_v35, 64 }
 0x623   : > { %v2162_v62 = vpop.f32.mrf.mxu0 }
 0x624   : > { %v2181_v28 = vpack.c.bf16 %v2162_v62, %v2162_v62 }
 0x626   : > { %v2213_v4 = vunpack.c.l.b16 %v2181_v28 }
 0x62b   : > { %v2164_v23 = vpop.f32.mrf.mxu0 }
 0x62c   : > { %v2182_v60 = vpack.c.bf16 %v2164_v23, %v2164_v23 }
 0x62e   : > { %v2214_v49 = vunpack.c.l.b16 %v2182_v60 }
 0x630   : > { %v2222_v36 = vpack.c.b16 %v2214_v49, %v2213_v4  ;;  %v4196_v49 = vld [vmem:[%s5123_s21 + $0xe0] sm:$0xf] }
 0x632   : > { %2238 = vxpose.xlu2.c.b16.end [8/8] (narrow) %v2222_v36, 64  ;;  %v4409_v36 = vld [vmem:[%s5123_s21 + $0xec] sm:$0xf0] }
 0x663   : > { %v2239_v57 = vpop.trf.xlu2 }
 0x664   : > { %2323 = vmatmul.bf16.vlgmr.msra.gmra.mxu1 %v2239_v57  ;;  %v4407_v57 = vld [vmem:[%s5123_s21 + $0xe4] sm:$0xf] }
 0x673   : > { %v2240_v14 = vpop.trf.xlu2 }
 0x674   : > { %2328 = vmatmul.bf16.gmra.mxu1 %v2240_v14  ;;  %v4197_v14 = vor.u32 %v4409_v36, %v4196_v49  ;;  %v4393_v49 = vld [vmem:[%s5123_s21 + $0x6c] sm:$0xf0]  ;;  %v4391_v36 = vld [vmem:[%s5123_s21 + $0x64] sm:$0xf] }
 0x676   : > { %2742 = vmatpush.bf16.msra.mxu2 %v4197_v14  ;;  %v4134_v14 = vld [vmem:[%s5123_s21 + $0x70] sm:$0xf0] }
 0x683   : > { %v2241_v44 = vpop.trf.xlu2 }
 0x684   : > { %2333 = vmatmul.bf16.gmra.mxu1 %v2241_v44  ;;  %v4198_v44 = vld [vmem:[%s5123_s21 + $0xf0] sm:$0xf0] }
 0x693   : > { %v2242_v41 = vpop.trf.xlu2 }
 0x694   : > { %2338 = vmatmul.bf16.gmra.mxu1 %v2242_v41  ;;  %v4204_v41 = vld [vmem:[%s5123_s21 + $0xe8] sm:$0xf] }
 0x6e1   : > { %v2324_v38 = vpop.f32.mrf.mxu1 }
 0x6e2   : > { %v2325_v31 = vadd.f32 %v4572_v50, %v2324_v38  ;;  %v4201_v38 = vor.u32 %v4407_v57, %v4198_v44  ;;  %v4140_v44 = vld [vmem:[%s5123_s21 + $0x68] sm:$0xf] }
 0x6e4   : > { %v5885_v19 = vadd.f32 %v4802_v16, %v2325_v31  ;;  %v4408_v16 = vld [vmem:[%s5123_s21 + $0xec] sm:$0xf]  ;;  %2771 = vmatpush.bf16.msrb.mxu3 %v4201_v38 }
 0x6e6   : > { %2354 = vadd.xlane.f32.xlu1 %v5885_v19 }
 0x6e9   : > { %v2326_v20 = vpop.f32.mrf.mxu1 }
 0x6ea   : > { %v2327_v6 = vadd.f32 %v4572_v50, %v2326_v20  ;;  %v4206_v20 = vld [vmem:[%s5123_s21 + $0xf8] sm:$0xf0] }
 0x6ec   : > { %v5888_v5 = vadd.f32 %v4803_v22, %v2327_v6  ;;  %v4209_v6 = vor.u32 %v4408_v16, %v4206_v20  ;;  %v4180_v22 = vld [vmem:[%s5123_s21 + $0xc0] sm:$0xf]  ;;  %v4142_v16 = vld [vmem:[%s5123_s21 + $0x78] sm:$0xf0] }
 0x6ee   : > { %2356 = vadd.xlane.f32.xlu0 %v5888_v5  ;;  %2829 = vmatpush.bf16.msrb.mxu1 %v4209_v6  ;;  %v4116_v6 = vld [vmem:[%s5123_s21 + $0x40] sm:$0xf] }
 0x6f1   : > { %v2329_v2 = vpop.f32.mrf.mxu1 }
 0x6f2   : > { %v2330_v15 = vadd.f32 %v4572_v50, %v2329_v2  ;;  %v4405_v2 = vld [vmem:[%s5123_s21 + $0xcc] sm:$0xf0] }
 0x6f4   : > { %v5891_v61 = vadd.f32 %v4804_v33, %v2330_v15  ;;  %v4403_v15 = vld [vmem:[%s5123_s21 + $0xc4] sm:$0xf]  ;;  %v4181_v33 = vor.u32 %v4405_v2, %v4180_v22  ;;  %v4389_v22 = vld [vmem:[%s5123_s21 + $0x4c] sm:$0xf0] }
 0x6f5   : > { %v4387_v2 = vld [vmem:[%s5123_s21 + $0x44] sm:$0xf] }
 0x6f6   : > { %2358 = vadd.xlane.f32.xlu1 %v5891_v61  ;;  %2743 = vmatpush.bf16.msra.mxu2 %v4181_v33  ;;  %v4118_v33 = vld [vmem:[%s5123_s21 + $0x50] sm:$0xf0] }
 0x6f9   : > { %v2331_v3 = vpop.f32.mrf.mxu1 }
 0x6fa   : > { %v2332_v58 = vadd.f32 %v4572_v50, %v2331_v3  ;;  %v4182_v3 = vld [vmem:[%s5123_s21 + $0xd0] sm:$0xf0] }
 0x6fc   : > { %v5894_v37 = vadd.f32 %v4805_v51, %v2332_v58  ;;  %v4188_v58 = vld [vmem:[%s5123_s21 + $0xc8] sm:$0xf]  ;;  %v4406_v51 = vld [vmem:[%s5123_s21 + $0xd4] sm:$0xf0] }
 0x6fe   : > { %2360 = vadd.xlane.f32.xlu0 %v5894_v37 }
 0x701   : > { %v2334_v53 = vpop.f32.mrf.mxu1 }
 0x702   : > { %v2335_v30 = vadd.f32 %v4572_v50, %v2334_v53  ;;  %v4185_v53 = vor.u32 %v4403_v15, %v4182_v3  ;;  %v4117_v15 = vor.u32 %v4389_v22, %v4116_v6  ;;  %v4124_v3 = vld [vmem:[%s5123_s21 + $0x48] sm:$0xf] }
 0x704   : > { %v5897_v24 = vadd.f32 %v4806_v1, %v2335_v30  ;;  %v4189_v30 = vor.u32 %v4406_v51, %v4188_v58  ;;  %v4404_v1 = vld [vmem:[%s5123_s21 + $0xcc] sm:$0xf]  ;;  %2772 = vmatpush.bf16.msrb.mxu3 %v4185_v53  ;;  %v4390_v58 = vld [vmem:[%s5123_s21 + $0x54] sm:$0xf0]  ;;  %v4121_v51 = vor.u32 %v4387_v2, %v4118_v33 }
 0x705   : > { %v4125_v53 = vor.u32 %v4390_v58, %v4124_v3 }
 0x706   : > { %2362 = vadd.xlane.f32.xlu1 %v5897_v24 }
 0x709   : > { %v2336_v8 = vpop.f32.mrf.mxu1 }
 0x70a   : > { %v2337_v59 = vadd.f32 %v4572_v50, %v2336_v8  ;;  %v4190_v8 = vld [vmem:[%s5123_s21 + $0xd8] sm:$0xf0] }
 0x70c   : > { %v5900_v34 = vadd.f32 %v4807_v54, %v2337_v59  ;;  %v4193_v59 = vor.u32 %v4404_v1, %v4190_v8  ;;  %v4164_v54 = vld [vmem:[%s5123_s21 + $0xa0] sm:$0xf]  ;;  %v4126_v1 = vld [vmem:[%s5123_s21 + $0x58] sm:$0xf0] }
 0x70e   : > { %2364 = vadd.xlane.f32.xlu0 %v5900_v34  ;;  %2830 = vmatpush.bf16.msrb.mxu1 %v4193_v59  ;;  %v4100_v59 = vld [vmem:[%s5123_s21 + $0x20] sm:$0xf] }
 0x711   : > { %v2339_v55 = vpop.f32.mrf.mxu1 }
 0x712   : > { %v2340_v43 = vadd.f32 %v4572_v50, %v2339_v55 }
 0x714   : > { %v5913_v17 = vadd.f32 %v4808_v52, %v2340_v43  ;;  %v4172_v43 = vld [vmem:[%s5123_s21 + $0xa8] sm:$0xf] }
 0x719   : > { %v2341_v39 = vpop.f32.mrf.mxu1 }
 0x71a   : > { %v2342_v25 = vadd.f32 %v4572_v50, %v2341_v39  ;;  %v4410_v50 = vld [vmem:[%s5123_s21 + $0xf4] sm:$0xf0]  ;;  %v4174_v39 = vld [vmem:[%s5123_s21 + $0xb8] sm:$0xf0] }
 0x71b   : > { %v4205_v31 = vor.u32 %v4410_v50, %v4204_v41  ;;  %v4394_v41 = vld [vmem:[%s5123_s21 + $0x74] sm:$0xf0]  ;;  %v4137_v50 = vor.u32 %v4391_v36, %v4134_v14 }
 0x71c   : > { %v5922_v0 = vadd.f32 %v4809_v56, %v2342_v25  ;;  %v4397_v25 = vld [vmem:[%s5123_s21 + $0x8c] sm:$0xf0]  ;;  %v4395_v56 = vld [vmem:[%s5123_s21 + $0x84] sm:$0xf]  ;;  %v4141_v38 = vor.u32 %v4394_v41, %v4140_v44 }
 0x71d   : > { %2800 = vmatpush.bf16.msrb.mxu0 %v4205_v31  ;;  %v4392_v31 = vld [vmem:[%s5123_s21 + $0x6c] sm:$0xf] }
 0x71e   : > { %v4145_v20 = vor.u32 %v4392_v31, %v4142_v16 }
 0x721   : > { %2801 = vmatpush.bf16.msrb.mxu0 %v4189_v30  ;;  %v4388_v30 = vld [vmem:[%s5123_s21 + $0x4c] sm:$0xf] }
 0x722   : > { %v4129_v8 = vor.u32 %v4388_v30, %v4126_v1 }
 0x759   : > { %v2355_v21 = vpop.xlane.xlu1 %2354 }
 0x75a   : > { %v2370_v18 = vmul.f32 %v2355_v21, %v5193_v42  ;;  %v4401_v21 = vld [vmem:[%s5123_s21 + $0xac] sm:$0xf0] }
 0x75b   : > { %v4165_v55 = vor.u32 %v4401_v21, %v4164_v54  ;;  %v4385_v54 = vld [vmem:[%s5123_s21 + $0x2c] sm:$0xf0]  ;;  %v4383_v21 = vld [vmem:[%s5123_s21 + $0x24] sm:$0xf] }
 0x75c   : > { %v5905_v48 = vsub.f32 %v5885_v19, %v2370_v18  ;;  %v4399_v18 = vld [vmem:[%s5123_s21 + $0xa4] sm:$0xf] }
 0x75d   : > { %2744 = vmatpush.bf16.msra.mxu2 %v4165_v55  ;;  %v4102_v55 = vld [vmem:[%s5123_s21 + $0x30] sm:$0xf0] }
 0x75e   : > { %v2386_v63 = vmul.f32 %v5905_v48, %v5905_v48 }
 0x760   : > { %2394 = vadd.xlane.f32.xlu1 %v2386_v63  ;;  %v4166_v63 = vld [vmem:[%s5123_s21 + $0xb0] sm:$0xf0] }
 0x761   : > { %v2357_v40 = vpop.xlane.xlu0 %2356 }
 0x762   : > { %v2371_v27 = vmul.f32 %v2357_v40, %v5193_v42  ;;  %v4402_v40 = vld [vmem:[%s5123_s21 + $0xb4] sm:$0xf0] }
 0x763   : > { %v4173_v52 = vor.u32 %v4402_v40, %v4172_v43  ;;  %v4386_v43 = vld [vmem:[%s5123_s21 + $0x34] sm:$0xf0] }
 0x764   : > { %v5911_v13 = vsub.f32 %v5888_v5, %v2371_v27  ;;  %v4169_v27 = vor.u32 %v4399_v18, %v4166_v63  ;;  %v4101_v18 = vor.u32 %v4385_v54, %v4100_v59  ;;  %v4108_v63 = vld [vmem:[%s5123_s21 + $0x28] sm:$0xf] }
 0x765   : > { %2802 = vmatpush.bf16.msrb.mxu0 %v4173_v52  ;;  %v4109_v52 = vor.u32 %v4386_v43, %v4108_v63 }
 0x766   : > { %v2387_v45 = vmul.f32 %v5911_v13, %v5911_v13  ;;  %2773 = vmatpush.bf16.msrb.mxu3 %v4169_v27  ;;  %v4105_v27 = vor.u32 %v4383_v21, %v4102_v55 }
 0x768   : > { %2396 = vadd.xlane.f32.xlu0 %v2387_v45  ;;  %2366 = vadd.xlane.f32.xlu1 %v5913_v17  ;;  %v4400_v45 = vld [vmem:[%s5123_s21 + $0xac] sm:$0xf] }
 0x769   : > { %v2359_v10 = vpop.xlane.xlu1 %2358 }
 0x76a   : > { %v2372_v11 = vmul.f32 %v2359_v10, %v5193_v42  ;;  %v4177_v10 = vor.u32 %v4400_v45, %v4174_v39  ;;  %v4384_v45 = vld [vmem:[%s5123_s21 + $0x2c] sm:$0xf]  ;;  %v4110_v39 = vld [vmem:[%s5123_s21 + $0x38] sm:$0xf0] }
 0x76c   : > { %v5920_v29 = vsub.f32 %v5891_v61, %v2372_v11  ;;  %v4148_v11 = vld [vmem:[%s5123_s21 + $0x80] sm:$0xf]  ;;  %2831 = vmatpush.bf16.msrb.mxu1 %v4177_v10 }
 0x76e   : > { %v2388_v12 = vmul.f32 %v5920_v29, %v5920_v29 }
 0x770   : > { %2368 = vadd.xlane.f32.xlu0 %v5922_v0  ;;  %2398 = vadd.xlane.f32.xlu1 %v2388_v12  ;;  %v4149_v12 = vor.u32 %v4397_v25, %v4148_v11  ;;  %v4113_v11 = vor.u32 %v4384_v45, %v4110_v39  ;;  %v4084_v25 = vld [vmem:[%s5123_s21] sm:$0xf] }
 0x771   : > { %v2361_v46 = vpop.xlane.xlu0 %2360 }
 0x772   : > { %v2373_v7 = vmul.f32 %v2361_v46, %v5193_v42  ;;  %v4150_v46 = vld [vmem:[%s5123_s21 + $0x90] sm:$0xf0]  ;;  %2745 = vmatpush.bf16.msra.mxu2 %v4149_v12  ;;  %v4379_v12 = vld [vmem:[%s5123_s21 + $0x4] sm:$0xf] }
 0x774   : > { %v5929_v35 = vsub.f32 %v5894_v37, %v2373_v7  ;;  %v4156_v7 = vld [vmem:[%s5123_s21 + $0x88] sm:$0xf] }
 0x776   : > { %v2389_v47 = vmul.f32 %v5929_v35, %v5929_v35 }
 0x778   : > { %2400 = vadd.xlane.f32.xlu0 %v2389_v47  ;;  %v4398_v47 = vld [vmem:[%s5123_s21 + $0x94] sm:$0xf0] }
 0x779   : > { %v2363_v62 = vpop.xlane.xlu1 %2362 }
 0x77a   : > { %v2374_v26 = vmul.f32 %v2363_v62, %v5193_v42  ;;  %v4153_v62 = vor.u32 %v4395_v56, %v4150_v46  ;;  %v4381_v56 = vld [vmem:[%s5123_s21 + $0xc] sm:$0xf0] }
 0x77c   : > { %v5935_v32 = vsub.f32 %v5897_v24, %v2374_v26  ;;  %v4157_v26 = vor.u32 %v4398_v47, %v4156_v7  ;;  %2774 = vmatpush.bf16.msrb.mxu3 %v4153_v62  ;;  %v4085_v7 = vor.u32 %v4381_v56, %v4084_v25  ;;  %v4086_v47 = vld [vmem:[%s5123_s21 + $0x10] sm:$0xf0]  ;;  %v4092_v62 = vld [vmem:[%s5123_s21 + $0x8] sm:$0xf] }
 0x77e   : > { %v2390_v28 = vmul.f32 %v5935_v32, %v5935_v32  ;;  %2803 = vmatpush.bf16.msrb.mxu0 %v4157_v26  ;;  %v4089_v26 = vor.u32 %v4379_v12, %v4086_v47 }
 0x780   : > { %2402 = vadd.xlane.f32.xlu1 %v2390_v28  ;;  %v4396_v28 = vld [vmem:[%s5123_s21 + $0x8c] sm:$0xf]  ;;  %2775 = vmatpush.bf16.msrb.mxu3 %v4137_v50 }
 0x781   : > { %v2365_v23 = vpop.xlane.xlu0 %2364 }
 0x782   : > { %v2375_v60 = vmul.f32 %v2365_v23, %v5193_v42  ;;  %v4158_v23 = vld [vmem:[%s5123_s21 + $0x98] sm:$0xf0]  ;;  %2804 = vmatpush.bf16.msrb.mxu0 %v4141_v38 }
 0x784   : > { %v5941_v9 = vsub.f32 %v5900_v34, %v2375_v60  ;;  %v4161_v60 = vor.u32 %v4396_v28, %v4158_v23  ;;  %2776 = vmatpush.bf16.msrb.mxu3 %v4121_v51  ;;  %v4382_v28 = vld [vmem:[%s5123_s21 + $0x14] sm:$0xf0]  ;;  %v4380_v23 = vld [vmem:[%s5123_s21 + $0xc] sm:$0xf] }
 0x786   : > { %v2391_v4 = vmul.f32 %v5941_v9, %v5941_v9  ;;  %2832 = vmatpush.bf16.msrb.mxu1 %v4161_v60  ;;  %2805 = vmatpush.bf16.msrb.mxu0 %v4125_v53  ;;  %v4094_v60 = vld [vmem:[%s5123_s21 + $0x18] sm:$0xf0] }
 0x788   : > { %2404 = vadd.xlane.f32.xlu0 %v2391_v4  ;;  %v4132_v4 = vld [vmem:[%s5123_s21 + $0x60] sm:$0xf]  ;;  %2777 = vmatpush.bf16.msrb.mxu3 %v4105_v27 }
 0x789   : > { %v4133_v57 = vor.u32 %v4393_v49, %v4132_v4  ;;  %v4093_v4 = vor.u32 %v4382_v28, %v4092_v62  ;;  %v4097_v49 = vor.u32 %v4380_v23, %v4094_v60 }
 0x78a   : > { %2833 = vmatpush.bf16.msrb.mxu1 %v4145_v20  ;;  %2806 = vmatpush.bf16.msrb.mxu0 %v4109_v52  ;;  %v6031_v52 = vld [vmem:[%s618_s23] ss:$0 sm:$0xff] }
 0x78b   : > { %2746 = vmatpush.bf16.msra.mxu2 %v4133_v57 }
 0x78c   : > { %2778 = vmatpush.bf16.msrb.mxu3 %v4089_v26 }
 0x78e   : > { %2834 = vmatpush.bf16.msrb.mxu1 %v4129_v8  ;;  %2807 = vmatpush.bf16.msrb.mxu0 %v4093_v4 }
 0x78f   : > { %2747 = vmatpush.bf16.msra.mxu2 %v4117_v15 }
 0x792   : > { %2835 = vmatpush.bf16.msrb.mxu1 %v4113_v11 }
 0x793   : > { %2748 = vmatpush.bf16.msra.mxu2 %v4101_v18 }
 0x796   : > { %2836 = vmatpush.bf16.msrb.mxu1 %v4097_v49 }
 0x797   : > { %2749 = vmatpush.bf16.msra.mxu2 %v4085_v7 }
 0x7d3   : > { %v2395_v40 = vpop.xlane.xlu1 %2394 }
 0x7d4   : > { %v2410_v10 = vmul.f32 %v2395_v40, %v5193_v42 }
 0x7d6   : > { %v2418_v46 = vadd.f32 1e-05, %v2410_v10 }
 0x7d8   : > { %4722 = vrsqrt.f32 %v2418_v46  ;;  %vm2432_vm14 = vweird.f32 %v2418_v46 }
 0x7db   : > { %v2397_v36 = vpop.xlane.xlu0 %2396  ;;  %v2367_v57 = vpop.xlane.xlu1 %2366 }
 0x7dc   : > { %v2411_v14 = vmul.f32 %v2397_v36, %v5193_v42  ;;  %v2376_v44 = vmul.f32 %v2367_v57, %v5193_v42 }
 0x7de   : > { %v4723_v41 = vpop.eup %4722  ;;  %v2419_v50 = vadd.f32 1e-05, %v2411_v14  ;;  %v6013_v38 = vsub.f32 %v5913_v17, %v2376_v44 }
 0x7df   : > { %v2427_v31 = vmul.f32 %v4723_v41, %v2418_v46  ;;  %vm2433_vm13 = vweird.f32 %v4723_v41 }
 0x7e0   : > { %4724 = vrsqrt.f32 %v2419_v50  ;;  %v2392_v16 = vmul.f32 %v6013_v38, %v6013_v38  ;;  %vm2434_vm15 = vmor %vm2432_vm14, %vm2433_vm13  ;;  %vm2442_vm1 = vweird.f32 %v2419_v50 }
 0x7e1   : > { %v2428_v20 = vmul.f32 %v4723_v41, %v2427_v31 }
 0x7e2   : > { %2406 = vadd.xlane.f32.xlu1 %v2392_v16 }
 0x7e3   : > { %v2429_v6 = vmul.f32 0.5, %v2428_v20  ;;  %v2369_v22 = vpop.xlane.xlu0 %2368  ;;  %v2399_v2 = vpop.xlane.xlu1 %2398 }
 0x7e4   : > { %v2377_v15 = vmul.f32 %v2369_v22, %v5193_v42  ;;  %v2412_v33 = vmul.f32 %v2399_v2, %v5193_v42 }
 0x7e5   : > { %v2430_v3 = vsub.f32 1.5, %v2429_v6 }
 0x7e6   : > { %v4725_v58 = vpop.eup %4724  ;;  %v6020_v51 = vsub.f32 %v5922_v0, %v2377_v15  ;;  %v2420_v53 = vadd.f32 1e-05, %v2412_v33 }
 0x7e7   : > { %v2431_v30 = vmul.f32 %v4723_v41, %v2430_v3  ;;  %v2437_v1 = vmul.f32 %v4725_v58, %v2419_v50  ;;  %vm2443_vm0 = vweird.f32 %v4725_v58 }
 0x7e8   : > { %4726 = vrsqrt.f32 %v2420_v53  ;;  %v2393_v8 = vmul.f32 %v6020_v51, %v6020_v51  ;;  %vm2444_vm2 = vmor %vm2442_vm1, %vm2443_vm0  ;;  %vm2452_vm4 = vweird.f32 %v2420_v53 }
 0x7e9   : > { %v2438_v59 = vmul.f32 %v4725_v58, %v2437_v1  ;;  %v2435_v54 = vsel %vm2434_vm15, %v4723_v41, %v2431_v30 }
 0x7ea   : > { %2408 = vadd.xlane.f32.xlu0 %v2393_v8  ;;  %v2506_v40 = vmul.f32 %v2435_v54, %v5905_v48  ;;  %v6040_v48 = vld [vmem:[%s6526_s19] ss:$0 sm:$0xff] }
 0x7eb   : > { %v2439_v21 = vmul.f32 0.5, %v2438_v59  ;;  %v2401_v18 = vpop.xlane.xlu0 %2400 }
 0x7ec   : > { %v2413_v55 = vmul.f32 %v2401_v18, %v5193_v42  ;;  %v2517_v56 = vmul.f32 %v6031_v52, %v2506_v40 }
 0x7ed   : > { %v2440_v63 = vsub.f32 1.5, %v2439_v21 }
 0x7ee   : > { %v4727_v43 = vpop.eup %4726  ;;  %v2421_v27 = vadd.f32 1e-05, %v2413_v55  ;;  %v2528_v23 = vadd.f32 %v6040_v48, %v2517_v56 }
 0x7ef   : > { %v2441_v45 = vmul.f32 %v4725_v58, %v2440_v63  ;;  %v2447_v39 = vmul.f32 %v4727_v43, %v2420_v53  ;;  %vm2453_vm3 = vweird.f32 %v4727_v43 }
 0x7f0   : > { %4728 = vrsqrt.f32 %v2421_v27  ;;  %vm2454_vm5 = vmor %vm2452_vm4, %vm2453_vm3  ;;  %vm2462_vm7 = vweird.f32 %v2421_v27 }
 0x7f1   : > { %v2445_v10 = vsel %vm2444_vm2, %v4725_v58, %v2441_v45  ;;  %v2448_v11 = vmul.f32 %v4727_v43, %v2447_v39 }
 0x7f2   : > { %v2507_v25 = vmul.f32 %v2445_v10, %v5911_v13 }
 0x7f3   : > { %v2449_v12 = vmul.f32 0.5, %v2448_v11  ;;  %v2403_v46 = vpop.xlane.xlu1 %2402 }
 0x7f4   : > { %v2414_v7 = vmul.f32 %v2403_v46, %v5193_v42  ;;  %v2518_v47 = vmul.f32 %v6031_v52, %v2507_v25  ;;  %v4434_v46 = vld [vmem:[%s5134_s14 + $0xb8] sm:$0xff] }
 0x7f5   : > { %v2450_v62 = vsub.f32 1.5, %v2449_v12  ;;  %3480 = vmatpush.bf16.msra.mxu0 %v4434_v46 }
 0x7f6   : > { %v4729_v26 = vpop.eup %4728  ;;  %v2422_v28 = vadd.f32 1e-05, %v2414_v7  ;;  %v2529_v13 = vadd.f32 %v6040_v48, %v2518_v47  ;;  %v4442_v7 = vld [vmem:[%s5134_s14 + $0xf8] sm:$0xff] }
 0x7f7   : > { %v2451_v60 = vmul.f32 %v4727_v43, %v2450_v62  ;;  %v2457_v4 = vmul.f32 %v4729_v26, %v2421_v27  ;;  %vm2463_vm6 = vweird.f32 %v4729_v26  ;;  %3509 = vmatpush.bf16.msra.mxu1 %v4442_v7 }
 0x7f8   : > { %4730 = vrsqrt.f32 %v2422_v28  ;;  %v2536_v49 = vpack.c.bf16 %v2529_v13, %v2528_v23  ;;  %vm2464_vm8 = vmor %vm2462_vm7, %vm2463_vm6  ;;  %vm2472_vm10 = vweird.f32 %v2422_v28 }
 0x7f9   : > { %v2458_v36 = vmul.f32 %v4729_v26, %v2457_v4  ;;  %v2455_v57 = vsel %vm2454_vm5, %v4727_v43, %v2451_v60  ;;  %v4418_v4 = vld [vmem:[%s5134_s14 + $0x38] sm:$0xff] }
 0x7fa   : > { %2750 = vmatmul.bf16.vlgmr.msra.gmra.mxu2 %v2536_v49  ;;  %2779 = vmatmul.bf16.vlgmr.msrb.gmra.mxu3 %v2536_v49  ;;  %v2508_v16 = vmul.f32 %v2455_v57, %v5920_v29  ;;  %v4432_v57 = vld [vmem:[%s5134_s14 + $0xa8] sm:$0xff] }
 0x7fb   : > { %v2459_v14 = vmul.f32 0.5, %v2458_v36  ;;  %2808 = vmatmul.bf16.vlgmr.msrb.gmra.mxu0 %v2536_v49  ;;  %2837 = vmatmul.bf16.vlgmr.msrb.gmra.mxu1 %v2536_v49  ;;  %v2405_v44 = vpop.xlane.xlu0 %2404  ;;  %v4426_v49 = vld [vmem:[%s5134_s14 + $0x78] sm:$0xff] }
 0x7fc   : > { %v2415_v41 = vmul.f32 %v2405_v44, %v5193_v42  ;;  %v2519_v3 = vmul.f32 %v6031_v52, %v2508_v16  ;;  %3422 = vmatpush.bf16.msrb.mxu2 %v4418_v4  ;;  %3451 = vmatpush.bf16.msra.mxu3 %v4426_v49  ;;  %v4431_v16 = vld [vmem:[%s5134_s14 + $0xa0] sm:$0xff] }
 0x7fd   : > { %v2460_v50 = vsub.f32 1.5, %v2459_v14  ;;  %v4440_v14 = vld [vmem:[%s5134_s14 + $0xe8] sm:$0xff] }
 0x7fe   : > { %v4731_v31 = vpop.eup %4730  ;;  %v2423_v20 = vadd.f32 1e-05, %v2415_v41  ;;  %v2530_v8 = vadd.f32 %v6040_v48, %v2519_v3  ;;  %v4417_v41 = vld [vmem:[%s5134_s14 + $0x30] sm:$0xff] }
 0x7ff   : > { %v2461_v6 = vmul.f32 %v4729_v26, %v2460_v50  ;;  %v2467_v22 = vmul.f32 %v4731_v31, %v2422_v28  ;;  %vm2473_vm9 = vweird.f32 %v4731_v31  ;;  %v4441_v28 = vld [vmem:[%s5134_s14 + $0xf0] sm:$0xff] }
 0x800   : > { %4732 = vrsqrt.f32 %v2423_v20  ;;  %vm2474_vm11 = vmor %vm2472_vm10, %vm2473_vm9  ;;  %vm2482_vm13 = vweird.f32 %v2423_v20  ;;  %3510 = vmatpush.bf16.msra.mxu1 %v4441_v28  ;;  %v4425_v50 = vld [vmem:[%s5134_s14 + $0x70] sm:$0xff]  ;;  %3423 = vmatpush.bf16.msrb.mxu2 %v4417_v41  ;;  %v4412_v28 = vld [vmem:[%s5134_s14 + $0x8] sm:$0xff] }
 0x801   : > { %v2465_v2 = vsel %vm2464_vm8, %v4729_v26, %v2461_v6  ;;  %v2468_v15 = vmul.f32 %v4731_v31, %v2467_v22  ;;  %v4433_v26 = vld [vmem:[%s5134_s14 + $0xb0] sm:$0xff]  ;;  %3452 = vmatpush.bf16.msra.mxu3 %v4425_v50  ;;  %v4419_v41 = vld [vmem:[%s5134_s14 + $0x40] sm:$0xff] }
 0x802   : > { %v2509_v33 = vmul.f32 %v2465_v2, %v5929_v35  ;;  %3481 = vmatpush.bf16.msra.mxu0 %v4433_v26 }
 0x803   : > { %v2469_v58 = vmul.f32 0.5, %v2468_v15  ;;  %v4416_v15 = vld [vmem:[%s5134_s14 + $0x28] sm:$0xff] }
 0x804   : > { %v2520_v53 = vmul.f32 %v6031_v52, %v2509_v33  ;;  %3511 = vmatpush.bf16.msra.mxu1 %v4440_v14  ;;  %v4424_v33 = vld [vmem:[%s5134_s14 + $0x68] sm:$0xff]  ;;  %3424 = vmatpush.bf16.msrb.mxu2 %v4416_v15 }
 0x805   : > { %v2470_v30 = vsub.f32 1.5, %v2469_v58  ;;  %3453 = vmatpush.bf16.msra.mxu3 %v4424_v33  ;;  %v4430_v58 = vld [vmem:[%s5134_s14 + $0x98] sm:$0xff] }
 0x806   : > { %v4733_v1 = vpop.eup %4732  ;;  %v2531_v29 = vadd.f32 %v6040_v48, %v2520_v53  ;;  %3482 = vmatpush.bf16.msra.mxu0 %v4432_v57  ;;  %v4438_v53 = vld [vmem:[%s5134_s14 + $0xd8] sm:$0xff] }
 0x807   : > { %v2471_v59 = vmul.f32 %v4731_v31, %v2470_v30  ;;  %v2477_v54 = vmul.f32 %v4733_v1, %v2423_v20  ;;  %vm2483_vm12 = vweird.f32 %v4733_v1  ;;  %v4439_v20 = vld [vmem:[%s5134_s14 + $0xe0] sm:$0xff] }
 0x808   : > { %v2537_v21 = vpack.c.bf16 %v2531_v29, %v2530_v8  ;;  %vm2484_vm14 = vmor %vm2482_vm13, %vm2483_vm12  ;;  %3512 = vmatpush.bf16.msra.mxu1 %v4439_v20  ;;  %v4415_v8 = vld [vmem:[%s5134_s14 + $0x20] sm:$0xff] }
 0x809   : > { %v2478_v18 = vmul.f32 %v4733_v1, %v2477_v54  ;;  %v2475_v35 = vsel %vm2474_vm11, %v4731_v31, %v2471_v59  ;;  %v4423_v29 = vld [vmem:[%s5134_s14 + $0x60] sm:$0xff]  ;;  %3425 = vmatpush.bf16.msrb.mxu2 %v4415_v8  ;;  %v4429_v54 = vld [vmem:[%s5134_s14 + $0x90] sm:$0xff] }
 0x80a   : > { %2755 = vmatmul.bf16.gmra.mxu2 %v2537_v21  ;;  %2784 = vmatmul.bf16.gmra.mxu3 %v2537_v21  ;;  %v2510_v43 = vmul.f32 %v2475_v35, %v5935_v32 }
 0x80b   : > { %v2479_v55 = vmul.f32 0.5, %v2478_v18  ;;  %2813 = vmatmul.bf16.gmra.mxu0 %v2537_v21  ;;  %2842 = vmatmul.bf16.gmra.mxu1 %v2537_v21  ;;  %v4437_v21 = vld [vmem:[%s5134_s14 + $0xd0] sm:$0xff] }
 0x80c   : > { %v2521_v39 = vmul.f32 %v6031_v52, %v2510_v43  ;;  %3483 = vmatpush.bf16.msra.mxu0 %v4431_v16  ;;  %3513 = vmatpush.bf16.msra.mxu1 %v4438_v53  ;;  %v2572_v43 = vld [vmem:[%s5129_s26] sm:$0xf] }
 0x80d   : > { %v2480_v63 = vsub.f32 1.5, %v2479_v55  ;;  %3454 = vmatpush.bf16.msra.mxu3 %v4423_v29  ;;  %v4414_v55 = vld [vmem:[%s5134_s14 + $0x18] sm:$0xff] }
 0x80e   : > { %v2532_v11 = vadd.f32 %v6040_v48, %v2521_v39  ;;  %3426 = vmatpush.bf16.msrb.mxu2 %v4414_v55 }
 0x80f   : > { %v2481_v40 = vmul.f32 %v4733_v1, %v2480_v63  ;;  %v4422_v63 = vld [vmem:[%s5134_s14 + $0x58] sm:$0xff] }
 0x810   : > { %3484 = vmatpush.bf16.msra.mxu0 %v4430_v58  ;;  %3514 = vmatpush.bf16.msra.mxu1 %v4437_v21 }
 0x811   : > { %v2485_v27 = vsel %vm2484_vm14, %v4733_v1, %v2481_v40  ;;  %3455 = vmatpush.bf16.msra.mxu3 %v4422_v63 }
 0x812   : > { %v2511_v45 = vmul.f32 %v2485_v27, %v5941_v9  ;;  %v4428_v27 = vld [vmem:[%s5134_s14 + $0x88] sm:$0xff] }
 0x814   : > { %v2522_v10 = vmul.f32 %v6031_v52, %v2511_v45  ;;  %3485 = vmatpush.bf16.msra.mxu0 %v4429_v54  ;;  %v4436_v45 = vld [vmem:[%s5134_s14 + $0xc8] sm:$0xff] }
 0x815   : > { %3515 = vmatpush.bf16.msra.mxu1 %v4436_v45 }
 0x816   : > { %v2533_v25 = vadd.f32 %v6040_v48, %v2522_v10  ;;  %v6089_v10 = vperm.slane %v2572_v43, 2 }
 0x818   : > { %v2538_v56 = vpack.c.bf16 %v2533_v25, %v2532_v11  ;;  %v6091_v11 = vperm.slane %v2572_v43, 3  ;;  %3486 = vmatpush.bf16.msra.mxu0 %v4428_v27  ;;  %v4413_v25 = vld [vmem:[%s5134_s14 + $0x10] sm:$0xff] }
 0x819   : > { %3427 = vmatpush.bf16.msrb.mxu2 %v4413_v25 }
 0x81a   : > { %2760 = vmatmul.bf16.gmra.mxu2 %v2538_v56  ;;  %2789 = vmatmul.bf16.gmra.mxu3 %v2538_v56 }
 0x81b   : > { %2818 = vmatmul.bf16.gmra.mxu0 %v2538_v56  ;;  %2847 = vmatmul.bf16.gmra.mxu1 %v2538_v56  ;;  %v4421_v56 = vld [vmem:[%s5134_s14 + $0x50] sm:$0xff] }
 0x81c   : > { %3456 = vmatpush.bf16.msra.mxu3 %v4421_v56 }
 0x81d   : > { %3428 = vmatpush.bf16.msrb.mxu2 %v4412_v28 }
 0x855   : > { %v2407_v32 = vpop.xlane.xlu1 %2406 }
 0x856   : > { %v2416_v12 = vmul.f32 %v2407_v32, %v5193_v42 }
 0x858   : > { %v2424_v9 = vadd.f32 1e-05, %v2416_v12  ;;  %v4427_v12 = vld [vmem:[%s5134_s14 + $0x80] sm:$0xff] }
 0x859   : > { %3487 = vmatpush.bf16.msra.mxu0 %v4427_v12 }
 0x85a   : > { %4734 = vrsqrt.f32 %v2424_v9  ;;  %vm2492_vm0 = vweird.f32 %v2424_v9 }
 0x85d   : > { %v2409_v47 = vpop.xlane.xlu0 %2408 }
 0x85e   : > { %v2417_v62 = vmul.f32 %v2409_v47, %v5193_v42 }
 0x860   : > { %v4735_v23 = vpop.eup %4734  ;;  %v2425_v13 = vadd.f32 1e-05, %v2417_v62 }
 0x861   : > { %v2487_v60 = vmul.f32 %v4735_v23, %v2424_v9  ;;  %vm2493_vm15 = vweird.f32 %v4735_v23  ;;  %v4435_v9 = vld [vmem:[%s5134_s14 + $0xc0] sm:$0xff] }
 0x862   : > { %4736 = vrsqrt.f32 %v2425_v13  ;;  %vm2494_vm1 = vmor %vm2492_vm0, %vm2493_vm15  ;;  %vm2502_vm3 = vweird.f32 %v2425_v13  ;;  %3516 = vmatpush.bf16.msra.mxu1 %v4435_v9 }
 0x863   : > { %v2488_v36 = vmul.f32 %v4735_v23, %v2487_v60  ;;  %v6108_v60 = vperm.slane %v2572_v43, 1 }
 0x865   : > { %v2489_v44 = vmul.f32 0.5, %v2488_v36 }
 0x867   : > { %v2490_v31 = vsub.f32 1.5, %v2489_v44  ;;  %v4411_v44 = vld [vmem:[%s5134_s14] sm:$0xff] }
 0x868   : > { %v4737_v6 = vpop.eup %4736  ;;  %3429 = vmatpush.bf16.msrb.mxu2 %v4411_v44 }
 0x869   : > { %v2491_v22 = vmul.f32 %v4735_v23, %v2490_v31  ;;  %v2497_v2 = vmul.f32 %v4737_v6, %v2425_v13  ;;  %vm2503_vm2 = vweird.f32 %v4737_v6  ;;  %v6106_v13 = vperm.slane %v2572_v43, 0 }
 0x86a   : > { %vm2504_vm4 = vmor %vm2502_vm3, %vm2503_vm2 }
 0x86b   : > { %v2498_v3 = vmul.f32 %v4737_v6, %v2497_v2  ;;  %v2495_v30 = vsel %vm2494_vm1, %v4735_v23, %v2491_v22  ;;  %v4420_v23 = vld [vmem:[%s5134_s14 + $0x48] sm:$0xff] }
 0x86c   : > { %v2512_v18 = vmul.f32 %v2495_v30, %v6013_v38  ;;  %3457 = vmatpush.bf16.msra.mxu3 %v4420_v23 }
 0x86d   : > { %v2499_v1 = vmul.f32 0.5, %v2498_v3 }
 0x86e   : > { %v2523_v38 = vmul.f32 %v6031_v52, %v2512_v18 }
 0x86f   : > { %v2500_v59 = vsub.f32 1.5, %v2499_v1 }
 0x870   : > { %v2534_v7 = vadd.f32 %v6040_v48, %v2523_v38  ;;  %3458 = vmatpush.bf16.msra.mxu3 %v4419_v41 }
 0x871   : > { %v2501_v35 = vmul.f32 %v4737_v6, %v2500_v59 }
 0x873   : > { %v2505_v40 = vsel %vm2504_vm4, %v4737_v6, %v2501_v35 }
 0x874   : > { %v2513_v39 = vmul.f32 %v2505_v40, %v6020_v51 }
 0x876   : > { %v2524_v32 = vmul.f32 %v6031_v52, %v2513_v39 }
 0x878   : > { %v2809_v46 = vpop.f32.mrf.mxu0  ;;  %v2838_v51 = vpop.f32.mrf.mxu1  ;;  %v2535_v47 = vadd.f32 %v6040_v48, %v2524_v32 }
 0x879   : > { %v2810_v62 = vadd.f32 %v2809_v46, %v6089_v10  ;;  %v6102_v26 = vadd.f32 %v2838_v51, %v6091_v11 }
 0x87a   : > { %v2539_v52 = vpack.c.bf16 %v2535_v47, %v2534_v7 }
 0x87b   : > { %v2892_v4 = vmul.f32 0.044715, %v2810_v62  ;;  %v2893_v49 = vmul.f32 0.044715, %v6102_v26  ;;  %v2860_v51 = vmul.f32 0.5, %v2810_v62  ;;  %v2861_v23 = vmul.f32 0.5, %v6102_v26 }
 0x87c   : > { %2765 = vmatmul.bf16.gmra.mxu2 %v2539_v52  ;;  %2794 = vmatmul.bf16.gmra.mxu3 %v2539_v52 }
 0x87d   : > { %v2924_v48 = vmul.f32 %v2892_v4, %v2810_v62  ;;  %v2925_v36 = vmul.f32 %v2893_v49, %v6102_v26  ;;  %2823 = vmatmul.bf16.gmra.mxu0 %v2539_v52  ;;  %2852 = vmatmul.bf16.gmra.mxu1 %v2539_v52  ;;  %v2751_v57 = vpop.f32.mrf.mxu2  ;;  %v2780_v14 = vpop.f32.mrf.mxu3 }
 0x87e   : > { %v2752_v50 = vadd.f32 %v2751_v57, %v6106_v13  ;;  %v2781_v31 = vadd.f32 %v2780_v14, %v6108_v60 }
 0x87f   : > { %v2956_v16 = vmul.f32 %v2924_v48, %v2810_v62  ;;  %v2957_v20 = vmul.f32 %v2925_v36, %v6102_v26 }
 0x880   : > { %v2890_v6 = vmul.f32 0.044715, %v2752_v50  ;;  %v2891_v22 = vmul.f32 0.044715, %v2781_v31  ;;  %v2811_v2 = vpop.f32.mrf.mxu0  ;;  %v2840_v15 = vpop.f32.mrf.mxu1  ;;  %v6129_v48 = vmul.f32 0.5, %v2752_v50 }
 0x881   : > { %v2988_v33 = vadd.f32 %v2956_v16, %v2810_v62  ;;  %v2989_v3 = vadd.f32 %v2957_v20, %v6102_v26  ;;  %v2812_v58 = vadd.f32 %v2811_v2, %v6089_v10  ;;  %v2841_v53 = vadd.f32 %v2840_v15, %v6091_v11 }
 0x882   : > { %v2922_v30 = vmul.f32 %v2890_v6, %v2752_v50  ;;  %v2923_v1 = vmul.f32 %v2891_v22, %v2781_v31  ;;  %v6132_v6 = vmul.f32 0.5, %v2781_v31 }
 0x883   : > { %v3020_v8 = vmul.f32 0.7978846, %v2988_v33  ;;  %v2896_v54 = vmul.f32 0.044715, %v2812_v58  ;;  %v2897_v21 = vmul.f32 0.044715, %v2841_v53 }
 0x884   : > { %v2954_v29 = vmul.f32 %v2922_v30, %v2752_v50  ;;  %v2955_v59 = vmul.f32 %v2923_v1, %v2781_v31  ;;  %v3021_v18 = vmul.f32 0.7978846, %v2989_v3  ;;  %v2864_v26 = vmul.f32 0.5, %v2812_v58 }
 0x885   : > { %v2753_v35 = vpop.f32.mrf.mxu2  ;;  %v2782_v55 = vpop.f32.mrf.mxu3  ;;  %v2928_v40 = vmul.f32 %v2896_v54, %v2812_v58  ;;  %4738 = vtanh.f32 %v3020_v8  ;;  %v2929_v27 = vmul.f32 %v2897_v21, %v2841_v53  ;;  %v2865_v30 = vmul.f32 0.5, %v2841_v53 }
 0x886   : > { %v2986_v63 = vadd.f32 %v2954_v29, %v2752_v50  ;;  %v2987_v43 = vadd.f32 %v2955_v59, %v2781_v31  ;;  %v2754_v45 = vadd.f32 %v2753_v35, %v6106_v13  ;;  %v2783_v39 = vadd.f32 %v2782_v55, %v6108_v60 }
 0x887   : > { %v2960_v25 = vmul.f32 %v2928_v40, %v2812_v58  ;;  %4740 = vtanh.f32 %v3021_v18  ;;  %v2961_v9 = vmul.f32 %v2929_v27, %v2841_v53 }
 0x888   : > { %v3018_v38 = vmul.f32 0.7978846, %v2986_v63  ;;  %v2814_v56 = vpop.f32.mrf.mxu0  ;;  %v2843_v32 = vpop.f32.mrf.mxu1  ;;  %v3019_v12 = vmul.f32 0.7978846, %v2987_v43  ;;  %v2894_v46 = vmul.f32 0.044715, %v2754_v45 }
 0x889   : > { %v2992_v7 = vadd.f32 %v2960_v25, %v2812_v58  ;;  %v2895_v47 = vmul.f32 0.044715, %v2783_v39  ;;  %v6123_v28 = vadd.f32 %v2814_v56, %v6089_v10  ;;  %v2993_v52 = vadd.f32 %v2961_v9, %v2841_v53 }
 0x88a   : > { %v2926_v4 = vmul.f32 %v2894_v46, %v2754_v45  ;;  %v6127_v49 = vadd.f32 %v2843_v32, %v6091_v11  ;;  %4742 = vtanh.f32 %v3018_v38  ;;  %v2862_v59 = vmul.f32 0.5, %v2754_v45 }
 0x88b   : > { %v3024_v36 = vmul.f32 0.7978846, %v2992_v7  ;;  %v2927_v57 = vmul.f32 %v2895_v47, %v2783_v39  ;;  %v4739_v14 = vpop.eup %4738  ;;  %4744 = vtanh.f32 %v3019_v12  ;;  %v3025_v62 = vmul.f32 0.7978846, %v2993_v52 }
 0x88c   : > { %v2958_v44 = vmul.f32 %v2926_v4, %v2754_v45  ;;  %v2900_v41 = vmul.f32 0.044715, %v6123_v28  ;;  %v2901_v15 = vmul.f32 0.044715, %v6127_v49  ;;  %v3084_v3 = vadd.f32 1.0, %v4739_v14 }
 0x88d   : > { %v2756_v16 = vpop.f32.mrf.mxu2  ;;  %v2785_v20 = vpop.f32.mrf.mxu3  ;;  %4746 = vtanh.f32 %v3024_v36  ;;  %v2959_v22 = vmul.f32 %v2927_v57, %v2783_v39  ;;  %v2863_v55 = vmul.f32 0.5, %v2783_v39 }
 0x88e   : > { %v4741_v2 = vpop.eup %4740  ;;  %4748 = vtanh.f32 %v3025_v62  ;;  %v2990_v50 = vadd.f32 %v2958_v44, %v2754_v45  ;;  %v6136_v33 = vadd.f32 %v2756_v16, %v6106_v13  ;;  %v6139_v8 = vadd.f32 %v2785_v20, %v6108_v60 }
 0x88f   : > { %v2991_v1 = vadd.f32 %v2959_v22, %v2783_v39  ;;  %v2932_v54 = vmul.f32 %v2900_v41, %v6123_v28  ;;  %v3085_v35 = vadd.f32 1.0, %v4741_v2  ;;  %v2933_v40 = vmul.f32 %v2901_v15, %v6127_v49 }
 0x890   : > { %v2816_v29 = vpop.f32.mrf.mxu0  ;;  %v2845_v31 = vpop.f32.mrf.mxu1  ;;  %v3022_v58 = vmul.f32 0.7978846, %v2990_v50  ;;  %v2898_v27 = vmul.f32 0.044715, %v6136_v33  ;;  %v2899_v25 = vmul.f32 0.044715, %v6139_v8  ;;  %v3116_v32 = vmul.f32 %v3084_v3, %v2860_v51 }
 0x891   : > { %v6143_v21 = vadd.f32 %v2816_v29, %v6089_v10  ;;  %v4743_v18 = vpop.eup %4742  ;;  %v3023_v63 = vmul.f32 0.7978846, %v2991_v1  ;;  %v6146_v43 = vadd.f32 %v2845_v31, %v6091_v11  ;;  %v2964_v52 = vmul.f32 %v2932_v54, %v6123_v28 }
 0x892   : > { %v4745_v53 = vpop.eup %4744  ;;  %4750 = vtanh.f32 %v3022_v58  ;;  %v3082_v12 = vadd.f32 1.0, %v4743_v18  ;;  %v3117_v14 = vmul.f32 %v3085_v35, %v2861_v23  ;;  %v2930_v62 = vmul.f32 %v2898_v27, %v6136_v33 }
 0x893   : > { %v2904_v45 = vmul.f32 0.044715, %v6143_v21  ;;  %v4747_v38 = vpop.eup %4746  ;;  %4752 = vtanh.f32 %v3023_v63  ;;  %v2905_v56 = vmul.f32 0.044715, %v6146_v43  ;;  %v3083_v4 = vadd.f32 1.0, %v4745_v53 }
 0x894   : > { %v4749_v39 = vpop.eup %4748  ;;  %v3088_v9 = vadd.f32 1.0, %v4747_v38  ;;  %v6164_v16 = vmul.f32 %v2899_v25, %v6139_v8  ;;  %v2996_v15 = vadd.f32 %v2964_v52, %v6123_v28  ;;  %v3114_v29 = vmul.f32 %v3082_v12, %v6129_v48 }
 0x895   : > { %v2936_v46 = vmul.f32 %v2904_v45, %v6143_v21  ;;  %v2758_v7 = vpop.f32.mrf.mxu2  ;;  %v2787_v47 = vpop.f32.mrf.mxu3  ;;  %v3089_v36 = vadd.f32 1.0, %v4749_v39  ;;  %v2937_v20 = vmul.f32 %v2905_v56, %v6146_v43  ;;  %v3115_v53 = vmul.f32 %v3083_v4, %v6132_v6 }
 0x896   : > { %v6156_v57 = vadd.f32 %v2758_v7, %v6106_v13  ;;  %v6160_v44 = vadd.f32 %v2787_v47, %v6108_v60  ;;  %v3120_v51 = vmul.f32 %v3088_v9, %v2864_v26  ;;  %v2965_v27 = vmul.f32 %v2933_v40, %v6127_v49 }
 0x897   : > { %v2968_v41 = vmul.f32 %v2936_v46, %v6143_v21  ;;  %v3121_v50 = vmul.f32 %v3089_v36, %v2865_v30  ;;  %v3028_v45 = vmul.f32 0.7978846, %v2996_v15  ;;  %v2969_v25 = vmul.f32 %v2937_v20, %v6146_v43 }
 0x898   : > { %v2819_v22 = vpop.f32.mrf.mxu0  ;;  %v2848_v2 = vpop.f32.mrf.mxu1  ;;  %v2902_v23 = vmul.f32 0.044715, %v6156_v57  ;;  %v3148_v1 = vpack.c.bf16 %v3120_v51, %v3116_v32  ;;  %v2903_v63 = vmul.f32 0.044715, %v6160_v44  ;;  %v2868_v9 = vmul.f32 0.5, %v6123_v28 }
 0x899   : > { %v4751_v3 = vpop.eup %4750  ;;  %v3000_v26 = vadd.f32 %v2968_v41, %v6143_v21  ;;  %v6172_v54 = vadd.f32 %v2819_v22, %v6089_v10  ;;  %v6175_v18 = vadd.f32 %v2848_v2, %v6091_v11  ;;  %v3149_v35 = vpack.c.bf16 %v3121_v50, %v3117_v14 }
 0x89a   : > { %v4753_v31 = vpop.eup %4752  ;;  %v3086_v58 = vadd.f32 1.0, %v4751_v3  ;;  %3488 = vmatmul.bf16.vlgmr.msra.gmra.mxu0 %v3148_v1  ;;  %v2934_v56 = vmul.f32 %v2902_v23, %v6156_v57  ;;  %v2997_v46 = vadd.f32 %v2965_v27, %v6127_v49  ;;  %4754 = vtanh.f32 %v3028_v45 }
 0x89b   : > { %v3087_v30 = vadd.f32 1.0, %v4753_v31  ;;  %3517 = vmatmul.bf16.vlgmr.msra.gmra.mxu1 %v3149_v35  ;;  %v3032_v38 = vmul.f32 0.7978846, %v3000_v26  ;;  %v2908_v7 = vmul.f32 0.044715, %v6172_v54  ;;  %v3001_v47 = vadd.f32 %v2969_v25, %v6146_v43 }
 0x89c   : > { %v3118_v48 = vmul.f32 %v3086_v58, %v2862_v59  ;;  %v2909_v6 = vmul.f32 0.044715, %v6175_v18  ;;  %v3029_v52 = vmul.f32 0.7978846, %v2997_v46  ;;  %v2935_v4 = vmul.f32 %v2903_v63, %v6160_v44 }
 0x89d   : > { %v2761_v32 = vpop.f32.mrf.mxu2  ;;  %v2790_v39 = vpop.f32.mrf.mxu3  ;;  %v3119_v12 = vmul.f32 %v3087_v30, %v2863_v55  ;;  %4756 = vtanh.f32 %v3032_v38  ;;  %v2872_v14 = vmul.f32 0.5, %v6143_v21  ;;  %v2869_v51 = vmul.f32 0.5, %v6127_v49 }
 0x89e   : > { %v3146_v40 = vpack.c.bf16 %v3118_v48, %v3114_v29  ;;  %v6189_v36 = vadd.f32 %v2761_v32, %v6106_v13  ;;  %v6194_v41 = vadd.f32 %v2790_v39, %v6108_v60  ;;  %v3033_v22 = vmul.f32 0.7978846, %v3001_v47 }
 0x89f   : > { %v3147_v59 = vpack.c.bf16 %v3119_v12, %v3115_v53  ;;  %4758 = vtanh.f32 %v3029_v52  ;;  %v2873_v50 = vmul.f32 0.5, %v6146_v43  ;;  %v2962_v15 = vmul.f32 %v2930_v62, %v6136_v33 }
 0x8a0   : > { %v2821_v55 = vpop.f32.mrf.mxu0  ;;  %v2850_v28 = vpop.f32.mrf.mxu1  ;;  %3430 = vmatmul.bf16.vlgmr.msrb.gmra.mxu2 %v3146_v40  ;;  %v2966_v21 = vmul.f32 %v2934_v56, %v6156_v57  ;;  %v2940_v49 = vmul.f32 %v2908_v7, %v6172_v54  ;;  %v2941_v3 = vmul.f32 %v2909_v6, %v6175_v18  ;;  %4760 = vtanh.f32 %v3033_v22 }
 0x8a1   : > { %v6197_v20 = vadd.f32 %v2821_v55, %v6089_v10  ;;  %3459 = vmatmul.bf16.vlgmr.msra.gmra.mxu3 %v3147_v59  ;;  %v6200_v2 = vadd.f32 %v2850_v28, %v6091_v11  ;;  %v4755_v1 = vpop.eup %4754  ;;  %v2906_v29 = vmul.f32 0.044715, %v6189_v36  ;;  %v2994_v26 = vadd.f32 %v2962_v15, %v6136_v33 }
 0x8a2   : > { %v2998_v31 = vadd.f32 %v2966_v21, %v6156_v57  ;;  %v2963_v43 = vmul.f32 %v6164_v16, %v6139_v8  ;;  %v2907_v58 = vmul.f32 0.044715, %v6194_v41  ;;  %v3092_v30 = vadd.f32 1.0, %v4755_v1 }
 0x8a3   : > { %v2912_v23 = vmul.f32 0.044715, %v6197_v20  ;;  %v4757_v62 = vpop.eup %4756  ;;  %v6215_v63 = vmul.f32 0.5, %v6136_v33  ;;  %v2967_v53 = vmul.f32 %v2935_v4, %v6160_v44  ;;  %v2913_v27 = vmul.f32 0.044715, %v6200_v2 }
 0x8a4   : > { %v3096_v45 = vadd.f32 1.0, %v4757_v62  ;;  %v3026_v38 = vmul.f32 0.7978846, %v2994_v26  ;;  %v3030_v32 = vmul.f32 0.7978846, %v2998_v31  ;;  %v2995_v39 = vadd.f32 %v2963_v43, %v6139_v8 }
 0x8a5   : > { %v2763_v35 = vpop.f32.mrf.mxu2  ;;  %v4759_v25 = vpop.eup %4758  ;;  %v2944_v16 = vmul.f32 %v2912_v23, %v6197_v20  ;;  %v2999_v12 = vadd.f32 %v2967_v53, %v6160_v44  ;;  %v3124_v46 = vmul.f32 %v3092_v30, %v2868_v9  ;;  %v2870_v59 = vmul.f32 0.5, %v6156_v57 }
 0x8a6   : > { %v6220_v48 = vadd.f32 %v2763_v35, %v6106_v13  ;;  %v2792_v56 = vpop.f32.mrf.mxu3  ;;  %v3128_v7 = vmul.f32 %v3096_v45, %v2872_v14  ;;  %v3093_v6 = vadd.f32 1.0, %v4759_v25  ;;  %v4761_v40 = vpop.eup %4760  ;;  %4762 = vtanh.f32 %v3026_v38 }
 0x8a7   : > { %v3027_v47 = vmul.f32 0.7978846, %v2995_v39  ;;  %v3031_v52 = vmul.f32 0.7978846, %v2999_v12  ;;  %v2945_v4 = vmul.f32 %v2913_v27, %v6200_v2  ;;  %v6229_v55 = vadd.f32 %v2792_v56, %v6108_v60 }
 0x8a8   : > { %v2910_v33 = vmul.f32 0.044715, %v6220_v48  ;;  %v3152_v28 = vpack.c.bf16 %v3128_v7, %v3124_v46  ;;  %v3097_v22 = vadd.f32 1.0, %v4761_v40  ;;  %v2938_v15 = vmul.f32 %v2906_v29, %v6189_v36 }
 0x8a9   : > { %4764 = vtanh.f32 %v3030_v32  ;;  %v2972_v9 = vmul.f32 %v2940_v49, %v6172_v54  ;;  %v3125_v14 = vmul.f32 %v3093_v6, %v2869_v51  ;;  %v2976_v23 = vmul.f32 %v2944_v16, %v6197_v20 }
 0x8aa   : > { %v2942_v21 = vmul.f32 %v2910_v33, %v6220_v48  ;;  %3493 = vmatmul.bf16.gmra.mxu0 %v3152_v28  ;;  %v3129_v57 = vmul.f32 %v3097_v22, %v2873_v50  ;;  %4766 = vtanh.f32 %v3027_v47  ;;  %v2939_v1 = vmul.f32 %v2907_v58, %v6194_v41 }
 0x8ab   : > { %4768 = vtanh.f32 %v3031_v52  ;;  %v3004_v26 = vadd.f32 %v2972_v9, %v6172_v54  ;;  %v2973_v31 = vmul.f32 %v2941_v3, %v6175_v18  ;;  %v2911_v29 = vmul.f32 0.044715, %v6229_v55 }
 0x8ac   : > { %v3153_v43 = vpack.c.bf16 %v3129_v57, %v3125_v14  ;;  %v3008_v62 = vadd.f32 %v2976_v23, %v6197_v20  ;;  %v2977_v49 = vmul.f32 %v2945_v4, %v6200_v2  ;;  %v4763_v35 = vpop.eup %4762  ;;  %v2867_v51 = vmul.f32 0.5, %v6139_v8 }
 0x8ad   : > { %v3036_v50 = vmul.f32 0.7978846, %v3004_v26  ;;  %v3005_v30 = vadd.f32 %v2973_v31, %v6175_v18  ;;  %v2970_v58 = vmul.f32 %v2938_v15, %v6189_v36  ;;  %v3090_v53 = vadd.f32 1.0, %v4763_v35 }
 0x8ae   : > { %3522 = vmatmul.bf16.gmra.mxu1 %v3153_v43  ;;  %v3040_v27 = vmul.f32 0.7978846, %v3008_v62  ;;  %v3009_v3 = vadd.f32 %v2977_v49, %v6200_v2  ;;  %v2974_v45 = vmul.f32 %v2942_v21, %v6220_v48  ;;  %v2871_v25 = vmul.f32 0.5, %v6160_v44 }
 0x8af   : > { %v4765_v38 = vpop.eup %4764  ;;  %4770 = vtanh.f32 %v3036_v50  ;;  %v3037_v16 = vmul.f32 0.7978846, %v3005_v30  ;;  %v3002_v56 = vadd.f32 %v2970_v58, %v6189_v36  ;;  %v2943_v32 = vmul.f32 %v2911_v29, %v6229_v55 }
 0x8b0   : > { %v4767_v8 = vpop.eup %4766  ;;  %v3094_v39 = vadd.f32 1.0, %v4765_v38  ;;  %4772 = vtanh.f32 %v3040_v27  ;;  %v3041_v12 = vmul.f32 0.7978846, %v3009_v3  ;;  %v3006_v7 = vadd.f32 %v2974_v45, %v6220_v48 }
 0x8b1   : > { %v4769_v33 = vpop.eup %4768  ;;  %v3091_v46 = vadd.f32 1.0, %v4767_v8  ;;  %4774 = vtanh.f32 %v3037_v16  ;;  %v3034_v6 = vmul.f32 0.7978846, %v3002_v56  ;;  %v3122_v40 = vmul.f32 %v3090_v53, %v6215_v63 }
 0x8b2   : > { %v3126_v47 = vmul.f32 %v3094_v39, %v2870_v59  ;;  %v3095_v44 = vadd.f32 1.0, %v4769_v33  ;;  %4776 = vtanh.f32 %v3041_v12  ;;  %v3038_v52 = vmul.f32 0.7978846, %v3006_v7 }
 0x8b3   : > { %4778 = vtanh.f32 %v3034_v6  ;;  %v2971_v4 = vmul.f32 %v2939_v1, %v6194_v41  ;;  %v3123_v22 = vmul.f32 %v3091_v46, %v2867_v51  ;;  %v2975_v21 = vmul.f32 %v2943_v32, %v6229_v55 }
 0x8b4   : > { %v3150_v28 = vpack.c.bf16 %v3126_v47, %v3122_v40  ;;  %v3127_v15 = vmul.f32 %v3095_v44, %v2871_v25  ;;  %4780 = vtanh.f32 %v3038_v52  ;;  %v2876_v31 = vmul.f32 0.5, %v6172_v54 }
 0x8b5   : > { %v4771_v9 = vpop.eup %4770  ;;  %v3003_v14 = vadd.f32 %v2971_v4, %v6194_v41  ;;  %v3007_v59 = vadd.f32 %v2975_v21, %v6229_v55  ;;  %v2880_v1 = vmul.f32 0.5, %v6197_v20  ;;  %v2877_v49 = vmul.f32 0.5, %v6175_v18 }
 0x8b6   : > { %v4773_v57 = vpop.eup %4772  ;;  %3435 = vmatmul.bf16.gmra.mxu2 %v3150_v28  ;;  %v3151_v23 = vpack.c.bf16 %v3127_v15, %v3123_v22  ;;  %v3100_v63 = vadd.f32 1.0, %v4771_v9  ;;  %v2881_v35 = vmul.f32 0.5, %v6200_v2  ;;  %v2878_v38 = vmul.f32 0.5, %v6220_v48 }
 0x8b7   : > { %v4775_v26 = vpop.eup %4774  ;;  %v3104_v29 = vadd.f32 1.0, %v4773_v57  ;;  %v3035_v43 = vmul.f32 0.7978846, %v3003_v14  ;;  %v3039_v50 = vmul.f32 0.7978846, %v3007_v59  ;;  %v2874_v2 = vmul.f32 0.5, %v6189_v36 }
 0x8b8   : > { %v4777_v62 = vpop.eup %4776  ;;  %3464 = vmatmul.bf16.gmra.mxu3 %v3151_v23  ;;  %v3101_v51 = vadd.f32 1.0, %v4775_v26  ;;  %v3132_v58 = vmul.f32 %v3100_v63, %v2876_v31  ;;  %v2875_v33 = vmul.f32 0.5, %v6194_v41  ;;  %v2879_v46 = vmul.f32 0.5, %v6229_v55 }
 0x8b9   : > { %v4779_v30 = vpop.eup %4778  ;;  %v3136_v53 = vmul.f32 %v3104_v29, %v2880_v1  ;;  %v3105_v27 = vadd.f32 1.0, %v4777_v62  ;;  %4782 = vtanh.f32 %v3035_v43 }
 0x8ba   : > { %4784 = vtanh.f32 %v3039_v50  ;;  %v4781_v3 = vpop.eup %4780  ;;  %v3133_v45 = vmul.f32 %v3101_v51, %v2877_v49  ;;  %v3098_v25 = vadd.f32 1.0, %v4779_v30 }
 0x8bb   : > { %v3156_v54 = vpack.c.bf16 %v3136_v53, %v3132_v58  ;;  %v3137_v20 = vmul.f32 %v3105_v27, %v2881_v35  ;;  %v3102_v16 = vadd.f32 1.0, %v4781_v3 }
 0x8bc   : > { %v3130_v39 = vmul.f32 %v3098_v25, %v2874_v2 }
 0x8bd   : > { %3498 = vmatmul.bf16.gmra.mxu0 %v3156_v54  ;;  %v3157_v18 = vpack.c.bf16 %v3137_v20, %v3133_v45  ;;  %v3134_v56 = vmul.f32 %v3102_v16, %v2878_v38 }
 0x8bf   : > { %v4783_v8 = vpop.eup %4782  ;;  %3527 = vmatmul.bf16.gmra.mxu1 %v3157_v18  ;;  %v3154_v6 = vpack.c.bf16 %v3134_v56, %v3130_v39 }
 0x8c0   : > { %v4785_v32 = vpop.eup %4784  ;;  %v3099_v12 = vadd.f32 1.0, %v4783_v8 }
 0x8c1   : > { %v3103_v7 = vadd.f32 1.0, %v4785_v32 }
 0x8c2   : > { %v3131_v40 = vmul.f32 %v3099_v12, %v2875_v33 }
 0x8c3   : > { %v3135_v48 = vmul.f32 %v3103_v7, %v2879_v46 }
 0x8c5   : > { %v3155_v47 = vpack.c.bf16 %v3135_v48, %v3131_v40 }
 0x8c6   : > { %3440 = vmatmul.bf16.gmra.mxu2 %v3154_v6 }
 0x8c8   : > { %3469 = vmatmul.bf16.gmra.mxu3 %v3155_v47 }
 0x8fa   : > { %v2824_v44 = vpop.f32.mrf.mxu0  ;;  %v2853_v52 = vpop.f32.mrf.mxu1 }
 0x8fb   : > { %v6264_v36 = vadd.f32 %v2824_v44, %v6089_v10  ;;  %v6267_v4 = vadd.f32 %v2853_v52, %v6091_v11 }
 0x8fd   : > { %v2916_v28 = vmul.f32 0.044715, %v6264_v36  ;;  %v2917_v41 = vmul.f32 0.044715, %v6267_v4 }
 0x8ff   : > { %v2948_v55 = vmul.f32 %v2916_v28, %v6264_v36  ;;  %v2949_v22 = vmul.f32 %v2917_v41, %v6267_v4  ;;  %v2766_v15 = vpop.f32.mrf.mxu2  ;;  %v2795_v21 = vpop.f32.mrf.mxu3 }
 0x900   : > { %v6274_v9 = vadd.f32 %v2766_v15, %v6106_v13  ;;  %v6277_v14 = vadd.f32 %v2795_v21, %v6108_v60 }
 0x901   : > { %v2980_v57 = vmul.f32 %v2948_v55, %v6264_v36  ;;  %v2981_v23 = vmul.f32 %v2949_v22, %v6267_v4 }
 0x902   : > { %v2914_v63 = vmul.f32 0.044715, %v6274_v9  ;;  %v2915_v59 = vmul.f32 0.044715, %v6277_v14  ;;  %v2826_v26 = vpop.f32.mrf.mxu0  ;;  %v2855_v31 = vpop.f32.mrf.mxu1 }
 0x903   : > { %v2827_v1 = vadd.f32 %v2826_v26, %v6089_v10  ;;  %v2856_v29 = vadd.f32 %v2855_v31, %v6091_v11  ;;  %v3012_v43 = vadd.f32 %v2980_v57, %v6264_v36  ;;  %v3013_v35 = vadd.f32 %v2981_v23, %v6267_v4 }
 0x904   : > { %v2946_v62 = vmul.f32 %v2914_v63, %v6274_v9  ;;  %v2947_v49 = vmul.f32 %v2915_v59, %v6277_v14  ;;  %v2884_v57 = vmul.f32 0.5, %v6264_v36  ;;  %v2885_v26 = vmul.f32 0.5, %v6267_v4 }
 0x905   : > { %v2920_v51 = vmul.f32 0.044715, %v2827_v1  ;;  %v2921_v50 = vmul.f32 0.044715, %v2856_v29  ;;  %v3044_v54 = vmul.f32 0.7978846, %v3012_v43 }
 0x906   : > { %v2978_v30 = vmul.f32 %v2946_v62, %v6274_v9  ;;  %v2979_v58 = vmul.f32 %v2947_v49, %v6277_v14  ;;  %v3045_v20 = vmul.f32 0.7978846, %v3013_v35  ;;  %v2888_v23 = vmul.f32 0.5, %v2827_v1 }
 0x907   : > { %v2952_v53 = vmul.f32 %v2920_v51, %v2827_v1  ;;  %v2953_v27 = vmul.f32 %v2921_v50, %v2856_v29  ;;  %v2768_v3 = vpop.f32.mrf.mxu2  ;;  %v2797_v10 = vpop.f32.mrf.mxu3  ;;  %4786 = vtanh.f32 %v3044_v54  ;;  %v2889_v31 = vmul.f32 0.5, %v2856_v29 }
 0x908   : > { %v2769_v11 = vadd.f32 %v2768_v3, %v6106_v13  ;;  %v2798_v45 = vadd.f32 %v2797_v10, %v6108_v60  ;;  %v3010_v38 = vadd.f32 %v2978_v30, %v6274_v9  ;;  %v3011_v18 = vadd.f32 %v2979_v58, %v6277_v14 }
 0x909   : > { %v2984_v25 = vmul.f32 %v2952_v53, %v2827_v1  ;;  %v2985_v16 = vmul.f32 %v2953_v27, %v2856_v29  ;;  %4788 = vtanh.f32 %v3045_v20  ;;  %v2882_v36 = vmul.f32 0.5, %v6274_v9 }
 0x90a   : > { %v2918_v2 = vmul.f32 0.044715, %v2769_v11  ;;  %v2919_v56 = vmul.f32 0.044715, %v2798_v45  ;;  %v3042_v39 = vmul.f32 0.7978846, %v3010_v38 }
 0x90b   : > { %v3016_v8 = vadd.f32 %v2984_v25, %v2827_v1  ;;  %v3017_v32 = vadd.f32 %v2985_v16, %v2856_v29  ;;  %v3043_v7 = vmul.f32 0.7978846, %v3011_v18  ;;  %v2886_v1 = vmul.f32 0.5, %v2769_v11 }
 0x90c   : > { %v2950_v12 = vmul.f32 %v2918_v2, %v2769_v11  ;;  %v2951_v33 = vmul.f32 %v2919_v56, %v2798_v45  ;;  %4790 = vtanh.f32 %v3042_v39  ;;  %v2883_v4 = vmul.f32 0.5, %v6277_v14  ;;  %v6304_v56 = vld [vmem:[%s638_s27] ss:$0 sm:$0xff] }
 0x90d   : > { %v3048_v46 = vmul.f32 0.7978846, %v3016_v8  ;;  %v3049_v13 = vmul.f32 0.7978846, %v3017_v32  ;;  %v4787_v47 = vpop.eup %4786  ;;  %v2887_v29 = vmul.f32 0.5, %v2798_v45 }
 0x90e   : > { %v2982_v60 = vmul.f32 %v2950_v12, %v2769_v11  ;;  %v2983_v6 = vmul.f32 %v2951_v33, %v2798_v45  ;;  %v3108_v55 = vadd.f32 1.0, %v4787_v47 }
 0x90f   : > { %4792 = vtanh.f32 %v3048_v46  ;;  %v4789_v44 = vpop.eup %4788 }
 0x910   : > { %4794 = vtanh.f32 %v3049_v13  ;;  %v3014_v40 = vadd.f32 %v2982_v60, %v2769_v11  ;;  %v3015_v48 = vadd.f32 %v2983_v6, %v2798_v45  ;;  %v3109_v15 = vadd.f32 1.0, %v4789_v44 }
 0x911   : > { %4796 = vtanh.f32 %v3043_v7  ;;  %v3140_v62 = vmul.f32 %v3108_v55, %v2884_v57 }
 0x912   : > { %v3046_v52 = vmul.f32 0.7978846, %v3014_v40  ;;  %v3047_v28 = vmul.f32 0.7978846, %v3015_v48  ;;  %v4791_v41 = vpop.eup %4790  ;;  %v3141_v35 = vmul.f32 %v3109_v15, %v2885_v26 }
 0x913   : > { %v3106_v50 = vadd.f32 1.0, %v4791_v41 }
 0x914   : > { %4798 = vtanh.f32 %v3046_v52 }
 0x915   : > { %v4793_v22 = vpop.eup %4792  ;;  %4800 = vtanh.f32 %v3047_v28  ;;  %v3138_v20 = vmul.f32 %v3106_v50, %v2882_v36 }
 0x916   : > { %v4795_v21 = vpop.eup %4794  ;;  %v3112_v63 = vadd.f32 1.0, %v4793_v22 }
 0x917   : > { %v4797_v59 = vpop.eup %4796  ;;  %v3113_v43 = vadd.f32 1.0, %v4795_v21  ;;  %v3489_v45 = vpop.f32.mrf.mxu0 }
 0x918   : > { %v3144_v49 = vmul.f32 %v3112_v63, %v2888_v23  ;;  %v3107_v53 = vadd.f32 1.0, %v4797_v59  ;;  %v3518_v32 = vpop.f32.mrf.mxu1 }
 0x919   : > { %v3145_v51 = vmul.f32 %v3113_v43, %v2889_v31 }
 0x91a   : > { %v4799_v30 = vpop.eup %4798  ;;  %v3160_v58 = vpack.c.bf16 %v3144_v49, %v3140_v62  ;;  %v3139_v25 = vmul.f32 %v3107_v53, %v2883_v4 }
 0x91b   : > { %v4801_v27 = vpop.eup %4800  ;;  %v3161_v3 = vpack.c.bf16 %v3145_v51, %v3141_v35  ;;  %v3110_v10 = vadd.f32 1.0, %v4799_v30 }
 0x91c   : > { %3503 = vmatmul.bf16.gmra.mxu0 %v3160_v58  ;;  %v3111_v54 = vadd.f32 1.0, %v4801_v27 }
 0x91d   : > { %3532 = vmatmul.bf16.gmra.mxu1 %v3161_v3  ;;  %v3142_v38 = vmul.f32 %v3110_v10, %v2886_v1 }
 0x91e   : > { %v3143_v16 = vmul.f32 %v3111_v54, %v2887_v29 }
 0x91f   : > { %v3158_v18 = vpack.c.bf16 %v3142_v38, %v3138_v20  ;;  %v3491_v6 = vpop.f32.mrf.mxu0 }
 0x920   : > { %v3159_v2 = vpack.c.bf16 %v3143_v16, %v3139_v25  ;;  %v3520_v48 = vpop.f32.mrf.mxu1 }
 0x921   : > { %3445 = vmatmul.bf16.gmra.mxu2 %v3158_v18 }
 0x922   : > { %3474 = vmatmul.bf16.gmra.mxu3 %v3159_v2 }
 0x923   : > { %v3431_v9 = vpop.f32.mrf.mxu2 }
 0x924   : > { %v3432_v14 = vadd.f32 %v6304_v56, %v3431_v9  ;;  %v3460_v11 = vpop.f32.mrf.mxu3 }
 0x926   : > { %v3461_v8 = vadd.f32 %v3460_v11, %v3432_v14 }
 0x927   : > { %v3494_v52 = vpop.f32.mrf.mxu0 }
 0x928   : > { %v3490_v39 = vadd.f32 %v3489_v45, %v3461_v8 }
 0x92a   : > { %v3519_v12 = vadd.f32 %v3518_v32, %v3490_v39 }
 0x92b   : > { %v3433_v33 = vpop.f32.mrf.mxu2  ;;  %v3523_v28 = vpop.f32.mrf.mxu1 }
 0x92c   : > { %v6308_v46 = vadd.f32 %v3519_v12, %v5885_v19  ;;  %v3434_v13 = vadd.f32 %v6304_v56, %v3433_v33  ;;  %v3462_v7 = vpop.f32.mrf.mxu3 }
 0x92e   : > { %v3463_v60 = vadd.f32 %v3462_v7, %v3434_v13 }
 0x92f   : > { %v3496_v57 = vpop.f32.mrf.mxu0 }
 0x930   : > { %v3492_v40 = vadd.f32 %v3491_v6, %v3463_v60 }
 0x932   : > { %v3521_v47 = vadd.f32 %v3520_v48, %v3492_v40 }
 0x933   : > { %v3525_v26 = vpop.f32.mrf.mxu1 }
 0x934   : > { %v6312_v44 = vadd.f32 %v3521_v47, %v5888_v5 }
 0x939   : > { %v3436_v41 = vpop.f32.mrf.mxu2 }
 0x93a   : > { %v3437_v55 = vadd.f32 %v6304_v56, %v3436_v41  ;;  %v3499_v50 = vpop.f32.mrf.mxu0 }
 0x93b   : > { %v3465_v22 = vpop.f32.mrf.mxu3 }
 0x93c   : > { %v3466_v15 = vadd.f32 %v3465_v22, %v3437_v55  ;;  %v3528_v53 = vpop.f32.mrf.mxu1 }
 0x93e   : > { %v3495_v19 = vadd.f32 %v3494_v52, %v3466_v15 }
 0x940   : > { %v3524_v21 = vadd.f32 %v3523_v28, %v3495_v19 }
 0x941   : > { %v3438_v23 = vpop.f32.mrf.mxu2 }
 0x942   : > { %v6316_v63 = vadd.f32 %v3524_v21, %v5891_v61  ;;  %v3439_v59 = vadd.f32 %v6304_v56, %v3438_v23  ;;  %v3501_v29 = vpop.f32.mrf.mxu0 }
 0x943   : > { %v3467_v31 = vpop.f32.mrf.mxu3 }
 0x944   : > { %v3468_v5 = vadd.f32 %v3467_v31, %v3439_v59 }
 0x946   : > { %v3497_v43 = vadd.f32 %v3496_v57, %v3468_v5 }
 0x948   : > { %v3526_v62 = vadd.f32 %v3525_v26, %v3497_v43 }
 0x949   : > { %v3441_v49 = vpop.f32.mrf.mxu2 }
 0x94a   : > { %v6320_v35 = vadd.f32 %v3526_v62, %v5894_v37  ;;  %v3442_v51 = vadd.f32 %v6304_v56, %v3441_v49  ;;  %v3530_v37 = vpop.f32.mrf.mxu1 }
 0x94b   : > { %v3470_v30 = vpop.f32.mrf.mxu3 }
 0x94c   : > { %v3471_v58 = vadd.f32 %v3470_v30, %v3442_v51 }
 0x94e   : > { %v3500_v27 = vadd.f32 %v3499_v50, %v3471_v58 }
 0x950   : > { %v3529_v61 = vadd.f32 %v3528_v53, %v3500_v27 }
 0x951   : > { %v3443_v3 = vpop.f32.mrf.mxu2 }
 0x952   : > { %v6324_v36 = vadd.f32 %v3529_v61, %v5897_v24  ;;  %v3444_v1 = vadd.f32 %v6304_v56, %v3443_v3 }
 0x953   : > { %v3472_v10 = vpop.f32.mrf.mxu3 }
 0x954   : > { %v3473_v4 = vadd.f32 %v3472_v10, %v3444_v1 }
 0x956   : > { %v3502_v54 = vadd.f32 %v3501_v29, %v3473_v4 }
 0x958   : > { %v3531_v20 = vadd.f32 %v3530_v37, %v3502_v54 }
 0x95a   : > { %v3543_v38 = vadd.f32 %v3531_v20, %v5900_v34 }
 0x999   : > { %v3504_v2 = vpop.f32.mrf.mxu0 }
 0x99a   : > { %v3533_v14 = vpop.f32.mrf.mxu1 }
 0x9a1   : > { %v3506_v33 = vpop.f32.mrf.mxu0 }
 0x9a2   : > { %v3535_v7 = vpop.f32.mrf.mxu1 }
 0x9a4   : > { %v3446_v25 = vpop.f32.mrf.mxu2 }
 0x9a5   : > { %v3447_v16 = vadd.f32 %v6304_v56, %v3446_v25  ;;  %v3475_v18 = vpop.f32.mrf.mxu3 }
 0x9a7   : > { %v3476_v9 = vadd.f32 %v3475_v18, %v3447_v16 }
 0x9a9   : > { %v3505_v11 = vadd.f32 %v3504_v2, %v3476_v9 }
 0x9ab   : > { %v3534_v24 = vadd.f32 %v3533_v14, %v3505_v11 }
 0x9ac   : > { %v3448_v45 = vpop.f32.mrf.mxu2 }
 0x9ad   : > { %v3544_v8 = vadd.f32 %v3534_v24, %v5913_v17  ;;  %v3449_v32 = vadd.f32 %v6304_v56, %v3448_v45  ;;  %v3477_v39 = vpop.f32.mrf.mxu3 }
 0x9af   : > { %v3478_v12 = vadd.f32 %v3477_v39, %v3449_v32 }
 0x9b1   : > { %v3507_v13 = vadd.f32 %v3506_v33, %v3478_v12  ;;  %3549 = sbr.rel (%p4338_p8) target bundleno = 2494 (0x9be), region = 88 }
 0x9b3   : > { %v3536_v34 = vadd.f32 %v3535_v7, %v3507_v13 }
 0x9b5   : > { %v3545_v60 = vadd.f32 %v3536_v34, %v5922_v0 }
 0x9b6   : > { %3550 = vst [vmem:[#allocation8] sm:$0xff] %v6308_v46 }
 0x9b7   : > { %3551 = vst [vmem:[#allocation8 + $0x8] sm:$0xff] %v6312_v44 }
 0x9b8   : > { %3552 = vst [vmem:[#allocation8 + $0x10] sm:$0xff] %v6316_v63 }
 0x9b9   : > { %3553 = vst [vmem:[#allocation8 + $0x18] sm:$0xff] %v6320_v35 }
 0x9ba   : > { %3554 = vst [vmem:[#allocation8 + $0x20] sm:$0xff] %v6324_v36 }
 0x9bb   : > { %3555 = vst [vmem:[#allocation8 + $0x28] sm:$0xff] %v3543_v38 }
 0x9bc   : > { %3556 = vst [vmem:[#allocation8 + $0x30] sm:$0xff] %v3544_v8 }
 0x9bd   : > { %3557 = vst [vmem:[#allocation8 + $0x38] sm:$0xff] %v3545_v60 }
 0x9be PF: > { %p4339_p9 = scmp.ne.s32.totalorder %s5038_s0, 1 }
 0x9bf   : > { %s6527_s27 = sld [smem:[#allocation16_spill]] (!%p4339_p9) }
 0x9c0   : > { %3561 = sbr.rel (%p4339_p9) target bundleno = 2793 (0xae9), region = 92  ;;  %s6528_s4 = sld [smem:[#allocation17_spill]] (!%p4339_p9) }
 0x9c5   : > { %3572 = vadd.xlane.f32.xlu2 %v6324_v36  ;;  %3568 = vadd.xlane.f32.xlu1 %v6316_v63 }
 0x9c6   : > { %3564 = vadd.xlane.f32.xlu0 %v6308_v46 }
 0x9cd   : > { %3574 = vadd.xlane.f32.xlu2 %v3543_v38  ;;  %3570 = vadd.xlane.f32.xlu1 %v6320_v35 }
 0x9ce   : > { %3566 = vadd.xlane.f32.xlu0 %v6312_v44 }
 0x9d5   : > { %3578 = vadd.xlane.f32.xlu1 %v3545_v60 }
 0x9d6   : > { %3576 = vadd.xlane.f32.xlu0 %v3544_v8 }
 0xa38   : > { %v3573_v17 = vpop.xlane.xlu2 %3572  ;;  %v3569_v0 = vpop.xlane.xlu1 %3568 }
 0xa39   : > { %v3582_v56 = vmul.f32 %v3569_v0, %v5193_v42  ;;  %v3565_v6 = vpop.xlane.xlu0 %3564  ;;  %v3584_v23 = vmul.f32 %v3573_v17, %v5193_v42 }
 0xa3a   : > { %v3580_v40 = vmul.f32 %v3565_v6, %v5193_v42 }
 0xa3b   : > { %v6349_v48 = vsub.f32 %v6316_v63, %v3582_v56  ;;  %v6377_v5 = vsub.f32 %v6324_v36, %v3584_v23 }
 0xa3c   : > { %v6352_v47 = vsub.f32 %v6308_v46, %v3580_v40  ;;  %v6410_v40 = vld [vmem:[%s6527_s27] ss:$0 sm:$0xff] }
 0xa3d   : > { %v3598_v52 = vmul.f32 %v6349_v48, %v6349_v48 }
 0xa3e   : > { %v3596_v28 = vmul.f32 %v6352_v47, %v6352_v47 }
 0xa3f   : > { %3608 = vadd.xlane.f32.xlu1 %v3598_v52 }
 0xa40   : > { %3604 = vadd.xlane.f32.xlu2 %v3596_v28  ;;  %v3575_v41 = vpop.xlane.xlu2 %3574  ;;  %v3571_v55 = vpop.xlane.xlu1 %3570 }
 0xa41   : > { %v3585_v22 = vmul.f32 %v3575_v41, %v5193_v42  ;;  %v3583_v15 = vmul.f32 %v3571_v55, %v5193_v42  ;;  %v3567_v19 = vpop.xlane.xlu0 %3566 }
 0xa42   : > { %v3581_v21 = vmul.f32 %v3567_v19, %v5193_v42 }
 0xa43   : > { %v6361_v57 = vsub.f32 %v3543_v38, %v3585_v22  ;;  %v6364_v46 = vsub.f32 %v6320_v35, %v3583_v15  ;;  %v3600_v35 = vmul.f32 %v6377_v5, %v6377_v5 }
 0xa44   : > { %v6368_v63 = vsub.f32 %v6312_v44, %v3581_v21  ;;  %v6420_v21 = vld [vmem:[%s6528_s4] ss:$0 sm:$0xff] }
 0xa45   : > { %v3601_v59 = vmul.f32 %v6361_v57, %v6361_v57  ;;  %v3599_v26 = vmul.f32 %v6364_v46, %v6364_v46 }
 0xa46   : > { %v3597_v31 = vmul.f32 %v6368_v63, %v6368_v63 }
 0xa47   : > { %3614 = vadd.xlane.f32.xlu1 %v3601_v59 }
 0xa48   : > { %3610 = vadd.xlane.f32.xlu2 %v3599_v26  ;;  %3606 = vadd.xlane.f32.xlu0 %v3597_v31  ;;  %v3579_v62 = vpop.xlane.xlu1 %3578 }
 0xa49   : > { %v3577_v43 = vpop.xlane.xlu0 %3576  ;;  %v3587_v51 = vmul.f32 %v3579_v62, %v5193_v42 }
 0xa4a   : > { %v3586_v44 = vmul.f32 %v3577_v43, %v5193_v42 }
 0xa4b   : > { %v6387_v30 = vsub.f32 %v3545_v60, %v3587_v51 }
 0xa4c   : > { %v6380_v49 = vsub.f32 %v3544_v8, %v3586_v44 }
 0xa4d   : > { %v3603_v58 = vmul.f32 %v6387_v30, %v6387_v30 }
 0xa4e   : > { %v3602_v50 = vmul.f32 %v6380_v49, %v6380_v49 }
 0xa50   : > { %3612 = vadd.xlane.f32.xlu0 %v3600_v35  ;;  %3616 = vadd.xlane.f32.xlu2 %v3602_v50 }
 0xa58   : > { %3618 = vadd.xlane.f32.xlu0 %v3603_v58 }
 0xab2   : > { %v3609_v53 = vpop.xlane.xlu1 %3608 }
 0xab3   : > { %v3622_v27 = vmul.f32 %v3609_v53, %v5193_v42  ;;  %v3605_v61 = vpop.xlane.xlu2 %3604 }
 0xab4   : > { %v3620_v3 = vmul.f32 %v3605_v61, %v5193_v42 }
 0xab5   : > { %v3630_v36 = vadd.f32 1e-05, %v3622_v27 }
 0xab6   : > { %v3628_v1 = vadd.f32 1e-05, %v3620_v3 }
 0xab7   : > { %4812 = vrsqrt.f32 %v3630_v36  ;;  %vm3662_vm5 = vweird.f32 %v3630_v36 }
 0xab8   : > { %4814 = vrsqrt.f32 %v3628_v1  ;;  %vm3642_vm9 = vweird.f32 %v3628_v1 }
 0xaba   : > { %v3615_v10 = vpop.xlane.xlu1 %3614 }
 0xabb   : > { %v3625_v4 = vmul.f32 %v3615_v10, %v5193_v42  ;;  %v3611_v29 = vpop.xlane.xlu2 %3610  ;;  %v3607_v54 = vpop.xlane.xlu0 %3606 }
 0xabc   : > { %v3623_v37 = vmul.f32 %v3611_v29, %v5193_v42  ;;  %v3621_v20 = vmul.f32 %v3607_v54, %v5193_v42 }
 0xabd   : > { %v4813_v38 = vpop.eup %4812  ;;  %v3633_v25 = vadd.f32 1e-05, %v3625_v4 }
 0xabe   : > { %v4815_v16 = vpop.eup %4814  ;;  %v3657_v18 = vmul.f32 %v4813_v38, %v3630_v36  ;;  %v6396_v2 = vadd.f32 1e-05, %v3623_v37  ;;  %v6398_v9 = vadd.f32 1e-05, %v3621_v20  ;;  %vm3663_vm6 = vweird.f32 %v4813_v38 }
 0xabf   : > { %v3637_v14 = vmul.f32 %v4815_v16, %v3628_v1  ;;  %4816 = vrsqrt.f32 %v3633_v25  ;;  %vm3643_vm7 = vweird.f32 %v4815_v16  ;;  %vm3664_vm8 = vmor %vm3662_vm5, %vm3663_vm6  ;;  %vm3692_vm11 = vweird.f32 %v3633_v25 }
 0xac0   : > { %v3658_v11 = vmul.f32 %v4813_v38, %v3657_v18  ;;  %4818 = vrsqrt.f32 %v6396_v2  ;;  %vm3644_vm10 = vmor %vm3642_vm9, %vm3643_vm7  ;;  %vm3672_vm13 = vweird.f32 %v6396_v2  ;;  %vm3652_vm2 = vweird.f32 %v6398_v9 }
 0xac1   : > { %v3638_v24 = vmul.f32 %v4815_v16, %v3637_v14  ;;  %4820 = vrsqrt.f32 %v6398_v9 }
 0xac2   : > { %v3659_v45 = vmul.f32 0.5, %v3658_v11 }
 0xac3   : > { %v3639_v8 = vmul.f32 0.5, %v3638_v24  ;;  %v3617_v32 = vpop.xlane.xlu2 %3616  ;;  %v3613_v39 = vpop.xlane.xlu0 %3612 }
 0xac4   : > { %v3660_v12 = vsub.f32 1.5, %v3659_v45  ;;  %v3626_v33 = vmul.f32 %v3617_v32, %v5193_v42  ;;  %v3624_v13 = vmul.f32 %v3613_v39, %v5193_v42 }
 0xac5   : > { %v4817_v7 = vpop.eup %4816  ;;  %v3640_v34 = vsub.f32 1.5, %v3639_v8 }
 0xac6   : > { %v4819_v60 = vpop.eup %4818  ;;  %v3661_v17 = vmul.f32 %v4813_v38, %v3660_v12  ;;  %v3687_v0 = vmul.f32 %v4817_v7, %v3633_v25  ;;  %v6404_v56 = vadd.f32 1e-05, %v3626_v33  ;;  %v6413_v41 = vadd.f32 1e-05, %v3624_v13 }
 0xac7   : > { %v4821_v6 = vpop.eup %4820  ;;  %v3641_v52 = vmul.f32 %v4815_v16, %v3640_v34  ;;  %v3667_v28 = vmul.f32 %v4819_v60, %v6396_v2  ;;  %vm3693_vm12 = vweird.f32 %v4817_v7  ;;  %vm3673_vm15 = vweird.f32 %v4819_v60 }
 0xac8   : > { %v3665_v55 = vsel %vm3664_vm8, %v4813_v38, %v3661_v17  ;;  %v3688_v22 = vmul.f32 %v4817_v7, %v3687_v0  ;;  %v3647_v15 = vmul.f32 %v4821_v6, %v6398_v9  ;;  %4822 = vrsqrt.f32 %v6404_v56  ;;  %vm6431_vm14 = vmor %vm3692_vm11, %vm3693_vm12 }
 0xac9   : > { %v3718_v19 = vmul.f32 %v3665_v55, %v6349_v48  ;;  %v3645_v23 = vsel %vm3644_vm10, %v4815_v16, %v3641_v52  ;;  %v3668_v59 = vmul.f32 %v4819_v60, %v3667_v28  ;;  %4824 = vrsqrt.f32 %v6413_v41  ;;  %vm3674_vm1 = vmor %vm3672_vm13, %vm3673_vm15 }
 0xaca   : > { %v3716_v26 = vmul.f32 %v3645_v23, %v6352_v47  ;;  %v3689_v31 = vmul.f32 0.5, %v3688_v22  ;;  %v3648_v43 = vmul.f32 %v4821_v6, %v3647_v15  ;;  %vm3653_vm0 = vweird.f32 %v4821_v6 }
 0xacb   : > { %v3729_v62 = vmul.f32 %v6410_v40, %v3718_v19  ;;  %v3669_v44 = vmul.f32 0.5, %v3668_v59  ;;  %v3619_v48 = vpop.xlane.xlu0 %3618  ;;  %vm3654_vm3 = vmor %vm3652_vm2, %vm3653_vm0  ;;  %vm3702_vm4 = vweird.f32 %v6404_v56  ;;  %vm3682_vm8 = vweird.f32 %v6413_v41 }
 0xacc   : > { %v3727_v35 = vmul.f32 %v6410_v40, %v3716_v26  ;;  %v3690_v51 = vsub.f32 1.5, %v3689_v31  ;;  %v3649_v50 = vmul.f32 0.5, %v3648_v43  ;;  %v3627_v58 = vmul.f32 %v3619_v48, %v5193_v42 }
 0xacd   : > { %v3740_v53 = vadd.f32 %v6420_v21, %v3729_v62  ;;  %v3670_v27 = vsub.f32 1.5, %v3669_v44 }
 0xace   : > { %v3738_v61 = vadd.f32 %v6420_v21, %v3727_v35  ;;  %v3691_v3 = vmul.f32 %v4817_v7, %v3690_v51  ;;  %v3650_v36 = vsub.f32 1.5, %v3649_v50  ;;  %v3635_v1 = vadd.f32 1e-05, %v3627_v58  ;;  %v4823_v10 = vpop.eup %4822 }
 0xacf   : > { %3748 = vst [vmem:[#allocation8 + $0x10] sm:$0xff] %v3740_v53  ;;  %v3671_v4 = vmul.f32 %v4819_v60, %v3670_v27  ;;  %v3697_v54 = vmul.f32 %v4823_v10, %v6404_v56  ;;  %v4825_v37 = vpop.eup %4824  ;;  %vm3703_vm5 = vweird.f32 %v4823_v10 }
 0xad0   : > { %3746 = vst [vmem:[#allocation8] sm:$0xff] %v3738_v61  ;;  %v3695_v42 = vsel %vm6431_vm14, %v4817_v7, %v3691_v3  ;;  %v3651_v29 = vmul.f32 %v4821_v6, %v3650_v36  ;;  %4826 = vrsqrt.f32 %v3635_v1  ;;  %v3677_v14 = vmul.f32 %v4825_v37, %v6413_v41  ;;  %vm3704_vm7 = vmor %vm3702_vm4, %vm3703_vm5 }
 0xad1   : > { %v3721_v20 = vmul.f32 %v3695_v42, %v6361_v57  ;;  %v3675_v38 = vsel %vm3674_vm1, %v4819_v60, %v3671_v4  ;;  %v3698_v18 = vmul.f32 %v4823_v10, %v3697_v54  ;;  %vm3683_vm6 = vweird.f32 %v4825_v37 }
 0xad2   : > { %v3719_v25 = vmul.f32 %v3675_v38, %v6364_v46  ;;  %v3655_v16 = vsel %vm3654_vm3, %v4821_v6, %v3651_v29  ;;  %v3678_v45 = vmul.f32 %v4825_v37, %v3677_v14  ;;  %vm3684_vm9 = vmor %vm3682_vm8, %vm3683_vm6  ;;  %vm3712_vm11 = vweird.f32 %v3635_v1 }
 0xad3   : > { %v3732_v2 = vmul.f32 %v6410_v40, %v3721_v20  ;;  %v3717_v11 = vmul.f32 %v3655_v16, %v6368_v63  ;;  %v3699_v24 = vmul.f32 0.5, %v3698_v18 }
 0xad4   : > { %v3730_v9 = vmul.f32 %v6410_v40, %v3719_v25  ;;  %v3679_v39 = vmul.f32 0.5, %v3678_v45 }
 0xad5   : > { %v3743_v57 = vadd.f32 %v6420_v21, %v3732_v2  ;;  %v3728_v8 = vmul.f32 %v6410_v40, %v3717_v11  ;;  %v3700_v32 = vsub.f32 1.5, %v3699_v24 }
 0xad6   : > { %v3741_v46 = vadd.f32 %v6420_v21, %v3730_v9  ;;  %v4827_v12 = vpop.eup %4826  ;;  %v3680_v13 = vsub.f32 1.5, %v3679_v39 }
 0xad7   : > { %3751 = vst [vmem:[#allocation8 + $0x28] sm:$0xff] %v3743_v57  ;;  %v3739_v33 = vadd.f32 %v6420_v21, %v3728_v8  ;;  %v3701_v63 = vmul.f32 %v4823_v10, %v3700_v32  ;;  %v3707_v7 = vmul.f32 %v4827_v12, %v3635_v1  ;;  %vm3713_vm10 = vweird.f32 %v4827_v12 }
 0xad8   : > { %3749 = vst [vmem:[#allocation8 + $0x18] sm:$0xff] %v3741_v46  ;;  %v3681_v60 = vmul.f32 %v4825_v37, %v3680_v13  ;;  %vm3714_vm12 = vmor %vm3712_vm11, %vm3713_vm10 }
 0xad9   : > { %3747 = vst [vmem:[#allocation8 + $0x8] sm:$0xff] %v3739_v33  ;;  %v3705_v34 = vsel %vm3704_vm7, %v4823_v10, %v3701_v63  ;;  %v3708_v17 = vmul.f32 %v4827_v12, %v3707_v7 }
 0xada   : > { %v3722_v0 = vmul.f32 %v3705_v34, %v6380_v49  ;;  %v3685_v56 = vsel %vm3684_vm9, %v4825_v37, %v3681_v60 }
 0xadb   : > { %v3709_v6 = vmul.f32 0.5, %v3708_v17  ;;  %v3720_v28 = vmul.f32 %v3685_v56, %v6377_v5 }
 0xadc   : > { %v3733_v52 = vmul.f32 %v6410_v40, %v3722_v0 }
 0xadd   : > { %v3710_v55 = vsub.f32 1.5, %v3709_v6  ;;  %v3731_v15 = vmul.f32 %v6410_v40, %v3720_v28 }
 0xade   : > { %v3744_v22 = vadd.f32 %v6420_v21, %v3733_v52 }
 0xadf   : > { %v3711_v19 = vmul.f32 %v4827_v12, %v3710_v55  ;;  %v3742_v41 = vadd.f32 %v6420_v21, %v3731_v15 }
 0xae0   : > { %3752 = vst [vmem:[#allocation8 + $0x30] sm:$0xff] %v3744_v22 }
 0xae1   : > { %v3715_v49 = vsel %vm3714_vm12, %v4827_v12, %v3711_v19  ;;  %3750 = vst [vmem:[#allocation8 + $0x20] sm:$0xff] %v3742_v41 }
 0xae2   : > { %v3723_v23 = vmul.f32 %v3715_v49, %v6387_v30 }
 0xae4   : > { %v3734_v59 = vmul.f32 %v6410_v40, %v3723_v23 }
 0xae6   : > { %v3745_v5 = vadd.f32 %v6420_v21, %v3734_v59 }
 0xae8   : > { %3753 = vst [vmem:[#allocation8 + $0x38] sm:$0xff] %v3745_v5 }
 0xae9 PF: > { %s6531_s20 = sld [smem:[#allocation18_spill]]  ;;  %s4933_s18 = smov [#allocation8]  }
 0xaea   : > { %s3759_s16 = sshll.u32 %s4933_s18, 4  ;;  %s4934_s21 = smov 128   ;;  %s3760_s16 = int_to_ptr.vmem [resolvable:$true] %s3759_s16 }
 0xaeb   : > { %s4935_s13 = smov 8  }
 0xaef   : > { %s3761_s30 = sshll.u32 %s6531_s20, 4  ;;  %s3762_s30 = int_to_ptr.hbm [resolvable:$true] %s3761_s30 }
 0xaf0   : > { %4457 = dma.vmem_to_hbm [thread:$0]  (%p4338_p8), %s3760_s16, 1024, %s3762_s30, [#allocation7], %s4934_s21, %s4934_s21, %s4935_s13  }
 0xaf1   : > { %4907 = dma.done.wait (%p4338_p8), [#allocation7], 1024  }
 0xaf2   : > { %4909 = vsyncadd (%p4338_p8), [#allocation7], 4294966272 }
 0xaf3 PF: > { %s6532_s23 = sld [smem:[#allocation13_spill]] }
 0xaf4   : > { %s6533_s20 = sld [smem:[#allocation11_spill]] }
 0xaf5   : > { %s6534_s21 = sld [smem:[#allocation12_spill]] }
 0xaf6   : > { %s6535_s22 = sld [smem:[#allocation14_spill]] }
 0xaf9   : > { %p27_p10 = scmp.ge.s32.totalorder %s6532_s23, 4  }
 0xafb   :  { %29 = sbr.rel (!%p27_p10) target bundleno = 10 (0xa), region = 155 }
 0xb00   :  { %3778 = vsyncpa [#allocation6], 1 }
 0xb01   :  { %3780 = vsyncpa [#allocation6 + $0x1], 1 }
 0xb02   :  { %3781 = vsyncpa [#allocation7], 1 }
 0xb03   :  { %3783 = vsyncpa [#allocation7 + $0x1], 1 }

</bundles_post_ra>
